<compile_context>
chip_gen: v6e
topology: v6e:2x2x1
jax: 0.10.0
libtpu: 0.0.40
codegen_flags: <defaults>
</compile_context>

<pallas_src>
import functools

import jax
import jax.numpy as jnp
from jax import lax
from jax.experimental import pallas as pl
from jax.experimental.pallas import tpu as pltpu


_TM_TARGET = 512                 # M-tile rows; TODO(synk): sweep to 1024 on v5e/v6e
_VMEM_LIMIT = 48 * 1024 * 1024   # scoped-VMEM cap, headroom under v7x's 64 MiB physical


def _pick_tm(m, target=_TM_TARGET):
    """Row tile: multiple of 8, <= target, and >= 2 grid steps whenever m >= 16 so
    v7x's two TensorCores both get work.  Grids use pl.cdiv, so tm need not divide
    m (tail block is read-padded / write-masked; all kernels are row-independent)."""
    if m <= 8:
        return m
    return max(min(target, (m // 2 // 8) * 8), 8)


def _cparams():
    return pltpu.CompilerParams(dimension_semantics=("parallel",),
                                vmem_limit_bytes=_VMEM_LIMIT)


# ----------------------------------------------------------------------------
# Pallas kernels
# ----------------------------------------------------------------------------
def _fused_mm_kernel(*refs, nb, nres):
    """out = sum_k relu((A_k @ W_k) * s_k + b_k) + sum_r R_r.

    refs layout: [a_0, w_0, s_0, b_0, ..., a_{nb-1}, ..., R_0, ..., R_{nres-1}, o].
    A/W/R are bf16; accumulation + BN/ReLU epilogue + residual adds are f32.
    """
    o_ref = refs[4 * nb + nres]
    out = None
    for k in range(nb):
        a_ref, w_ref, s_ref, b_ref = refs[4 * k:4 * k + 4]
        acc = jnp.dot(a_ref[...], w_ref[...], preferred_element_type=jnp.float32)
        br = jnp.maximum(acc * s_ref[...] + b_ref[...], 0.0)
        out = br if out is None else out + br
    for r in range(nres):
        out = out + refs[4 * nb + r][...].astype(jnp.float32)
    o_ref[...] = out.astype(o_ref.dtype)


def fused_matmul_bn_relu(branches, residuals=(), out_dtype=jnp.bfloat16):
    """branches: [(a [M,Kk] bf16, w [Kk,N], scale [N], bias [N]), ...]."""
    M = branches[0][0].shape[0]
    N = branches[0][1].shape[1]
    tm = _pick_tm(M)
    args, in_specs = [], []
    for (a, w, s, b) in branches:
        K = a.shape[1]
        args += [a.astype(jnp.bfloat16), w.astype(jnp.bfloat16),
                 s.reshape(1, N).astype(jnp.float32),
                 b.reshape(1, N).astype(jnp.float32)]
        in_specs += [
            pl.BlockSpec((tm, K), lambda i: (i, 0)),
            pl.BlockSpec((K, N), lambda i: (0, 0)),      # weights stay resident
            pl.BlockSpec((1, N), lambda i: (0, 0)),
            pl.BlockSpec((1, N), lambda i: (0, 0)),
        ]
    for r in residuals:
        args.append(r.astype(jnp.bfloat16))
        in_specs.append(pl.BlockSpec((tm, N), lambda i: (i, 0)))
    kernel = functools.partial(_fused_mm_kernel, nb=len(branches), nres=len(residuals))
    return pl.pallas_call(
        kernel,
        out_shape=jax.ShapeDtypeStruct((M, N), out_dtype),
        grid_spec=pltpu.PrefetchScalarGridSpec(
            num_scalar_prefetch=0,
            grid=(pl.cdiv(M, tm),),
            in_specs=in_specs,
            out_specs=pl.BlockSpec((tm, N), lambda i: (i, 0)),
        ),
        compiler_params=_cparams(),
    )(*args)


def _stage1_kernel(t_ref, w_ref, s_ref, b_ref, o_ref):
    """ReLU -> {strided (3,3,1) conv + BN + ReLU | (3,3,1) max-pool}, concat in-kernel.

    t_ref: [9, tm, C] bf16 pre-ReLU window taps (tap-major, lane-dense).
    w_ref: [9, C, Cout] bf16 per-tap conv weights.
    o_ref: [tm, Cout + C] bf16; cols 0:Cout conv, Cout: pool.
    """
    t = jnp.maximum(t_ref[0], 0)
    pool = t
    acc = jnp.dot(t, w_ref[0], preferred_element_type=jnp.float32)
    for k in range(1, 9):
        t = jnp.maximum(t_ref[k], 0)
        pool = jnp.maximum(pool, t)
        acc = acc + jnp.dot(t, w_ref[k], preferred_element_type=jnp.float32)
    conv = jnp.maximum(acc * s_ref[...] + b_ref[...], 0.0)
    o_ref[...] = jnp.concatenate([conv.astype(o_ref.dtype), pool], axis=-1)


def stage1_conv_pool_concat(x_ndhwc, p):
    """Fused layer1/2_1/2_2 + channel concat: returns ([M, 192+C] bf16, dims)."""
    C = x_ndhwc.shape[-1]
    cout = p['w'].shape[0]
    taps, (n, do, ho, wo) = _im2col_taps(x_ndhwc, stride=2, pad_dh=False)  # [9,M,C] bf16
    M = n * do * ho * wo
    w9 = _w_taps(p)                                              # [9, C, cout]
    s, b = _sb(p)
    tm = _pick_tm(M)
    out = pl.pallas_call(
        _stage1_kernel,
        out_shape=jax.ShapeDtypeStruct((M, cout + C), jnp.bfloat16),
        grid_spec=pltpu.PrefetchScalarGridSpec(
            num_scalar_prefetch=0,
            grid=(pl.cdiv(M, tm),),
            in_specs=[
                pl.BlockSpec((9, tm, C), lambda i: (0, i, 0)),
                pl.BlockSpec((9, C, cout), lambda i: (0, 0, 0)),
                pl.BlockSpec((1, cout), lambda i: (0, 0)),
                pl.BlockSpec((1, cout), lambda i: (0, 0)),
            ],
            out_specs=pl.BlockSpec((tm, cout + C), lambda i: (i, 0)),
        ),
        compiler_params=_cparams(),
    )(taps, w9.astype(jnp.bfloat16),
      s.reshape(1, cout).astype(jnp.float32), b.reshape(1, cout).astype(jnp.float32))
    return out, (n, do, ho, wo)


def _tap_conv_kernel(t_ref, w_ref, s_ref, b_ref, o_ref):
    """Tap-major (3,3,1) pad(1,1,0) stride-1 conv + BN + ReLU."""
    acc = jnp.dot(t_ref[0], w_ref[0], preferred_element_type=jnp.float32)
    for k in range(1, 9):
        acc = acc + jnp.dot(t_ref[k], w_ref[k], preferred_element_type=jnp.float32)
    o_ref[...] = jnp.maximum(acc * s_ref[...] + b_ref[...], 0.0).astype(o_ref.dtype)


def tap_conv_bn_relu(x_ndhwc, w9, s, b, out_dtype=jnp.bfloat16):
    """(3,3,1) pad(1,1,0) stride-1 conv from tap-major [9,M,C] taps; w9 [9,C,Nout]."""
    taps, (n, do, ho, wo) = _im2col_taps(x_ndhwc, stride=1, pad_dh=True)
    M = n * do * ho * wo
    C = taps.shape[-1]
    Nout = w9.shape[-1]
    tm = _pick_tm(M)
    return pl.pallas_call(
        _tap_conv_kernel,
        out_shape=jax.ShapeDtypeStruct((M, Nout), out_dtype),
        grid_spec=pltpu.PrefetchScalarGridSpec(
            num_scalar_prefetch=0,
            grid=(pl.cdiv(M, tm),),
            in_specs=[
                pl.BlockSpec((9, tm, C), lambda i: (0, i, 0)),
                pl.BlockSpec((9, C, Nout), lambda i: (0, 0, 0)),
                pl.BlockSpec((1, Nout), lambda i: (0, 0)),
                pl.BlockSpec((1, Nout), lambda i: (0, 0)),
            ],
            out_specs=pl.BlockSpec((tm, Nout), lambda i: (i, 0)),
        ),
        compiler_params=_cparams(),
    )(taps, w9.astype(jnp.bfloat16),
      s.reshape(1, Nout).astype(jnp.float32), b.reshape(1, Nout).astype(jnp.float32))


# ----------------------------------------------------------------------------
# JAX glue: window taps, BN folding, parameter setup
# ----------------------------------------------------------------------------
def _shifted_slice(x, kd, kh, stride, do, ho, wo):
    # x: [N, D, H, W, C] -> [N, do, ho, wo, C] at window offset (kd, kh, 0)
    N, D, H, W, C = x.shape
    return lax.slice(
        x,
        (0, kd, kh, 0, 0),
        (N, kd + stride * (do - 1) + 1, kh + stride * (ho - 1) + 1,
         stride * (wo - 1) + 1, C),
        (1, stride, stride, stride, 1))


def _im2col_taps(x, stride, pad_dh):
    # (3,3,1) window taps, tap-major bf16: [9, M, C], k = kd*3 + kh.
    x = x.astype(jnp.bfloat16)
    if pad_dh:
        x = jnp.pad(x, ((0, 0), (1, 1), (1, 1), (0, 0), (0, 0)))
    N, D, H, W, C = x.shape
    do = (D - 3) // stride + 1
    ho = (H - 3) // stride + 1
    wo = (W - 1) // stride + 1
    M = N * do * ho * wo
    cols = [_shifted_slice(x, kd, kh, stride, do, ho, wo).reshape(M, C)
            for kd in range(3) for kh in range(3)]
    return jnp.stack(cols, axis=0), (N, do, ho, wo)


def _bn_fold(conv_bias, gamma, beta, mean, var, eps=1e-5):
    s = gamma / jnp.sqrt(var + eps)
    b = (conv_bias - mean) * s + beta
    return s, b


def _sb(p):
    return _bn_fold(p['b'], p['gamma'], p['beta'], p['mean'], p['var'])


def _w_1x1(p):
    cout, cin = p['w'].shape[:2]
    return p['w'].reshape(cout, cin).T                                     # [Cin, Cout]


def _w_taps(p):
    cout, cin = p['w'].shape[:2]
    return jnp.transpose(p['w'][:, :, :, :, 0], (2, 3, 1, 0)).reshape(9, cin, cout)


def init_block(key, cin, cout, ksize):
    kw, kb, kg, kbe, km, kv = jax.random.split(key, 6)
    fan_in = cin * ksize[0] * ksize[1] * ksize[2]
    bound = 1.0 / jnp.sqrt(jnp.float32(fan_in))
    return dict(
        w=jax.random.uniform(kw, (cout, cin) + ksize, jnp.float32, -bound, bound),
        b=jax.random.uniform(kb, (cout,), jnp.float32, -bound, bound),
        gamma=jax.random.uniform(kg, (cout,), jnp.float32, 0.5, 1.5),
        beta=jax.random.uniform(kbe, (cout,), jnp.float32, -0.1, 0.1),
        mean=jax.random.uniform(km, (cout,), jnp.float32, -0.1, 0.1),
        var=jax.random.uniform(kv, (cout,), jnp.float32, 0.5, 1.5),
    )


def init_params(key, cin):
    ks = iter(jax.random.split(key, 10))
    return {
        'l2_1': init_block(next(ks), cin, 192, (3, 3, 1)),
        'l3_1': [init_block(next(ks), 384, 32, (1, 1, 1)),
                 init_block(next(ks), 32, 384, (1, 1, 1))],
        'l3_2': [init_block(next(ks), 384, 32, (1, 1, 1)),
                 init_block(next(ks), 32, 32, (3, 3, 1)),
                 init_block(next(ks), 32, 384, (1, 1, 1))],
        'l3_3': [init_block(next(ks), 384, 32, (1, 1, 1)),
                 init_block(next(ks), 32, 48, (3, 3, 1)),
                 init_block(next(ks), 48, 64, (3, 3, 1)),
                 init_block(next(ks), 64, 384, (1, 1, 1))],
    }


# ----------------------------------------------------------------------------
# inceptionA forward
# ----------------------------------------------------------------------------
def inception_a(x_ncdhw, params):
    x = jnp.transpose(x_ncdhw, (0, 2, 3, 4, 1))                             # -> NDHWC

    # stage 1+2: ReLU -> {Conv3d(C,192,(3,3,1),s=2)+BN+ReLU | MaxPool3d((3,3,1),s=2)},
    # channel-concatenated inside the kernel -> cflat [M, 384] bf16.
    cflat, (n, do, ho, wo) = stage1_conv_pool_concat(x, params['l2_1'])
    M = n * do * ho * wo
    p1, p2, p3 = params['l3_1'], params['l3_2'], params['l3_3']

    # merged 384->32 bottlenecks of the three stage-3 paths, one [M,384]@[384,128]
    # matmul.  Column layout: [q2(0:32) | q3(32:64) | q1(64:96) | zero pad(96:128)].
    w_b = jnp.zeros((384, 128), jnp.float32)
    w_b = w_b.at[:, 0:32].set(_w_1x1(p2[0]))
    w_b = w_b.at[:, 32:64].set(_w_1x1(p3[0]))
    w_b = w_b.at[:, 64:96].set(_w_1x1(p1[0]))
    (s2, c2), (s3, c3), (s1, c1) = _sb(p2[0]), _sb(p3[0]), _sb(p1[0])
    s_b = jnp.zeros((128,), jnp.float32).at[0:32].set(s2).at[32:64].set(s3).at[64:96].set(s1)
    b_b = jnp.zeros((128,), jnp.float32).at[0:32].set(c2).at[32:64].set(c3).at[64:96].set(c1)
    bneck = fused_matmul_bn_relu([(cflat, w_b, s_b, b_b)])                  # [M, 128] bf16

    # merged 3x3 pad(1,1,0) convs: path3_2 (q2: 32->32) and path3_3 first (q3: 32->48)
    # via block-diagonal per-tap weights.  Output layout: [r3a(0:48) | r2(48:80) | 0].
    q23 = bneck[:, 0:64].reshape(n, do, ho, wo, 64)
    w_m = jnp.zeros((9, 64, 128), jnp.float32)
    w_m = w_m.at[:, 32:64, 0:48].set(_w_taps(p3[1]))      # q3 -> r3a
    w_m = w_m.at[:, 0:32, 48:80].set(_w_taps(p2[1]))      # q2 -> r2
    (s3a, c3a), (s2c, c2c) = _sb(p3[1]), _sb(p2[1])
    s_m = jnp.zeros((128,), jnp.float32).at[0:48].set(s3a).at[48:80].set(s2c)
    b_m = jnp.zeros((128,), jnp.float32).at[0:48].set(c3a).at[48:80].set(c2c)
    r23 = tap_conv_bn_relu(q23, w_m, s_m, b_m)                              # [M, 128] bf16

    # second 3x3 pad(1,1,0) conv of path3_3 (48->64), output padded to 128 lanes.
    r3a = r23[:, 0:48].reshape(n, do, ho, wo, 48)
    w_c = jnp.zeros((9, 48, 128), jnp.float32).at[:, :, 0:64].set(_w_taps(p3[2]))
    s3b, c3b = _sb(p3[2])
    s_c = jnp.zeros((128,), jnp.float32).at[0:64].set(s3b)
    b_c = jnp.zeros((128,), jnp.float32).at[0:64].set(c3b)
    r3b = tap_conv_bn_relu(r3a, w_c, s_c, b_c)                              # [M, 128] bf16

    # final: three *->384 projections (+BN+ReLU) summed with the concat residual,
    # all in one fused kernel.  Zero weight rows select the right columns of the
    # padded activations, so no XLA slices are needed here.
    w1 = jnp.zeros((128, 384), jnp.float32).at[64:96, :].set(_w_1x1(p1[1]))  # q1 -> 384
    w2 = jnp.zeros((128, 384), jnp.float32).at[48:80, :].set(_w_1x1(p2[2]))  # r2 -> 384
    w3 = jnp.zeros((128, 384), jnp.float32).at[0:64, :].set(_w_1x1(p3[3]))   # r3b -> 384
    out = fused_matmul_bn_relu(
        [(bneck, w1, *_sb(p1[1])),
         (r23, w2, *_sb(p2[2])),
         (r3b, w3, *_sb(p3[3]))],
        residuals=(cflat,), out_dtype=jnp.float32)                          # [M, 384] f32

    out = out.reshape(n, do, ho, wo, 384)
    return jnp.transpose(out, (0, 4, 1, 2, 3))                              # -> NCDHW


if __name__ == "__main__":
    key = jax.random.PRNGKey(0)
    kx, kp = jax.random.split(key)
    # concat = 192 (conv branch) + C_IN (pool branch) must equal 384 for stage 3,
    # so the module only type-checks with conv_in_channels = 192.
    C_IN = 192
    x = jax.random.normal(kx, (2, C_IN, 9, 9, 2), jnp.float32)   # NCDHW
    params = init_params(kp, C_IN)

    out = jax.jit(inception_a)(x, params)
    jax.block_until_ready(out)
    assert out.shape == (2, 384, 4, 4, 1), out.shape
    assert bool(jnp.isfinite(out).all())
    print("KERNEL_OK")
</pallas_src>

<mosaic_0001>
module attributes {stable_mosaic.version = 11 : i64} {
  func.func @_stage1_kernel(%arg0: i32, %arg1: memref<9x16x192xbf16, #tpu.memory_space<vmem>>, %arg2: memref<9x192x192xbf16, #tpu.memory_space<vmem>>, %arg3: memref<1x192xf32, #tpu.memory_space<vmem>>, %arg4: memref<1x192xf32, #tpu.memory_space<vmem>>, %arg5: memref<16x384xbf16, #tpu.memory_space<vmem>>) attributes {dimension_semantics = [#tpu.dimension_semantics<parallel>], iteration_bounds = array<i64: 2>, scalar_prefetch = 0 : i64, scratch_operands = 0 : i64, tpu.core_type = #tpu.core_type<tc>, window_params = [{transform_indices = @transform_0, window_bounds = array<i64: 9, 16, 192>}, {pipeline_mode = #tpu.pipeline_mode<synchronous>, transform_indices = @transform_1, window_bounds = array<i64: 9, 192, 192>}, {pipeline_mode = #tpu.pipeline_mode<synchronous>, transform_indices = @transform_2, window_bounds = array<i64: 1, 192>}, {pipeline_mode = #tpu.pipeline_mode<synchronous>, transform_indices = @transform_3, window_bounds = array<i64: 1, 192>}, {transform_indices = @transform_4, window_bounds = array<i64: 16, 384>}]} {
    %c0 = arith.constant 0 : index
    %c0_0 = arith.constant 0 : index
    %c0_1 = arith.constant 0 : index
    %0 = vector.load %arg1[%c0, %c0_0, %c0_1] : memref<9x16x192xbf16, #tpu.memory_space<vmem>>, vector<1x16x192xbf16>
    %1 = vector.shape_cast %0 : vector<1x16x192xbf16> to vector<16x192xbf16>
    %cst = arith.constant 0.000000e+00 : bf16
    %2 = vector.broadcast %cst : bf16 to vector<16x192xbf16>
    %3 = arith.maximumf %1, %2 : vector<16x192xbf16>
    %c0_2 = arith.constant 0 : index
    %c0_3 = arith.constant 0 : index
    %c0_4 = arith.constant 0 : index
    %4 = vector.load %arg2[%c0_2, %c0_3, %c0_4] : memref<9x192x192xbf16, #tpu.memory_space<vmem>>, vector<1x192x192xbf16>
    %5 = vector.shape_cast %4 : vector<1x192x192xbf16> to vector<192x192xbf16>
    %cst_5 = arith.constant dense<0.000000e+00> : vector<16x192xf32>
    %6 = tpu.matmul %3, %5, %cst_5 {dimension_numbers = #tpu.dot_dimension_numbers<[1], [0], [0], [1], [0, 0, 1, 1], [], []>} : vector<16x192xbf16>, vector<192x192xbf16>, vector<16x192xf32> -> vector<16x192xf32>
    %c1 = arith.constant 1 : index
    %c0_6 = arith.constant 0 : index
    %c0_7 = arith.constant 0 : index
    %7 = vector.load %arg1[%c1, %c0_6, %c0_7] : memref<9x16x192xbf16, #tpu.memory_space<vmem>>, vector<1x16x192xbf16>
    %8 = vector.shape_cast %7 : vector<1x16x192xbf16> to vector<16x192xbf16>
    %cst_8 = arith.constant 0.000000e+00 : bf16
    %9 = vector.broadcast %cst_8 : bf16 to vector<16x192xbf16>
    %10 = arith.maximumf %8, %9 : vector<16x192xbf16>
    %11 = arith.maximumf %3, %10 : vector<16x192xbf16>
    %c1_9 = arith.constant 1 : index
    %c0_10 = arith.constant 0 : index
    %c0_11 = arith.constant 0 : index
    %12 = vector.load %arg2[%c1_9, %c0_10, %c0_11] : memref<9x192x192xbf16, #tpu.memory_space<vmem>>, vector<1x192x192xbf16>
    %13 = vector.shape_cast %12 : vector<1x192x192xbf16> to vector<192x192xbf16>
    %cst_12 = arith.constant dense<0.000000e+00> : vector<16x192xf32>
    %14 = tpu.matmul %10, %13, %cst_12 {dimension_numbers = #tpu.dot_dimension_numbers<[1], [0], [0], [1], [0, 0, 1, 1], [], []>} : vector<16x192xbf16>, vector<192x192xbf16>, vector<16x192xf32> -> vector<16x192xf32>
    %15 = arith.addf %6, %14 : vector<16x192xf32>
    %c2 = arith.constant 2 : index
    %c0_13 = arith.constant 0 : index
    %c0_14 = arith.constant 0 : index
    %16 = vector.load %arg1[%c2, %c0_13, %c0_14] : memref<9x16x192xbf16, #tpu.memory_space<vmem>>, vector<1x16x192xbf16>
    %17 = vector.shape_cast %16 : vector<1x16x192xbf16> to vector<16x192xbf16>
    %cst_15 = arith.constant 0.000000e+00 : bf16
    %18 = vector.broadcast %cst_15 : bf16 to vector<16x192xbf16>
    %19 = arith.maximumf %17, %18 : vector<16x192xbf16>
    %20 = arith.maximumf %11, %19 : vector<16x192xbf16>
    %c2_16 = arith.constant 2 : index
    %c0_17 = arith.constant 0 : index
    %c0_18 = arith.constant 0 : index
    %21 = vector.load %arg2[%c2_16, %c0_17, %c0_18] : memref<9x192x192xbf16, #tpu.memory_space<vmem>>, vector<1x192x192xbf16>
    %22 = vector.shape_cast %21 : vector<1x192x192xbf16> to vector<192x192xbf16>
    %cst_19 = arith.constant dense<0.000000e+00> : vector<16x192xf32>
    %23 = tpu.matmul %19, %22, %cst_19 {dimension_numbers = #tpu.dot_dimension_numbers<[1], [0], [0], [1], [0, 0, 1, 1], [], []>} : vector<16x192xbf16>, vector<192x192xbf16>, vector<16x192xf32> -> vector<16x192xf32>
    %24 = arith.addf %15, %23 : vector<16x192xf32>
    %c3 = arith.constant 3 : index
    %c0_20 = arith.constant 0 : index
    %c0_21 = arith.constant 0 : index
    %25 = vector.load %arg1[%c3, %c0_20, %c0_21] : memref<9x16x192xbf16, #tpu.memory_space<vmem>>, vector<1x16x192xbf16>
    %26 = vector.shape_cast %25 : vector<1x16x192xbf16> to vector<16x192xbf16>
    %cst_22 = arith.constant 0.000000e+00 : bf16
    %27 = vector.broadcast %cst_22 : bf16 to vector<16x192xbf16>
    %28 = arith.maximumf %26, %27 : vector<16x192xbf16>
    %29 = arith.maximumf %20, %28 : vector<16x192xbf16>
    %c3_23 = arith.constant 3 : index
    %c0_24 = arith.constant 0 : index
    %c0_25 = arith.constant 0 : index
    %30 = vector.load %arg2[%c3_23, %c0_24, %c0_25] : memref<9x192x192xbf16, #tpu.memory_space<vmem>>, vector<1x192x192xbf16>
    %31 = vector.shape_cast %30 : vector<1x192x192xbf16> to vector<192x192xbf16>
    %cst_26 = arith.constant dense<0.000000e+00> : vector<16x192xf32>
    %32 = tpu.matmul %28, %31, %cst_26 {dimension_numbers = #tpu.dot_dimension_numbers<[1], [0], [0], [1], [0, 0, 1, 1], [], []>} : vector<16x192xbf16>, vector<192x192xbf16>, vector<16x192xf32> -> vector<16x192xf32>
    %33 = arith.addf %24, %32 : vector<16x192xf32>
    %c4 = arith.constant 4 : index
    %c0_27 = arith.constant 0 : index
    %c0_28 = arith.constant 0 : index
    %34 = vector.load %arg1[%c4, %c0_27, %c0_28] : memref<9x16x192xbf16, #tpu.memory_space<vmem>>, vector<1x16x192xbf16>
    %35 = vector.shape_cast %34 : vector<1x16x192xbf16> to vector<16x192xbf16>
    %cst_29 = arith.constant 0.000000e+00 : bf16
    %36 = vector.broadcast %cst_29 : bf16 to vector<16x192xbf16>
    %37 = arith.maximumf %35, %36 : vector<16x192xbf16>
    %38 = arith.maximumf %29, %37 : vector<16x192xbf16>
    %c4_30 = arith.constant 4 : index
    %c0_31 = arith.constant 0 : index
    %c0_32 = arith.constant 0 : index
    %39 = vector.load %arg2[%c4_30, %c0_31, %c0_32] : memref<9x192x192xbf16, #tpu.memory_space<vmem>>, vector<1x192x192xbf16>
    %40 = vector.shape_cast %39 : vector<1x192x192xbf16> to vector<192x192xbf16>
    %cst_33 = arith.constant dense<0.000000e+00> : vector<16x192xf32>
    %41 = tpu.matmul %37, %40, %cst_33 {dimension_numbers = #tpu.dot_dimension_numbers<[1], [0], [0], [1], [0, 0, 1, 1], [], []>} : vector<16x192xbf16>, vector<192x192xbf16>, vector<16x192xf32> -> vector<16x192xf32>
    %42 = arith.addf %33, %41 : vector<16x192xf32>
    %c5 = arith.constant 5 : index
    %c0_34 = arith.constant 0 : index
    %c0_35 = arith.constant 0 : index
    %43 = vector.load %arg1[%c5, %c0_34, %c0_35] : memref<9x16x192xbf16, #tpu.memory_space<vmem>>, vector<1x16x192xbf16>
    %44 = vector.shape_cast %43 : vector<1x16x192xbf16> to vector<16x192xbf16>
    %cst_36 = arith.constant 0.000000e+00 : bf16
    %45 = vector.broadcast %cst_36 : bf16 to vector<16x192xbf16>
    %46 = arith.maximumf %44, %45 : vector<16x192xbf16>
    %47 = arith.maximumf %38, %46 : vector<16x192xbf16>
    %c5_37 = arith.constant 5 : index
    %c0_38 = arith.constant 0 : index
    %c0_39 = arith.constant 0 : index
    %48 = vector.load %arg2[%c5_37, %c0_38, %c0_39] : memref<9x192x192xbf16, #tpu.memory_space<vmem>>, vector<1x192x192xbf16>
    %49 = vector.shape_cast %48 : vector<1x192x192xbf16> to vector<192x192xbf16>
    %cst_40 = arith.constant dense<0.000000e+00> : vector<16x192xf32>
    %50 = tpu.matmul %46, %49, %cst_40 {dimension_numbers = #tpu.dot_dimension_numbers<[1], [0], [0], [1], [0, 0, 1, 1], [], []>} : vector<16x192xbf16>, vector<192x192xbf16>, vector<16x192xf32> -> vector<16x192xf32>
    %51 = arith.addf %42, %50 : vector<16x192xf32>
    %c6 = arith.constant 6 : index
    %c0_41 = arith.constant 0 : index
    %c0_42 = arith.constant 0 : index
    %52 = vector.load %arg1[%c6, %c0_41, %c0_42] : memref<9x16x192xbf16, #tpu.memory_space<vmem>>, vector<1x16x192xbf16>
    %53 = vector.shape_cast %52 : vector<1x16x192xbf16> to vector<16x192xbf16>
    %cst_43 = arith.constant 0.000000e+00 : bf16
    %54 = vector.broadcast %cst_43 : bf16 to vector<16x192xbf16>
    %55 = arith.maximumf %53, %54 : vector<16x192xbf16>
    %56 = arith.maximumf %47, %55 : vector<16x192xbf16>
    %c6_44 = arith.constant 6 : index
    %c0_45 = arith.constant 0 : index
    %c0_46 = arith.constant 0 : index
    %57 = vector.load %arg2[%c6_44, %c0_45, %c0_46] : memref<9x192x192xbf16, #tpu.memory_space<vmem>>, vector<1x192x192xbf16>
    %58 = vector.shape_cast %57 : vector<1x192x192xbf16> to vector<192x192xbf16>
    %cst_47 = arith.constant dense<0.000000e+00> : vector<16x192xf32>
    %59 = tpu.matmul %55, %58, %cst_47 {dimension_numbers = #tpu.dot_dimension_numbers<[1], [0], [0], [1], [0, 0, 1, 1], [], []>} : vector<16x192xbf16>, vector<192x192xbf16>, vector<16x192xf32> -> vector<16x192xf32>
    %60 = arith.addf %51, %59 : vector<16x192xf32>
    %c7 = arith.constant 7 : index
    %c0_48 = arith.constant 0 : index
    %c0_49 = arith.constant 0 : index
    %61 = vector.load %arg1[%c7, %c0_48, %c0_49] : memref<9x16x192xbf16, #tpu.memory_space<vmem>>, vector<1x16x192xbf16>
    %62 = vector.shape_cast %61 : vector<1x16x192xbf16> to vector<16x192xbf16>
    %cst_50 = arith.constant 0.000000e+00 : bf16
    %63 = vector.broadcast %cst_50 : bf16 to vector<16x192xbf16>
    %64 = arith.maximumf %62, %63 : vector<16x192xbf16>
    %65 = arith.maximumf %56, %64 : vector<16x192xbf16>
    %c7_51 = arith.constant 7 : index
    %c0_52 = arith.constant 0 : index
    %c0_53 = arith.constant 0 : index
    %66 = vector.load %arg2[%c7_51, %c0_52, %c0_53] : memref<9x192x192xbf16, #tpu.memory_space<vmem>>, vector<1x192x192xbf16>
    %67 = vector.shape_cast %66 : vector<1x192x192xbf16> to vector<192x192xbf16>
    %cst_54 = arith.constant dense<0.000000e+00> : vector<16x192xf32>
    %68 = tpu.matmul %64, %67, %cst_54 {dimension_numbers = #tpu.dot_dimension_numbers<[1], [0], [0], [1], [0, 0, 1, 1], [], []>} : vector<16x192xbf16>, vector<192x192xbf16>, vector<16x192xf32> -> vector<16x192xf32>
    %69 = arith.addf %60, %68 : vector<16x192xf32>
    %c8 = arith.constant 8 : index
    %c0_55 = arith.constant 0 : index
    %c0_56 = arith.constant 0 : index
    %70 = vector.load %arg1[%c8, %c0_55, %c0_56] : memref<9x16x192xbf16, #tpu.memory_space<vmem>>, vector<1x16x192xbf16>
    %71 = vector.shape_cast %70 : vector<1x16x192xbf16> to vector<16x192xbf16>
    %cst_57 = arith.constant 0.000000e+00 : bf16
    %72 = vector.broadcast %cst_57 : bf16 to vector<16x192xbf16>
    %73 = arith.maximumf %71, %72 : vector<16x192xbf16>
    %74 = arith.maximumf %65, %73 : vector<16x192xbf16>
    %c8_58 = arith.constant 8 : index
    %c0_59 = arith.constant 0 : index
    %c0_60 = arith.constant 0 : index
    %75 = vector.load %arg2[%c8_58, %c0_59, %c0_60] : memref<9x192x192xbf16, #tpu.memory_space<vmem>>, vector<1x192x192xbf16>
    %76 = vector.shape_cast %75 : vector<1x192x192xbf16> to vector<192x192xbf16>
    %cst_61 = arith.constant dense<0.000000e+00> : vector<16x192xf32>
    %77 = tpu.matmul %73, %76, %cst_61 {dimension_numbers = #tpu.dot_dimension_numbers<[1], [0], [0], [1], [0, 0, 1, 1], [], []>} : vector<16x192xbf16>, vector<192x192xbf16>, vector<16x192xf32> -> vector<16x192xf32>
    %78 = arith.addf %69, %77 : vector<16x192xf32>
    %c0_62 = arith.constant 0 : index
    %c0_63 = arith.constant 0 : index
    %79 = vector.load %arg3[%c0_62, %c0_63] : memref<1x192xf32, #tpu.memory_space<vmem>>, vector<1x192xf32>
    %80 = vector.broadcast %79 : vector<1x192xf32> to vector<16x192xf32>
    %81 = arith.mulf %78, %80 : vector<16x192xf32>
    %c0_64 = arith.constant 0 : index
    %c0_65 = arith.constant 0 : index
    %82 = vector.load %arg4[%c0_64, %c0_65] : memref<1x192xf32, #tpu.memory_space<vmem>>, vector<1x192xf32>
    %83 = vector.broadcast %82 : vector<1x192xf32> to vector<16x192xf32>
    %84 = arith.addf %81, %83 : vector<16x192xf32>
    %cst_66 = arith.constant 0.000000e+00 : f32
    %85 = vector.broadcast %cst_66 : f32 to vector<16x192xf32>
    %86 = arith.maximumf %84, %85 : vector<16x192xf32>
    %87 = arith.truncf %86 : vector<16x192xf32> to vector<16x192xbf16>
    %88 = tpu.concatenate %87, %74 in 1 : vector<16x192xbf16>, vector<16x192xbf16> -> vector<16x384xbf16>
    %c0_67 = arith.constant 0 : index
    %c0_68 = arith.constant 0 : index
    %89 = vector.load %arg5[%c0_67, %c0_68] : memref<16x384xbf16, #tpu.memory_space<vmem>>, vector<16x384xbf16>
    tpu.vector_store %arg5[%c0_67, %c0_68], %88 {strides = array<i32>} : memref<16x384xbf16, #tpu.memory_space<vmem>>, vector<16x384xbf16>,
    return
  }
  func.func @transform_0(%arg0: i32) -> (i32, i32, i32) {
    %c0_i32 = arith.constant 0 : i32
    %c0_i32_0 = arith.constant 0 : i32
    %c0_i32_1 = arith.constant 0 : i32
    return %c0_i32, %arg0, %c0_i32_0 : i32, i32, i32
  }
  func.func @transform_1(%arg0: i32) -> (i32, i32, i32) {
    %c0_i32 = arith.constant 0 : i32
    %c0_i32_0 = arith.constant 0 : i32
    %c0_i32_1 = arith.constant 0 : i32
    %c0_i32_2 = arith.constant 0 : i32
    return %c0_i32, %c0_i32_0, %c0_i32_1 : i32, i32, i32
  }
  func.func @transform_2(%arg0: i32) -> (i32, i32) {
    %c0_i32 = arith.constant 0 : i32
    %c0_i32_0 = arith.constant 0 : i32
    %c0_i32_1 = arith.constant 0 : i32
    return %c0_i32, %c0_i32_0 : i32, i32
  }
  func.func @transform_3(%arg0: i32) -> (i32, i32) {
    %c0_i32 = arith.constant 0 : i32
    %c0_i32_0 = arith.constant 0 : i32
    %c0_i32_1 = arith.constant 0 : i32
    return %c0_i32, %c0_i32_0 : i32, i32
  }
  func.func @transform_4(%arg0: i32) -> (i32, i32) {
    %c0_i32 = arith.constant 0 : i32
    %c0_i32_0 = arith.constant 0 : i32
    return %arg0, %c0_i32 : i32, i32
  }
}

module attributes {stable_mosaic.version = 11 : i64} {
  func.func @_fused_mm_kernel(%arg0: i32, %arg1: memref<16x384xbf16, #tpu.memory_space<vmem>>, %arg2: memref<384x128xbf16, #tpu.memory_space<vmem>>, %arg3: memref<1x128xf32, #tpu.memory_space<vmem>>, %arg4: memref<1x128xf32, #tpu.memory_space<vmem>>, %arg5: memref<16x128xbf16, #tpu.memory_space<vmem>>) attributes {dimension_semantics = [#tpu.dimension_semantics<parallel>], iteration_bounds = array<i64: 2>, scalar_prefetch = 0 : i64, scratch_operands = 0 : i64, tpu.core_type = #tpu.core_type<tc>, window_params = [{transform_indices = @transform_0, window_bounds = array<i64: 16, 384>}, {pipeline_mode = #tpu.pipeline_mode<synchronous>, transform_indices = @transform_1, window_bounds = array<i64: 384, 128>}, {pipeline_mode = #tpu.pipeline_mode<synchronous>, transform_indices = @transform_2, window_bounds = array<i64: 1, 128>}, {pipeline_mode = #tpu.pipeline_mode<synchronous>, transform_indices = @transform_3, window_bounds = array<i64: 1, 128>}, {transform_indices = @transform_4, window_bounds = array<i64: 16, 128>}]} {
    %c0 = arith.constant 0 : index
    %c0_0 = arith.constant 0 : index
    %0 = vector.load %arg1[%c0, %c0_0] : memref<16x384xbf16, #tpu.memory_space<vmem>>, vector<16x384xbf16>
    %c0_1 = arith.constant 0 : index
    %c0_2 = arith.constant 0 : index
    %1 = vector.load %arg2[%c0_1, %c0_2] : memref<384x128xbf16, #tpu.memory_space<vmem>>, vector<384x128xbf16>
    %cst = arith.constant dense<0.000000e+00> : vector<16x128xf32>
    %2 = tpu.matmul %0, %1, %cst {dimension_numbers = #tpu.dot_dimension_numbers<[1], [0], [0], [1], [0, 0, 1, 1], [], []>} : vector<16x384xbf16>, vector<384x128xbf16>, vector<16x128xf32> -> vector<16x128xf32>
    %c0_3 = arith.constant 0 : index
    %c0_4 = arith.constant 0 : index
    %3 = vector.load %arg3[%c0_3, %c0_4] : memref<1x128xf32, #tpu.memory_space<vmem>>, vector<1x128xf32>
    %4 = vector.broadcast %3 : vector<1x128xf32> to vector<16x128xf32>
    %5 = arith.mulf %2, %4 : vector<16x128xf32>
    %c0_5 = arith.constant 0 : index
    %c0_6 = arith.constant 0 : index
    %6 = vector.load %arg4[%c0_5, %c0_6] : memref<1x128xf32, #tpu.memory_space<vmem>>, vector<1x128xf32>
    %7 = vector.broadcast %6 : vector<1x128xf32> to vector<16x128xf32>
    %8 = arith.addf %5, %7 : vector<16x128xf32>
    %cst_7 = arith.constant 0.000000e+00 : f32
    %9 = vector.broadcast %cst_7 : f32 to vector<16x128xf32>
    %10 = arith.maximumf %8, %9 : vector<16x128xf32>
    %11 = arith.truncf %10 : vector<16x128xf32> to vector<16x128xbf16>
    %c0_8 = arith.constant 0 : index
    %c0_9 = arith.constant 0 : index
    %12 = vector.load %arg5[%c0_8, %c0_9] : memref<16x128xbf16, #tpu.memory_space<vmem>>, vector<16x128xbf16>
    tpu.vector_store %arg5[%c0_8, %c0_9], %11 {strides = array<i32>} : memref<16x128xbf16, #tpu.memory_space<vmem>>, vector<16x128xbf16>,
    return
  }
  func.func @transform_0(%arg0: i32) -> (i32, i32) {
    %c0_i32 = arith.constant 0 : i32
    %c0_i32_0 = arith.constant 0 : i32
    return %arg0, %c0_i32 : i32, i32
  }
  func.func @transform_1(%arg0: i32) -> (i32, i32) {
    %c0_i32 = arith.constant 0 : i32
    %c0_i32_0 = arith.constant 0 : i32
    %c0_i32_1 = arith.constant 0 : i32
    return %c0_i32, %c0_i32_0 : i32, i32
  }
  func.func @transform_2(%arg0: i32) -> (i32, i32) {
    %c0_i32 = arith.constant 0 : i32
    %c0_i32_0 = arith.constant 0 : i32
    %c0_i32_1 = arith.constant 0 : i32
    return %c0_i32, %c0_i32_0 : i32, i32
  }
  func.func @transform_3(%arg0: i32) -> (i32, i32) {
    %c0_i32 = arith.constant 0 : i32
    %c0_i32_0 = arith.constant 0 : i32
    %c0_i32_1 = arith.constant 0 : i32
    return %c0_i32, %c0_i32_0 : i32, i32
  }
  func.func @transform_4(%arg0: i32) -> (i32, i32) {
    %c0_i32 = arith.constant 0 : i32
    %c0_i32_0 = arith.constant 0 : i32
    return %arg0, %c0_i32 : i32, i32
  }
}

module attributes {stable_mosaic.version = 11 : i64} {
  func.func @_tap_conv_kernel(%arg0: i32, %arg1: memref<9x16x64xbf16, #tpu.memory_space<vmem>>, %arg2: memref<9x64x128xbf16, #tpu.memory_space<vmem>>, %arg3: memref<1x128xf32, #tpu.memory_space<vmem>>, %arg4: memref<1x128xf32, #tpu.memory_space<vmem>>, %arg5: memref<16x128xbf16, #tpu.memory_space<vmem>>) attributes {dimension_semantics = [#tpu.dimension_semantics<parallel>], iteration_bounds = array<i64: 2>, scalar_prefetch = 0 : i64, scratch_operands = 0 : i64, tpu.core_type = #tpu.core_type<tc>, window_params = [{transform_indices = @transform_0, window_bounds = array<i64: 9, 16, 64>}, {pipeline_mode = #tpu.pipeline_mode<synchronous>, transform_indices = @transform_1, window_bounds = array<i64: 9, 64, 128>}, {pipeline_mode = #tpu.pipeline_mode<synchronous>, transform_indices = @transform_2, window_bounds = array<i64: 1, 128>}, {pipeline_mode = #tpu.pipeline_mode<synchronous>, transform_indices = @transform_3, window_bounds = array<i64: 1, 128>}, {transform_indices = @transform_4, window_bounds = array<i64: 16, 128>}]} {
    %c0 = arith.constant 0 : index
    %c0_0 = arith.constant 0 : index
    %c0_1 = arith.constant 0 : index
    %0 = vector.load %arg1[%c0, %c0_0, %c0_1] : memref<9x16x64xbf16, #tpu.memory_space<vmem>>, vector<1x16x64xbf16>
    %1 = vector.shape_cast %0 : vector<1x16x64xbf16> to vector<16x64xbf16>
    %c0_2 = arith.constant 0 : index
    %c0_3 = arith.constant 0 : index
    %c0_4 = arith.constant 0 : index
    %2 = vector.load %arg2[%c0_2, %c0_3, %c0_4] : memref<9x64x128xbf16, #tpu.memory_space<vmem>>, vector<1x64x128xbf16>
    %3 = vector.shape_cast %2 : vector<1x64x128xbf16> to vector<64x128xbf16>
    %cst = arith.constant dense<0.000000e+00> : vector<16x128xf32>
    %4 = tpu.matmul %1, %3, %cst {dimension_numbers = #tpu.dot_dimension_numbers<[1], [0], [0], [1], [0, 0, 1, 1], [], []>} : vector<16x64xbf16>, vector<64x128xbf16>, vector<16x128xf32> -> vector<16x128xf32>
    %c1 = arith.constant 1 : index
    %c0_5 = arith.constant 0 : index
    %c0_6 = arith.constant 0 : index
    %5 = vector.load %arg1[%c1, %c0_5, %c0_6] : memref<9x16x64xbf16, #tpu.memory_space<vmem>>, vector<1x16x64xbf16>
    %6 = vector.shape_cast %5 : vector<1x16x64xbf16> to vector<16x64xbf16>
    %c1_7 = arith.constant 1 : index
    %c0_8 = arith.constant 0 : index
    %c0_9 = arith.constant 0 : index
    %7 = vector.load %arg2[%c1_7, %c0_8, %c0_9] : memref<9x64x128xbf16, #tpu.memory_space<vmem>>, vector<1x64x128xbf16>
    %8 = vector.shape_cast %7 : vector<1x64x128xbf16> to vector<64x128xbf16>
    %cst_10 = arith.constant dense<0.000000e+00> : vector<16x128xf32>
    %9 = tpu.matmul %6, %8, %cst_10 {dimension_numbers = #tpu.dot_dimension_numbers<[1], [0], [0], [1], [0, 0, 1, 1], [], []>} : vector<16x64xbf16>, vector<64x128xbf16>, vector<16x128xf32> -> vector<16x128xf32>
    %10 = arith.addf %4, %9 : vector<16x128xf32>
    %c2 = arith.constant 2 : index
    %c0_11 = arith.constant 0 : index
    %c0_12 = arith.constant 0 : index
    %11 = vector.load %arg1[%c2, %c0_11, %c0_12] : memref<9x16x64xbf16, #tpu.memory_space<vmem>>, vector<1x16x64xbf16>
    %12 = vector.shape_cast %11 : vector<1x16x64xbf16> to vector<16x64xbf16>
    %c2_13 = arith.constant 2 : index
    %c0_14 = arith.constant 0 : index
    %c0_15 = arith.constant 0 : index
    %13 = vector.load %arg2[%c2_13, %c0_14, %c0_15] : memref<9x64x128xbf16, #tpu.memory_space<vmem>>, vector<1x64x128xbf16>
    %14 = vector.shape_cast %13 : vector<1x64x128xbf16> to vector<64x128xbf16>
    %cst_16 = arith.constant dense<0.000000e+00> : vector<16x128xf32>
    %15 = tpu.matmul %12, %14, %cst_16 {dimension_numbers = #tpu.dot_dimension_numbers<[1], [0], [0], [1], [0, 0, 1, 1], [], []>} : vector<16x64xbf16>, vector<64x128xbf16>, vector<16x128xf32> -> vector<16x128xf32>
    %16 = arith.addf %10, %15 : vector<16x128xf32>
    %c3 = arith.constant 3 : index
    %c0_17 = arith.constant 0 : index
    %c0_18 = arith.constant 0 : index
    %17 = vector.load %arg1[%c3, %c0_17, %c0_18] : memref<9x16x64xbf16, #tpu.memory_space<vmem>>, vector<1x16x64xbf16>
    %18 = vector.shape_cast %17 : vector<1x16x64xbf16> to vector<16x64xbf16>
    %c3_19 = arith.constant 3 : index
    %c0_20 = arith.constant 0 : index
    %c0_21 = arith.constant 0 : index
    %19 = vector.load %arg2[%c3_19, %c0_20, %c0_21] : memref<9x64x128xbf16, #tpu.memory_space<vmem>>, vector<1x64x128xbf16>
    %20 = vector.shape_cast %19 : vector<1x64x128xbf16> to vector<64x128xbf16>
    %cst_22 = arith.constant dense<0.000000e+00> : vector<16x128xf32>
    %21 = tpu.matmul %18, %20, %cst_22 {dimension_numbers = #tpu.dot_dimension_numbers<[1], [0], [0], [1], [0, 0, 1, 1], [], []>} : vector<16x64xbf16>, vector<64x128xbf16>, vector<16x128xf32> -> vector<16x128xf32>
    %22 = arith.addf %16, %21 : vector<16x128xf32>
    %c4 = arith.constant 4 : index
    %c0_23 = arith.constant 0 : index
    %c0_24 = arith.constant 0 : index
    %23 = vector.load %arg1[%c4, %c0_23, %c0_24] : memref<9x16x64xbf16, #tpu.memory_space<vmem>>, vector<1x16x64xbf16>
    %24 = vector.shape_cast %23 : vector<1x16x64xbf16> to vector<16x64xbf16>
    %c4_25 = arith.constant 4 : index
    %c0_26 = arith.constant 0 : index
    %c0_27 = arith.constant 0 : index
    %25 = vector.load %arg2[%c4_25, %c0_26, %c0_27] : memref<9x64x128xbf16, #tpu.memory_space<vmem>>, vector<1x64x128xbf16>
    %26 = vector.shape_cast %25 : vector<1x64x128xbf16> to vector<64x128xbf16>
    %cst_28 = arith.constant dense<0.000000e+00> : vector<16x128xf32>
    %27 = tpu.matmul %24, %26, %cst_28 {dimension_numbers = #tpu.dot_dimension_numbers<[1], [0], [0], [1], [0, 0, 1, 1], [], []>} : vector<16x64xbf16>, vector<64x128xbf16>, vector<16x128xf32> -> vector<16x128xf32>
    %28 = arith.addf %22, %27 : vector<16x128xf32>
    %c5 = arith.constant 5 : index
    %c0_29 = arith.constant 0 : index
    %c0_30 = arith.constant 0 : index
    %29 = vector.load %arg1[%c5, %c0_29, %c0_30] : memref<9x16x64xbf16, #tpu.memory_space<vmem>>, vector<1x16x64xbf16>
    %30 = vector.shape_cast %29 : vector<1x16x64xbf16> to vector<16x64xbf16>
    %c5_31 = arith.constant 5 : index
    %c0_32 = arith.constant 0 : index
    %c0_33 = arith.constant 0 : index
    %31 = vector.load %arg2[%c5_31, %c0_32, %c0_33] : memref<9x64x128xbf16, #tpu.memory_space<vmem>>, vector<1x64x128xbf16>
    %32 = vector.shape_cast %31 : vector<1x64x128xbf16> to vector<64x128xbf16>
    %cst_34 = arith.constant dense<0.000000e+00> : vector<16x128xf32>
    %33 = tpu.matmul %30, %32, %cst_34 {dimension_numbers = #tpu.dot_dimension_numbers<[1], [0], [0], [1], [0, 0, 1, 1], [], []>} : vector<16x64xbf16>, vector<64x128xbf16>, vector<16x128xf32> -> vector<16x128xf32>
    %34 = arith.addf %28, %33 : vector<16x128xf32>
    %c6 = arith.constant 6 : index
    %c0_35 = arith.constant 0 : index
    %c0_36 = arith.constant 0 : index
    %35 = vector.load %arg1[%c6, %c0_35, %c0_36] : memref<9x16x64xbf16, #tpu.memory_space<vmem>>, vector<1x16x64xbf16>
    %36 = vector.shape_cast %35 : vector<1x16x64xbf16> to vector<16x64xbf16>
    %c6_37 = arith.constant 6 : index
    %c0_38 = arith.constant 0 : index
    %c0_39 = arith.constant 0 : index
    %37 = vector.load %arg2[%c6_37, %c0_38, %c0_39] : memref<9x64x128xbf16, #tpu.memory_space<vmem>>, vector<1x64x128xbf16>
    %38 = vector.shape_cast %37 : vector<1x64x128xbf16> to vector<64x128xbf16>
    %cst_40 = arith.constant dense<0.000000e+00> : vector<16x128xf32>
    %39 = tpu.matmul %36, %38, %cst_40 {dimension_numbers = #tpu.dot_dimension_numbers<[1], [0], [0], [1], [0, 0, 1, 1], [], []>} : vector<16x64xbf16>, vector<64x128xbf16>, vector<16x128xf32> -> vector<16x128xf32>
    %40 = arith.addf %34, %39 : vector<16x128xf32>
    %c7 = arith.constant 7 : index
    %c0_41 = arith.constant 0 : index
    %c0_42 = arith.constant 0 : index
    %41 = vector.load %arg1[%c7, %c0_41, %c0_42] : memref<9x16x64xbf16, #tpu.memory_space<vmem>>, vector<1x16x64xbf16>
    %42 = vector.shape_cast %41 : vector<1x16x64xbf16> to vector<16x64xbf16>
    %c7_43 = arith.constant 7 : index
    %c0_44 = arith.constant 0 : index
    %c0_45 = arith.constant 0 : index
    %43 = vector.load %arg2[%c7_43, %c0_44, %c0_45] : memref<9x64x128xbf16, #tpu.memory_space<vmem>>, vector<1x64x128xbf16>
    %44 = vector.shape_cast %43 : vector<1x64x128xbf16> to vector<64x128xbf16>
    %cst_46 = arith.constant dense<0.000000e+00> : vector<16x128xf32>
    %45 = tpu.matmul %42, %44, %cst_46 {dimension_numbers = #tpu.dot_dimension_numbers<[1], [0], [0], [1], [0, 0, 1, 1], [], []>} : vector<16x64xbf16>, vector<64x128xbf16>, vector<16x128xf32> -> vector<16x128xf32>
    %46 = arith.addf %40, %45 : vector<16x128xf32>
    %c8 = arith.constant 8 : index
    %c0_47 = arith.constant 0 : index
    %c0_48 = arith.constant 0 : index
    %47 = vector.load %arg1[%c8, %c0_47, %c0_48] : memref<9x16x64xbf16, #tpu.memory_space<vmem>>, vector<1x16x64xbf16>
    %48 = vector.shape_cast %47 : vector<1x16x64xbf16> to vector<16x64xbf16>
    %c8_49 = arith.constant 8 : index
    %c0_50 = arith.constant 0 : index
    %c0_51 = arith.constant 0 : index
    %49 = vector.load %arg2[%c8_49, %c0_50, %c0_51] : memref<9x64x128xbf16, #tpu.memory_space<vmem>>, vector<1x64x128xbf16>
    %50 = vector.shape_cast %49 : vector<1x64x128xbf16> to vector<64x128xbf16>
    %cst_52 = arith.constant dense<0.000000e+00> : vector<16x128xf32>
    %51 = tpu.matmul %48, %50, %cst_52 {dimension_numbers = #tpu.dot_dimension_numbers<[1], [0], [0], [1], [0, 0, 1, 1], [], []>} : vector<16x64xbf16>, vector<64x128xbf16>, vector<16x128xf32> -> vector<16x128xf32>
    %52 = arith.addf %46, %51 : vector<16x128xf32>
    %c0_53 = arith.constant 0 : index
    %c0_54 = arith.constant 0 : index
    %53 = vector.load %arg3[%c0_53, %c0_54] : memref<1x128xf32, #tpu.memory_space<vmem>>, vector<1x128xf32>
    %54 = vector.broadcast %53 : vector<1x128xf32> to vector<16x128xf32>
    %55 = arith.mulf %52, %54 : vector<16x128xf32>
    %c0_55 = arith.constant 0 : index
    %c0_56 = arith.constant 0 : index
    %56 = vector.load %arg4[%c0_55, %c0_56] : memref<1x128xf32, #tpu.memory_space<vmem>>, vector<1x128xf32>
    %57 = vector.broadcast %56 : vector<1x128xf32> to vector<16x128xf32>
    %58 = arith.addf %55, %57 : vector<16x128xf32>
    %cst_57 = arith.constant 0.000000e+00 : f32
    %59 = vector.broadcast %cst_57 : f32 to vector<16x128xf32>
    %60 = arith.maximumf %58, %59 : vector<16x128xf32>
    %61 = arith.truncf %60 : vector<16x128xf32> to vector<16x128xbf16>
    %c0_58 = arith.constant 0 : index
    %c0_59 = arith.constant 0 : index
    %62 = vector.load %arg5[%c0_58, %c0_59] : memref<16x128xbf16, #tpu.memory_space<vmem>>, vector<16x128xbf16>
    tpu.vector_store %arg5[%c0_58, %c0_59], %61 {strides = array<i32>} : memref<16x128xbf16, #tpu.memory_space<vmem>>, vector<16x128xbf16>,
    return
  }
  func.func @transform_0(%arg0: i32) -> (i32, i32, i32) {
    %c0_i32 = arith.constant 0 : i32
    %c0_i32_0 = arith.constant 0 : i32
    %c0_i32_1 = arith.constant 0 : i32
    return %c0_i32, %arg0, %c0_i32_0 : i32, i32, i32
  }
  func.func @transform_1(%arg0: i32) -> (i32, i32, i32) {
    %c0_i32 = arith.constant 0 : i32
    %c0_i32_0 = arith.constant 0 : i32
    %c0_i32_1 = arith.constant 0 : i32
    %c0_i32_2 = arith.constant 0 : i32
    return %c0_i32, %c0_i32_0, %c0_i32_1 : i32, i32, i32
  }
  func.func @transform_2(%arg0: i32) -> (i32, i32) {
    %c0_i32 = arith.constant 0 : i32
    %c0_i32_0 = arith.constant 0 : i32
    %c0_i32_1 = arith.constant 0 : i32
    return %c0_i32, %c0_i32_0 : i32, i32
  }
  func.func @transform_3(%arg0: i32) -> (i32, i32) {
    %c0_i32 = arith.constant 0 : i32
    %c0_i32_0 = arith.constant 0 : i32
    %c0_i32_1 = arith.constant 0 : i32
    return %c0_i32, %c0_i32_0 : i32, i32
  }
  func.func @transform_4(%arg0: i32) -> (i32, i32) {
    %c0_i32 = arith.constant 0 : i32
    %c0_i32_0 = arith.constant 0 : i32
    return %arg0, %c0_i32 : i32, i32
  }
}

module attributes {stable_mosaic.version = 11 : i64} {
  func.func @_fused_mm_kernel(%arg0: i32, %arg1: memref<16x128xbf16, #tpu.memory_space<vmem>>, %arg2: memref<128x384xbf16, #tpu.memory_space<vmem>>, %arg3: memref<1x384xf32, #tpu.memory_space<vmem>>, %arg4: memref<1x384xf32, #tpu.memory_space<vmem>>, %arg5: memref<16x128xbf16, #tpu.memory_space<vmem>>, %arg6: memref<128x384xbf16, #tpu.memory_space<vmem>>, %arg7: memref<1x384xf32, #tpu.memory_space<vmem>>, %arg8: memref<1x384xf32, #tpu.memory_space<vmem>>, %arg9: memref<16x128xbf16, #tpu.memory_space<vmem>>, %arg10: memref<128x384xbf16, #tpu.memory_space<vmem>>, %arg11: memref<1x384xf32, #tpu.memory_space<vmem>>, %arg12: memref<1x384xf32, #tpu.memory_space<vmem>>, %arg13: memref<16x384xbf16, #tpu.memory_space<vmem>>, %arg14: memref<16x384xf32, #tpu.memory_space<vmem>>) attributes {dimension_semantics = [#tpu.dimension_semantics<parallel>], iteration_bounds = array<i64: 2>, scalar_prefetch = 0 : i64, scratch_operands = 0 : i64, tpu.core_type = #tpu.core_type<tc>, window_params = [{transform_indices = @transform_0, window_bounds = array<i64: 16, 128>}, {pipeline_mode = #tpu.pipeline_mode<synchronous>, transform_indices = @transform_1, window_bounds = array<i64: 128, 384>}, {pipeline_mode = #tpu.pipeline_mode<synchronous>, transform_indices = @transform_2, window_bounds = array<i64: 1, 384>}, {pipeline_mode = #tpu.pipeline_mode<synchronous>, transform_indices = @transform_3, window_bounds = array<i64: 1, 384>}, {transform_indices = @transform_4, window_bounds = array<i64: 16, 128>}, {pipeline_mode = #tpu.pipeline_mode<synchronous>, transform_indices = @transform_5, window_bounds = array<i64: 128, 384>}, {pipeline_mode = #tpu.pipeline_mode<synchronous>, transform_indices = @transform_6, window_bounds = array<i64: 1, 384>}, {pipeline_mode = #tpu.pipeline_mode<synchronous>, transform_indices = @transform_7, window_bounds = array<i64: 1, 384>}, {transform_indices = @transform_8, window_bounds = array<i64: 16, 128>}, {pipeline_mode = #tpu.pipeline_mode<synchronous>, transform_indices = @transform_9, window_bounds = array<i64: 128, 384>}, {pipeline_mode = #tpu.pipeline_mode<synchronous>, transform_indices = @transform_10, window_bounds = array<i64: 1, 384>}, {pipeline_mode = #tpu.pipeline_mode<synchronous>, transform_indices = @transform_11, window_bounds = array<i64: 1, 384>}, {transform_indices = @transform_12, window_bounds = array<i64: 16, 384>}, {transform_indices = @transform_13, window_bounds = array<i64: 16, 384>}]} {
    %c0 = arith.constant 0 : index
    %c0_0 = arith.constant 0 : index
    %0 = vector.load %arg1[%c0, %c0_0] : memref<16x128xbf16, #tpu.memory_space<vmem>>, vector<16x128xbf16>
    %c0_1 = arith.constant 0 : index
    %c0_2 = arith.constant 0 : index
    %1 = vector.load %arg2[%c0_1, %c0_2] : memref<128x384xbf16, #tpu.memory_space<vmem>>, vector<128x384xbf16>
    %cst = arith.constant dense<0.000000e+00> : vector<16x384xf32>
    %2 = tpu.matmul %0, %1, %cst {dimension_numbers = #tpu.dot_dimension_numbers<[1], [0], [0], [1], [0, 0, 1, 1], [], []>} : vector<16x128xbf16>, vector<128x384xbf16>, vector<16x384xf32> -> vector<16x384xf32>
    %c0_3 = arith.constant 0 : index
    %c0_4 = arith.constant 0 : index
    %3 = vector.load %arg3[%c0_3, %c0_4] : memref<1x384xf32, #tpu.memory_space<vmem>>, vector<1x384xf32>
    %4 = vector.broadcast %3 : vector<1x384xf32> to vector<16x384xf32>
    %5 = arith.mulf %2, %4 : vector<16x384xf32>
    %c0_5 = arith.constant 0 : index
    %c0_6 = arith.constant 0 : index
    %6 = vector.load %arg4[%c0_5, %c0_6] : memref<1x384xf32, #tpu.memory_space<vmem>>, vector<1x384xf32>
    %7 = vector.broadcast %6 : vector<1x384xf32> to vector<16x384xf32>
    %8 = arith.addf %5, %7 : vector<16x384xf32>
    %cst_7 = arith.constant 0.000000e+00 : f32
    %9 = vector.broadcast %cst_7 : f32 to vector<16x384xf32>
    %10 = arith.maximumf %8, %9 : vector<16x384xf32>
    %c0_8 = arith.constant 0 : index
    %c0_9 = arith.constant 0 : index
    %11 = vector.load %arg5[%c0_8, %c0_9] : memref<16x128xbf16, #tpu.memory_space<vmem>>, vector<16x128xbf16>
    %c0_10 = arith.constant 0 : index
    %c0_11 = arith.constant 0 : index
    %12 = vector.load %arg6[%c0_10, %c0_11] : memref<128x384xbf16, #tpu.memory_space<vmem>>, vector<128x384xbf16>
    %cst_12 = arith.constant dense<0.000000e+00> : vector<16x384xf32>
    %13 = tpu.matmul %11, %12, %cst_12 {dimension_numbers = #tpu.dot_dimension_numbers<[1], [0], [0], [1], [0, 0, 1, 1], [], []>} : vector<16x128xbf16>, vector<128x384xbf16>, vector<16x384xf32> -> vector<16x384xf32>
    %c0_13 = arith.constant 0 : index
    %c0_14 = arith.constant 0 : index
    %14 = vector.load %arg7[%c0_13, %c0_14] : memref<1x384xf32, #tpu.memory_space<vmem>>, vector<1x384xf32>
    %15 = vector.broadcast %14 : vector<1x384xf32> to vector<16x384xf32>
    %16 = arith.mulf %13, %15 : vector<16x384xf32>
    %c0_15 = arith.constant 0 : index
    %c0_16 = arith.constant 0 : index
    %17 = vector.load %arg8[%c0_15, %c0_16] : memref<1x384xf32, #tpu.memory_space<vmem>>, vector<1x384xf32>
    %18 = vector.broadcast %17 : vector<1x384xf32> to vector<16x384xf32>
    %19 = arith.addf %16, %18 : vector<16x384xf32>
    %cst_17 = arith.constant 0.000000e+00 : f32
    %20 = vector.broadcast %cst_17 : f32 to vector<16x384xf32>
    %21 = arith.maximumf %19, %20 : vector<16x384xf32>
    %22 = arith.addf %10, %21 : vector<16x384xf32>
    %c0_18 = arith.constant 0 : index
    %c0_19 = arith.constant 0 : index
    %23 = vector.load %arg9[%c0_18, %c0_19] : memref<16x128xbf16, #tpu.memory_space<vmem>>, vector<16x128xbf16>
    %c0_20 = arith.constant 0 : index
    %c0_21 = arith.constant 0 : index
    %24 = vector.load %arg10[%c0_20, %c0_21] : memref<128x384xbf16, #tpu.memory_space<vmem>>, vector<128x384xbf16>
    %cst_22 = arith.constant dense<0.000000e+00> : vector<16x384xf32>
    %25 = tpu.matmul %23, %24, %cst_22 {dimension_numbers = #tpu.dot_dimension_numbers<[1], [0], [0], [1], [0, 0, 1, 1], [], []>} : vector<16x128xbf16>, vector<128x384xbf16>, vector<16x384xf32> -> vector<16x384xf32>
    %c0_23 = arith.constant 0 : index
    %c0_24 = arith.constant 0 : index
    %26 = vector.load %arg11[%c0_23, %c0_24] : memref<1x384xf32, #tpu.memory_space<vmem>>, vector<1x384xf32>
    %27 = vector.broadcast %26 : vector<1x384xf32> to vector<16x384xf32>
    %28 = arith.mulf %25, %27 : vector<16x384xf32>
    %c0_25 = arith.constant 0 : index
    %c0_26 = arith.constant 0 : index
    %29 = vector.load %arg12[%c0_25, %c0_26] : memref<1x384xf32, #tpu.memory_space<vmem>>, vector<1x384xf32>
    %30 = vector.broadcast %29 : vector<1x384xf32> to vector<16x384xf32>
    %31 = arith.addf %28, %30 : vector<16x384xf32>
    %cst_27 = arith.constant 0.000000e+00 : f32
    %32 = vector.broadcast %cst_27 : f32 to vector<16x384xf32>
    %33 = arith.maximumf %31, %32 : vector<16x384xf32>
    %34 = arith.addf %22, %33 : vector<16x384xf32>
    %c0_28 = arith.constant 0 : index
    %c0_29 = arith.constant 0 : index
    %35 = vector.load %arg13[%c0_28, %c0_29] : memref<16x384xbf16, #tpu.memory_space<vmem>>, vector<16x384xbf16>
    %36 = arith.extf %35 : vector<16x384xbf16> to vector<16x384xf32>
    %37 = arith.addf %34, %36 : vector<16x384xf32>
    %c0_30 = arith.constant 0 : index
    %c0_31 = arith.constant 0 : index
    %38 = vector.load %arg14[%c0_30, %c0_31] : memref<16x384xf32, #tpu.memory_space<vmem>>, vector<16x384xf32>
    tpu.vector_store %arg14[%c0_30, %c0_31], %37 {strides = array<i32>} : memref<16x384xf32, #tpu.memory_space<vmem>>, vector<16x384xf32>,
    return
  }
  func.func @transform_0(%arg0: i32) -> (i32, i32) {
    %c0_i32 = arith.constant 0 : i32
    %c0_i32_0 = arith.constant 0 : i32
    return %arg0, %c0_i32 : i32, i32
  }
  func.func @transform_1(%arg0: i32) -> (i32, i32) {
    %c0_i32 = arith.constant 0 : i32
    %c0_i32_0 = arith.constant 0 : i32
    %c0_i32_1 = arith.constant 0 : i32
    return %c0_i32, %c0_i32_0 : i32, i32
  }
  func.func @transform_2(%arg0: i32) -> (i32, i32) {
    %c0_i32 = arith.constant 0 : i32
    %c0_i32_0 = arith.constant 0 : i32
    %c0_i32_1 = arith.constant 0 : i32
    return %c0_i32, %c0_i32_0 : i32, i32
  }
  func.func @transform_3(%arg0: i32) -> (i32, i32) {
    %c0_i32 = arith.constant 0 : i32
    %c0_i32_0 = arith.constant 0 : i32
    %c0_i32_1 = arith.constant 0 : i32
    return %c0_i32, %c0_i32_0 : i32, i32
  }
  func.func @transform_4(%arg0: i32) -> (i32, i32) {
    %c0_i32 = arith.constant 0 : i32
    %c0_i32_0 = arith.constant 0 : i32
    return %arg0, %c0_i32 : i32, i32
  }
  func.func @transform_5(%arg0: i32) -> (i32, i32) {
    %c0_i32 = arith.constant 0 : i32
    %c0_i32_0 = arith.constant 0 : i32
    %c0_i32_1 = arith.constant 0 : i32
    return %c0_i32, %c0_i32_0 : i32, i32
  }
  func.func @transform_6(%arg0: i32) -> (i32, i32) {
    %c0_i32 = arith.constant 0 : i32
    %c0_i32_0 = arith.constant 0 : i32
    %c0_i32_1 = arith.constant 0 : i32
    return %c0_i32, %c0_i32_0 : i32, i32
  }
  func.func @transform_7(%arg0: i32) -> (i32, i32) {
    %c0_i32 = arith.constant 0 : i32
    %c0_i32_0 = arith.constant 0 : i32
    %c0_i32_1 = arith.constant 0 : i32
    return %c0_i32, %c0_i32_0 : i32, i32
  }
  func.func @transform_8(%arg0: i32) -> (i32, i32) {
    %c0_i32 = arith.constant 0 : i32
    %c0_i32_0 = arith.constant 0 : i32
    return %arg0, %c0_i32 : i32, i32
  }
  func.func @transform_9(%arg0: i32) -> (i32, i32) {
    %c0_i32 = arith.constant 0 : i32
    %c0_i32_0 = arith.constant 0 : i32
    %c0_i32_1 = arith.constant 0 : i32
    return %c0_i32, %c0_i32_0 : i32, i32
  }
  func.func @transform_10(%arg0: i32) -> (i32, i32) {
    %c0_i32 = arith.constant 0 : i32
    %c0_i32_0 = arith.constant 0 : i32
    %c0_i32_1 = arith.constant 0 : i32
    return %c0_i32, %c0_i32_0 : i32, i32
  }
  func.func @transform_11(%arg0: i32) -> (i32, i32) {
    %c0_i32 = arith.constant 0 : i32
    %c0_i32_0 = arith.constant 0 : i32
    %c0_i32_1 = arith.constant 0 : i32
    return %c0_i32, %c0_i32_0 : i32, i32
  }
  func.func @transform_12(%arg0: i32) -> (i32, i32) {
    %c0_i32 = arith.constant 0 : i32
    %c0_i32_0 = arith.constant 0 : i32
    return %arg0, %c0_i32 : i32, i32
  }
  func.func @transform_13(%arg0: i32) -> (i32, i32) {
    %c0_i32 = arith.constant 0 : i32
    %c0_i32_0 = arith.constant 0 : i32
    return %arg0, %c0_i32 : i32, i32
  }
}

module attributes {stable_mosaic.version = 11 : i64} {
  func.func @_tap_conv_kernel(%arg0: i32, %arg1: memref<9x16x48xbf16, #tpu.memory_space<vmem>>, %arg2: memref<9x48x128xbf16, #tpu.memory_space<vmem>>, %arg3: memref<1x128xf32, #tpu.memory_space<vmem>>, %arg4: memref<1x128xf32, #tpu.memory_space<vmem>>, %arg5: memref<16x128xbf16, #tpu.memory_space<vmem>>) attributes {dimension_semantics = [#tpu.dimension_semantics<parallel>], iteration_bounds = array<i64: 2>, scalar_prefetch = 0 : i64, scratch_operands = 0 : i64, tpu.core_type = #tpu.core_type<tc>, window_params = [{transform_indices = @transform_0, window_bounds = array<i64: 9, 16, 48>}, {pipeline_mode = #tpu.pipeline_mode<synchronous>, transform_indices = @transform_1, window_bounds = array<i64: 9, 48, 128>}, {pipeline_mode = #tpu.pipeline_mode<synchronous>, transform_indices = @transform_2, window_bounds = array<i64: 1, 128>}, {pipeline_mode = #tpu.pipeline_mode<synchronous>, transform_indices = @transform_3, window_bounds = array<i64: 1, 128>}, {transform_indices = @transform_4, window_bounds = array<i64: 16, 128>}]} {
    %c0 = arith.constant 0 : index
    %c0_0 = arith.constant 0 : index
    %c0_1 = arith.constant 0 : index
    %0 = vector.load %arg1[%c0, %c0_0, %c0_1] : memref<9x16x48xbf16, #tpu.memory_space<vmem>>, vector<1x16x48xbf16>
    %1 = vector.shape_cast %0 : vector<1x16x48xbf16> to vector<16x48xbf16>
    %c0_2 = arith.constant 0 : index
    %c0_3 = arith.constant 0 : index
    %c0_4 = arith.constant 0 : index
    %2 = vector.load %arg2[%c0_2, %c0_3, %c0_4] : memref<9x48x128xbf16, #tpu.memory_space<vmem>>, vector<1x48x128xbf16>
    %3 = vector.shape_cast %2 : vector<1x48x128xbf16> to vector<48x128xbf16>
    %cst = arith.constant dense<0.000000e+00> : vector<16x128xf32>
    %4 = tpu.matmul %1, %3, %cst {dimension_numbers = #tpu.dot_dimension_numbers<[1], [0], [0], [1], [0, 0, 1, 1], [], []>} : vector<16x48xbf16>, vector<48x128xbf16>, vector<16x128xf32> -> vector<16x128xf32>
    %c1 = arith.constant 1 : index
    %c0_5 = arith.constant 0 : index
    %c0_6 = arith.constant 0 : index
    %5 = vector.load %arg1[%c1, %c0_5, %c0_6] : memref<9x16x48xbf16, #tpu.memory_space<vmem>>, vector<1x16x48xbf16>
    %6 = vector.shape_cast %5 : vector<1x16x48xbf16> to vector<16x48xbf16>
    %c1_7 = arith.constant 1 : index
    %c0_8 = arith.constant 0 : index
    %c0_9 = arith.constant 0 : index
    %7 = vector.load %arg2[%c1_7, %c0_8, %c0_9] : memref<9x48x128xbf16, #tpu.memory_space<vmem>>, vector<1x48x128xbf16>
    %8 = vector.shape_cast %7 : vector<1x48x128xbf16> to vector<48x128xbf16>
    %cst_10 = arith.constant dense<0.000000e+00> : vector<16x128xf32>
    %9 = tpu.matmul %6, %8, %cst_10 {dimension_numbers = #tpu.dot_dimension_numbers<[1], [0], [0], [1], [0, 0, 1, 1], [], []>} : vector<16x48xbf16>, vector<48x128xbf16>, vector<16x128xf32> -> vector<16x128xf32>
    %10 = arith.addf %4, %9 : vector<16x128xf32>
    %c2 = arith.constant 2 : index
    %c0_11 = arith.constant 0 : index
    %c0_12 = arith.constant 0 : index
    %11 = vector.load %arg1[%c2, %c0_11, %c0_12] : memref<9x16x48xbf16, #tpu.memory_space<vmem>>, vector<1x16x48xbf16>
    %12 = vector.shape_cast %11 : vector<1x16x48xbf16> to vector<16x48xbf16>
    %c2_13 = arith.constant 2 : index
    %c0_14 = arith.constant 0 : index
    %c0_15 = arith.constant 0 : index
    %13 = vector.load %arg2[%c2_13, %c0_14, %c0_15] : memref<9x48x128xbf16, #tpu.memory_space<vmem>>, vector<1x48x128xbf16>
    %14 = vector.shape_cast %13 : vector<1x48x128xbf16> to vector<48x128xbf16>
    %cst_16 = arith.constant dense<0.000000e+00> : vector<16x128xf32>
    %15 = tpu.matmul %12, %14, %cst_16 {dimension_numbers = #tpu.dot_dimension_numbers<[1], [0], [0], [1], [0, 0, 1, 1], [], []>} : vector<16x48xbf16>, vector<48x128xbf16>, vector<16x128xf32> -> vector<16x128xf32>
    %16 = arith.addf %10, %15 : vector<16x128xf32>
    %c3 = arith.constant 3 : index
    %c0_17 = arith.constant 0 : index
    %c0_18 = arith.constant 0 : index
    %17 = vector.load %arg1[%c3, %c0_17, %c0_18] : memref<9x16x48xbf16, #tpu.memory_space<vmem>>, vector<1x16x48xbf16>
    %18 = vector.shape_cast %17 : vector<1x16x48xbf16> to vector<16x48xbf16>
    %c3_19 = arith.constant 3 : index
    %c0_20 = arith.constant 0 : index
    %c0_21 = arith.constant 0 : index
    %19 = vector.load %arg2[%c3_19, %c0_20, %c0_21] : memref<9x48x128xbf16, #tpu.memory_space<vmem>>, vector<1x48x128xbf16>
    %20 = vector.shape_cast %19 : vector<1x48x128xbf16> to vector<48x128xbf16>
    %cst_22 = arith.constant dense<0.000000e+00> : vector<16x128xf32>
    %21 = tpu.matmul %18, %20, %cst_22 {dimension_numbers = #tpu.dot_dimension_numbers<[1], [0], [0], [1], [0, 0, 1, 1], [], []>} : vector<16x48xbf16>, vector<48x128xbf16>, vector<16x128xf32> -> vector<16x128xf32>
    %22 = arith.addf %16, %21 : vector<16x128xf32>
    %c4 = arith.constant 4 : index
    %c0_23 = arith.constant 0 : index
    %c0_24 = arith.constant 0 : index
    %23 = vector.load %arg1[%c4, %c0_23, %c0_24] : memref<9x16x48xbf16, #tpu.memory_space<vmem>>, vector<1x16x48xbf16>
    %24 = vector.shape_cast %23 : vector<1x16x48xbf16> to vector<16x48xbf16>
    %c4_25 = arith.constant 4 : index
    %c0_26 = arith.constant 0 : index
    %c0_27 = arith.constant 0 : index
    %25 = vector.load %arg2[%c4_25, %c0_26, %c0_27] : memref<9x48x128xbf16, #tpu.memory_space<vmem>>, vector<1x48x128xbf16>
    %26 = vector.shape_cast %25 : vector<1x48x128xbf16> to vector<48x128xbf16>
    %cst_28 = arith.constant dense<0.000000e+00> : vector<16x128xf32>
    %27 = tpu.matmul %24, %26, %cst_28 {dimension_numbers = #tpu.dot_dimension_numbers<[1], [0], [0], [1], [0, 0, 1, 1], [], []>} : vector<16x48xbf16>, vector<48x128xbf16>, vector<16x128xf32> -> vector<16x128xf32>
    %28 = arith.addf %22, %27 : vector<16x128xf32>
    %c5 = arith.constant 5 : index
    %c0_29 = arith.constant 0 : index
    %c0_30 = arith.constant 0 : index
    %29 = vector.load %arg1[%c5, %c0_29, %c0_30] : memref<9x16x48xbf16, #tpu.memory_space<vmem>>, vector<1x16x48xbf16>
    %30 = vector.shape_cast %29 : vector<1x16x48xbf16> to vector<16x48xbf16>
    %c5_31 = arith.constant 5 : index
    %c0_32 = arith.constant 0 : index
    %c0_33 = arith.constant 0 : index
    %31 = vector.load %arg2[%c5_31, %c0_32, %c0_33] : memref<9x48x128xbf16, #tpu.memory_space<vmem>>, vector<1x48x128xbf16>
    %32 = vector.shape_cast %31 : vector<1x48x128xbf16> to vector<48x128xbf16>
    %cst_34 = arith.constant dense<0.000000e+00> : vector<16x128xf32>
    %33 = tpu.matmul %30, %32, %cst_34 {dimension_numbers = #tpu.dot_dimension_numbers<[1], [0], [0], [1], [0, 0, 1, 1], [], []>} : vector<16x48xbf16>, vector<48x128xbf16>, vector<16x128xf32> -> vector<16x128xf32>
    %34 = arith.addf %28, %33 : vector<16x128xf32>
    %c6 = arith.constant 6 : index
    %c0_35 = arith.constant 0 : index
    %c0_36 = arith.constant 0 : index
    %35 = vector.load %arg1[%c6, %c0_35, %c0_36] : memref<9x16x48xbf16, #tpu.memory_space<vmem>>, vector<1x16x48xbf16>
    %36 = vector.shape_cast %35 : vector<1x16x48xbf16> to vector<16x48xbf16>
    %c6_37 = arith.constant 6 : index
    %c0_38 = arith.constant 0 : index
    %c0_39 = arith.constant 0 : index
    %37 = vector.load %arg2[%c6_37, %c0_38, %c0_39] : memref<9x48x128xbf16, #tpu.memory_space<vmem>>, vector<1x48x128xbf16>
    %38 = vector.shape_cast %37 : vector<1x48x128xbf16> to vector<48x128xbf16>
    %cst_40 = arith.constant dense<0.000000e+00> : vector<16x128xf32>
    %39 = tpu.matmul %36, %38, %cst_40 {dimension_numbers = #tpu.dot_dimension_numbers<[1], [0], [0], [1], [0, 0, 1, 1], [], []>} : vector<16x48xbf16>, vector<48x128xbf16>, vector<16x128xf32> -> vector<16x128xf32>
    %40 = arith.addf %34, %39 : vector<16x128xf32>
    %c7 = arith.constant 7 : index
    %c0_41 = arith.constant 0 : index
    %c0_42 = arith.constant 0 : index
    %41 = vector.load %arg1[%c7, %c0_41, %c0_42] : memref<9x16x48xbf16, #tpu.memory_space<vmem>>, vector<1x16x48xbf16>
    %42 = vector.shape_cast %41 : vector<1x16x48xbf16> to vector<16x48xbf16>
    %c7_43 = arith.constant 7 : index
    %c0_44 = arith.constant 0 : index
    %c0_45 = arith.constant 0 : index
    %43 = vector.load %arg2[%c7_43, %c0_44, %c0_45] : memref<9x48x128xbf16, #tpu.memory_space<vmem>>, vector<1x48x128xbf16>
    %44 = vector.shape_cast %43 : vector<1x48x128xbf16> to vector<48x128xbf16>
    %cst_46 = arith.constant dense<0.000000e+00> : vector<16x128xf32>
    %45 = tpu.matmul %42, %44, %cst_46 {dimension_numbers = #tpu.dot_dimension_numbers<[1], [0], [0], [1], [0, 0, 1, 1], [], []>} : vector<16x48xbf16>, vector<48x128xbf16>, vector<16x128xf32> -> vector<16x128xf32>
    %46 = arith.addf %40, %45 : vector<16x128xf32>
    %c8 = arith.constant 8 : index
    %c0_47 = arith.constant 0 : index
    %c0_48 = arith.constant 0 : index
    %47 = vector.load %arg1[%c8, %c0_47, %c0_48] : memref<9x16x48xbf16, #tpu.memory_space<vmem>>, vector<1x16x48xbf16>
    %48 = vector.shape_cast %47 : vector<1x16x48xbf16> to vector<16x48xbf16>
    %c8_49 = arith.constant 8 : index
    %c0_50 = arith.constant 0 : index
    %c0_51 = arith.constant 0 : index
    %49 = vector.load %arg2[%c8_49, %c0_50, %c0_51] : memref<9x48x128xbf16, #tpu.memory_space<vmem>>, vector<1x48x128xbf16>
    %50 = vector.shape_cast %49 : vector<1x48x128xbf16> to vector<48x128xbf16>
    %cst_52 = arith.constant dense<0.000000e+00> : vector<16x128xf32>
    %51 = tpu.matmul %48, %50, %cst_52 {dimension_numbers = #tpu.dot_dimension_numbers<[1], [0], [0], [1], [0, 0, 1, 1], [], []>} : vector<16x48xbf16>, vector<48x128xbf16>, vector<16x128xf32> -> vector<16x128xf32>
    %52 = arith.addf %46, %51 : vector<16x128xf32>
    %c0_53 = arith.constant 0 : index
    %c0_54 = arith.constant 0 : index
    %53 = vector.load %arg3[%c0_53, %c0_54] : memref<1x128xf32, #tpu.memory_space<vmem>>, vector<1x128xf32>
    %54 = vector.broadcast %53 : vector<1x128xf32> to vector<16x128xf32>
    %55 = arith.mulf %52, %54 : vector<16x128xf32>
    %c0_55 = arith.constant 0 : index
    %c0_56 = arith.constant 0 : index
    %56 = vector.load %arg4[%c0_55, %c0_56] : memref<1x128xf32, #tpu.memory_space<vmem>>, vector<1x128xf32>
    %57 = vector.broadcast %56 : vector<1x128xf32> to vector<16x128xf32>
    %58 = arith.addf %55, %57 : vector<16x128xf32>
    %cst_57 = arith.constant 0.000000e+00 : f32
    %59 = vector.broadcast %cst_57 : f32 to vector<16x128xf32>
    %60 = arith.maximumf %58, %59 : vector<16x128xf32>
    %61 = arith.truncf %60 : vector<16x128xf32> to vector<16x128xbf16>
    %c0_58 = arith.constant 0 : index
    %c0_59 = arith.constant 0 : index
    %62 = vector.load %arg5[%c0_58, %c0_59] : memref<16x128xbf16, #tpu.memory_space<vmem>>, vector<16x128xbf16>
    tpu.vector_store %arg5[%c0_58, %c0_59], %61 {strides = array<i32>} : memref<16x128xbf16, #tpu.memory_space<vmem>>, vector<16x128xbf16>,
    return
  }
  func.func @transform_0(%arg0: i32) -> (i32, i32, i32) {
    %c0_i32 = arith.constant 0 : i32
    %c0_i32_0 = arith.constant 0 : i32
    %c0_i32_1 = arith.constant 0 : i32
    return %c0_i32, %arg0, %c0_i32_0 : i32, i32, i32
  }
  func.func @transform_1(%arg0: i32) -> (i32, i32, i32) {
    %c0_i32 = arith.constant 0 : i32
    %c0_i32_0 = arith.constant 0 : i32
    %c0_i32_1 = arith.constant 0 : i32
    %c0_i32_2 = arith.constant 0 : i32
    return %c0_i32, %c0_i32_0, %c0_i32_1 : i32, i32, i32
  }
  func.func @transform_2(%arg0: i32) -> (i32, i32) {
    %c0_i32 = arith.constant 0 : i32
    %c0_i32_0 = arith.constant 0 : i32
    %c0_i32_1 = arith.constant 0 : i32
    return %c0_i32, %c0_i32_0 : i32, i32
  }
  func.func @transform_3(%arg0: i32) -> (i32, i32) {
    %c0_i32 = arith.constant 0 : i32
    %c0_i32_0 = arith.constant 0 : i32
    %c0_i32_1 = arith.constant 0 : i32
    return %c0_i32, %c0_i32_0 : i32, i32
  }
  func.func @transform_4(%arg0: i32) -> (i32, i32) {
    %c0_i32 = arith.constant 0 : i32
    %c0_i32_0 = arith.constant 0 : i32
    return %arg0, %c0_i32 : i32, i32
  }
}

</mosaic_0001>

<bundles_post_ra>
// kernel: inception_a.5
= control target key start
LH: loop header
LB: loop body
LE: loop exit
PB: predicated region body
PF: predicated region fallthrough
CT: control target
= control target key end

     0   :  { %s3210_s15 = smov 0   ;;  %s3212_s16 = smov 0   ;;  %s4091_s0 = inlined_call_operand.vmem [shape: bf16[9,32,192], index: 0, kind: input, shape index: {}]   ;;  %s4092_s1 = inlined_call_operand.vmem [shape: bf16[9,192,192], index: 1, kind: input, shape index: {}]   ;;  %s4093_s2 = inlined_call_operand.vmem [shape: f32[1,192], index: 2, kind: input, shape index: {}]   ;;  %s4094_s3 = inlined_call_operand.vmem [shape: f32[1,192], index: 3, kind: input, shape index: {}]   ;;  %s4095_s4 = inlined_call_operand.vmem [shape: bf16[32,384], index: 4, kind: output, shape index: {}]  }
   0x1   :  { %s3214_s17 = smov 0  }
   0x2 LB: > { %s2335_s18 = sadd.s32 4294967295, %s3181_s17   ;;  %s3227_s19 = sadd.s32 1, %s3181_s17   ;;  %s3181_s17 = sphi %s3214_s17, %s4098_s17   ;;  %s3177_s16 = sphi %s3212_s16, %s4097_s16   ;;  %s3173_s15 = sphi %s3210_s15, %s4096_s15  }
   0x3   : > { %s18_s20 = ssub.s32 %s3181_s17, %s3227_s19  ;;  %s21_s21 = sadd.s32 1, %s3177_s16 }
   0x4   : > { %p19_p0 = scmp.eq.s32.totalorder %s18_s20, 0  ;;  %p28_p1 = scmp.ne.s32.totalorder %s3177_s16, %s3173_s15 }
   0x5   : > { %p29_p2 = scmp.eq.s32.totalorder %s3181_s17, 0  ;;  %p2338_p4 = scmp.ge.s32.totalorder %s3181_s17, 2 }
   0x6   : > { %s3236_s22 = scalar_select %p19_p0, %s3177_s16, %s21_s21  }
   0x7   : > { %p30_p3 = por %p29_p2, %p28_p1  ;;  %152 = sbr.rel (%p2338_p4) target bundleno = 25 (0x19), region = 28 }
   0xc   : > { %155 = sbr.rel (!%p30_p3) target bundleno = 25 (0x19), region = 32  ;;  %s157_s23 = sand.u32 (%p30_p3), 1, %s3177_s16  }
   0xd   : > { %s2805_s24 = sshll.u32 (%p30_p3), %s3181_s17, 4  ;;  %s2806_s25 = smul.u32 (%p30_p3), 144, %s157_s23 }
   0xe   : > { %s3244_s28 = scalar_lea.vmem (%p30_p3), %s4091_s0, %s2805_s24 }
   0xf   : > { %v226_v0 = vld [vmem:[%s3244_s28] sm:$0xff] (%p30_p3)  ;;  %v228_v1 = vld [vmem:[%s3244_s28 + $0x8] sm:$0xff] (%p30_p3)  ;;  %s159_s29 = scalar_lea.vmem (%p30_p3), [#allocation2], %s2806_s25 }
  0x10   : > { %v230_v2 = vld [vmem:[%s3244_s28 + $0x20] sm:$0xff] (%p30_p3)  ;;  %v232_v3 = vld [vmem:[%s3244_s28 + $0x28] sm:$0xff] (%p30_p3)  ;;  %227 = vst [vmem:[%s159_s29] sm:$0xff] (%p30_p3), %v226_v0  ;;  %229 = vst [vmem:[%s159_s29 + $0x8] sm:$0xff] (%p30_p3), %v228_v1 }
  0x11   : > { %v234_v4 = vld [vmem:[%s3244_s28 + $0x40] sm:$0xff]  ;;  %v236_v5 = vld [vmem:[%s3244_s28 + $0x48] sm:$0xff]  ;;  %231 = vst [vmem:[%s159_s29 + $0x10] sm:$0xff] %v230_v2  ;;  %233 = vst [vmem:[%s159_s29 + $0x18] sm:$0xff] %v232_v3 }
  0x12   : > { %235 = vst [vmem:[%s159_s29 + $0x20] sm:$0xff] %v234_v4  ;;  %237 = vst [vmem:[%s159_s29 + $0x28] sm:$0xff] %v236_v5  ;;  %v238_v6 = vld [vmem:[%s3244_s28 + $0x60] sm:$0xff]  ;;  %v240_v7 = vld [vmem:[%s3244_s28 + $0x68] sm:$0xff] }
  0x13   : > { %v242_v8 = vld [vmem:[%s3244_s28 + $0x80] sm:$0xff]  ;;  %239 = vst [vmem:[%s159_s29 + $0x30] sm:$0xff] %v238_v6  ;;  %241 = vst [vmem:[%s159_s29 + $0x38] sm:$0xff] %v240_v7  ;;  %v244_v9 = vld [vmem:[%s3244_s28 + $0x88] sm:$0xff] }
  0x14   : > { %243 = vst [vmem:[%s159_s29 + $0x40] sm:$0xff] %v242_v8  ;;  %v246_v10 = vld [vmem:[%s3244_s28 + $0xa0] sm:$0xff]  ;;  %v248_v11 = vld [vmem:[%s3244_s28 + $0xa8] sm:$0xff]  ;;  %245 = vst [vmem:[%s159_s29 + $0x48] sm:$0xff] %v244_v9 }
  0x15   : > { %247 = vst [vmem:[%s159_s29 + $0x50] sm:$0xff] %v246_v10  ;;  %249 = vst [vmem:[%s159_s29 + $0x58] sm:$0xff] %v248_v11  ;;  %v250_v12 = vld [vmem:[%s3244_s28 + $0xc0] sm:$0xff]  ;;  %v252_v13 = vld [vmem:[%s3244_s28 + $0xc8] sm:$0xff] }
  0x16   : > { %v254_v14 = vld [vmem:[%s3244_s28 + $0xe0] sm:$0xff]  ;;  %251 = vst [vmem:[%s159_s29 + $0x60] sm:$0xff] %v250_v12  ;;  %253 = vst [vmem:[%s159_s29 + $0x68] sm:$0xff] %v252_v13  ;;  %v256_v15 = vld [vmem:[%s3244_s28 + $0xe8] sm:$0xff] }
  0x17   : > { %255 = vst [vmem:[%s159_s29 + $0x70] sm:$0xff] %v254_v14  ;;  %v258_v16 = vld [vmem:[%s3244_s28 + $0x100] sm:$0xff]  ;;  %v260_v17 = vld [vmem:[%s3244_s28 + $0x108] sm:$0xff]  ;;  %257 = vst [vmem:[%s159_s29 + $0x78] sm:$0xff] %v256_v15 }
  0x18   : > { %259 = vst [vmem:[%s159_s29 + $0x80] sm:$0xff] %v258_v16  ;;  %261 = vst [vmem:[%s159_s29 + $0x88] sm:$0xff] %v260_v17 }
  0x19 PF: > { %p2342_p5 = scmp.ge.s32.totalorder %s3181_s17, 1  ;;  %p266_p6 = scmp.lt.s32.totalorder %s3181_s17, 3 }
  0x1b   : > { %p267_p7 = pnand %p2342_p5, %p266_p6 }
  0x1c   : > { %s273_s21 = sand.u32 (!%p267_p7), 1, %s3173_s15   ;;  %s3184_s10 = smov (!%p267_p7), 64  }
  0x1d   : > { %270 = sbr.rel (%p267_p7) target bundleno = 488 (0x1e8), region = 70 }
  0x1e   : > { %s2807_s15 = smul.u32 (!%p267_p7), 144, %s273_s21 }
  0x20   : > { %s3381_s27 = scalar_lea.vmem (!%p267_p7), [#allocation2], %s2807_s15 }
  0x22   : > { %v2835_v18 = vld [vmem:[%s4092_s1 + $0x134] ss:$8 sps:$4 sm:$0xff]   ;;  %v2839_v20 = vld [vmem:[%s4092_s1 + $0x130] ss:$8 sps:$4 sm:$0xff]   ;;  %v2841_v22 = vld [vmem:[%s4092_s1 + $0x124] ss:$8 sps:$4 sm:$0xff]  }
  0x23   : > { %v2837_v19 = vld [vmem:[%s4092_s1 + $0x74] ss:$8 sps:$4 sm:$0xff]   ;;  %501 = vmatprep.subr.bf16.mxu0 %v2835_v18  ;;  %v2840_v21 = vld [vmem:[%s4092_s1 + $0x70] ss:$8 sps:$4 sm:$0xff]   ;;  %v2843_v23 = vld [vmem:[%s4092_s1 + $0x64] ss:$8 sps:$4 sm:$0xff]  }
  0x24   : > { %676 = vmatprep.subr.bf16.mxu1 %v2837_v19  ;;  %502 = vmatpush1.bf16.msra.mxu0 %v2839_v20  ;;  %v2845_v24 = vld [vmem:[%s4092_s1 + $0x120] ss:$8 sps:$4 sm:$0xff]   ;;  %v2847_v26 = vld [vmem:[%s4092_s1 + $0x114] ss:$8 sps:$4 sm:$0xff]   ;;  %v2851_v28 = vld [vmem:[%s4092_s1 + $0x110] ss:$8 sps:$4 sm:$0xff]  }
  0x25   : > { %677 = vmatpush1.bf16.msra.mxu1 %v2840_v21  ;;  %503 = vmatprep.subr.bf16.mxu0 %v2841_v22  ;;  %v2846_v25 = vld [vmem:[%s4092_s1 + $0x60] ss:$8 sps:$4 sm:$0xff]   ;;  %v2849_v27 = vld [vmem:[%s4092_s1 + $0x54] ss:$8 sps:$4 sm:$0xff]   ;;  %v2852_v29 = vld [vmem:[%s4092_s1 + $0x50] ss:$8 sps:$4 sm:$0xff]  }
  0x26   : > { %678 = vmatprep.subr.bf16.mxu1 %v2843_v23  ;;  %v2853_v30 = vld [vmem:[%s4092_s1 + $0x104] ss:$8 sps:$4 sm:$0xff]   ;;  %v2857_v32 = vld [vmem:[%s4092_s1 + $0x100] ss:$8 sps:$4 sm:$0xff]   ;;  %v2859_v34 = vld [vmem:[%s4092_s1 + $0xf4] ss:$8 sps:$4 sm:$0xff]  }
  0x27   : > { %v2855_v31 = vld [vmem:[%s4092_s1 + $0x44] ss:$8 sps:$4 sm:$0xff]   ;;  %v2858_v33 = vld [vmem:[%s4092_s1 + $0x40] ss:$8 sps:$4 sm:$0xff]   ;;  %v2861_v35 = vld [vmem:[%s4092_s1 + $0x34] ss:$8 sps:$4 sm:$0xff]  }
  0x28   : > { %504 = vmatpush1.bf16.msra.mxu0 %v2845_v24  ;;  %v2863_v36 = vld [vmem:[%s4092_s1 + $0xf0] ss:$8 sps:$4 sm:$0xff]   ;;  %v2865_v38 = vld [vmem:[%s4092_s1 + $0xe4] ss:$8 sps:$4 sm:$0xff]   ;;  %v2869_v40 = vld [vmem:[%s4092_s1 + $0xe0] ss:$8 sps:$4 sm:$0xff]  }
  0x29   : > { %679 = vmatpush1.bf16.msra.mxu1 %v2846_v25  ;;  %505 = vmatprep.subr.bf16.mxu0 %v2847_v26  ;;  %v2864_v37 = vld [vmem:[%s4092_s1 + $0x30] ss:$8 sps:$4 sm:$0xff]   ;;  %v2867_v39 = vld [vmem:[%s4092_s1 + $0x24] ss:$8 sps:$4 sm:$0xff]   ;;  %v2870_v41 = vld [vmem:[%s4092_s1 + $0x20] ss:$8 sps:$4 sm:$0xff]  }
  0x2a   : > { %680 = vmatprep.subr.bf16.mxu1 %v2849_v27  ;;  %v2871_v42 = vld [vmem:[%s4092_s1 + $0xd4] ss:$8 sps:$4 sm:$0xff]   ;;  %v2875_v44 = vld [vmem:[%s4092_s1 + $0xd0] ss:$8 sps:$4 sm:$0xff]   ;;  %v2877_v46 = vld [vmem:[%s4092_s1 + $0xc4] ss:$8 sps:$4 sm:$0xff]  }
  0x2b   : > { %v2873_v43 = vld [vmem:[%s4092_s1 + $0x14] ss:$8 sps:$4 sm:$0xff]   ;;  %v2876_v45 = vld [vmem:[%s4092_s1 + $0x10] ss:$8 sps:$4 sm:$0xff]   ;;  %v2879_v47 = vld [vmem:[%s4092_s1 + $0x4] ss:$8 sps:$4 sm:$0xff]  }
  0x2c   : > { %506 = vmatpush1.bf16.msra.mxu0 %v2851_v28  ;;  %v2881_v48 = vld [vmem:[%s4092_s1 + $0xc0] ss:$8 sps:$4 sm:$0xff]   ;;  %v2883_v50 = vld [vmem:[%s4092_s1 + $0x174] ss:$8 sps:$4 sm:$0xff]   ;;  %v2887_v52 = vld [vmem:[%s4092_s1 + $0x170] ss:$8 sps:$4 sm:$0xff]  }
  0x2d   : > { %681 = vmatpush1.bf16.msra.mxu1 %v2852_v29  ;;  %507 = vmatprep.subr.bf16.mxu0 %v2853_v30  ;;  %v2882_v49 = vld [vmem:[%s4092_s1] ss:$8 sps:$4 sm:$0xff]   ;;  %v2885_v51 = vld [vmem:[%s4092_s1 + $0xb4] ss:$8 sps:$4 sm:$0xff]   ;;  %v2888_v53 = vld [vmem:[%s4092_s1 + $0xb0] ss:$8 sps:$4 sm:$0xff]  }
  0x2e   : > { %682 = vmatprep.subr.bf16.mxu1 %v2855_v31  ;;  %v2889_v54 = vld [vmem:[%s4092_s1 + $0x164] ss:$8 sps:$4 sm:$0xff]   ;;  %v3183_v59 = vmov 0   ;;  %v2893_v1 = vld [vmem:[%s4092_s1 + $0x160] ss:$8 sps:$4 sm:$0xff]   ;;  %vm497_vm0 = vcmask 523264  }
  0x2f   : > { %v2891_v55 = vld [vmem:[%s4092_s1 + $0xa4] ss:$8 sps:$4 sm:$0xff]   ;;  %v2894_v2 = vld [vmem:[%s4092_s1 + $0xa0] ss:$8 sps:$4 sm:$0xff]   ;;  %v2895_v5 = vld [vmem:[%s4092_s1 + $0x154] ss:$8 sps:$4 sm:$0xff]  }
  0x30   : > { %508 = vmatpush1.bf16.msra.mxu0 %v2857_v32  ;;  %v2345_v56 = vld [vmem:[%s3381_s27 + $0x10] sm:$0xff]  ;;  %v2346_v57 = vld [vmem:[%s3381_s27 + $0x18] sm:$0xff]  ;;  %v308_v58 = vld [vmem:[%s3381_s27] sm:$0xff] }
  0x31   : > { %683 = vmatpush1.bf16.msra.mxu1 %v2858_v33  ;;  %509 = vmatprep.subr.bf16.mxu0 %v2859_v34  ;;  %v3387_v60 = vmax.bf16 %v3183_v59, %v2345_v56  ;;  %v3390_v61 = vmax.bf16 %v3183_v59, %v2346_v57  ;;  %v309_v62 = vld [vmem:[%s3381_s27 + $0x8] sm:$0xff]  ;;  %v3394_v63 = vmax.bf16 %v3183_v59, %v308_v58 }
  0x32   : > { %684 = vmatprep.subr.bf16.mxu1 %v2861_v35  ;;  %v3397_v0 = vmax.bf16 %v3183_v59, %v309_v62  ;;  %v2897_v8 = vld [vmem:[%s4092_s1 + $0x94] ss:$8 sps:$4 sm:$0xff]   ;;  %v2899_v9 = vld [vmem:[%s4092_s1 + $0x150] ss:$8 sps:$4 sm:$0xff]   ;;  %v2901_v11 = vld [vmem:[%s4092_s1 + $0x144] ss:$8 sps:$4 sm:$0xff]  }
  0x33   : > { %v2372_v3 = vcombine.high %v3387_v60, %v3390_v61  ;;  %v341_v4 = vmax.bf16 %v3387_v60, %v3394_v63  ;;  %v2900_v10 = vld [vmem:[%s4092_s1 + $0x90] ss:$8 sps:$4 sm:$0xff]   ;;  %v2903_v12 = vld [vmem:[%s4092_s1 + $0x84] ss:$8 sps:$4 sm:$0xff]   ;;  %v2905_v13 = vld [vmem:[%s4092_s1 + $0x140] ss:$8 sps:$4 sm:$0xff]   ;;  %v2371_v17 = vcombine.low %v3387_v60, %v3390_v61 }
  0x34   : > { %510 = vmatpush1.bf16.msra.mxu0 %v2863_v36  ;;  %v342_v6 = vmax.bf16 %v3390_v61, %v3397_v0  ;;  %v2399_v7 = vcombine.high %v3394_v63, %v3397_v0  ;;  %v2906_v14 = vld [vmem:[%s4092_s1 + $0x80] ss:$8 sps:$4 sm:$0xff]   ;;  %v2909_v15 = vld [vmem:[%s4092_s1 + $0x1f4] ss:$8 sps:$4 sm:$0xff]   ;;  %v2398_v18 = vcombine.low %v3394_v63, %v3397_v0  ;;  %v2907_v19 = vld [vmem:[%s4092_s1 + $0x1f0] ss:$8 sps:$4 sm:$0xff]  }
  0x35   : > { %685 = vmatpush1.bf16.msra.mxu1 %v2864_v37  ;;  %511 = vmatprep.subr.bf16.mxu0 %v2865_v38  ;;  %v2912_v16 = vld [vmem:[%s4092_s1 + $0x2b4] ss:$8 sps:$4 sm:$0xff]   ;;  %v2910_v20 = vld [vmem:[%s4092_s1 + $0x2b0] ss:$8 sps:$4 sm:$0xff]   ;;  %v2915_v21 = vld [vmem:[%s4092_s1 + $0x1e4] ss:$8 sps:$4 sm:$0xff]  }
  0x36   : > { %686 = vmatprep.subr.bf16.mxu1 %v2867_v39  ;;  %2397 = vmatprep.mubr.msk.bf16.mxu0 %vm497_vm0, %v2372_v3  ;;  %v2918_v22 = vld [vmem:[%s4092_s1 + $0x2a4] ss:$8 sps:$4 sm:$0xff]   ;;  %v2913_v23 = vld [vmem:[%s4092_s1 + $0x1e0] ss:$8 sps:$4 sm:$0xff]   ;;  %v2921_v25 = vld [vmem:[%s4092_s1 + $0x1d4] ss:$8 sps:$4 sm:$0xff]  }
  0x37   : > { %2424 = vmatprep.mubr.msk.bf16.mxu1 %vm497_vm0, %v2399_v7  ;;  %v2916_v24 = vld [vmem:[%s4092_s1 + $0x2a0] ss:$8 sps:$4 sm:$0xff]   ;;  %v2924_v26 = vld [vmem:[%s4092_s1 + $0x294] ss:$8 sps:$4 sm:$0xff]   ;;  %v2919_v27 = vld [vmem:[%s4092_s1 + $0x1d0] ss:$8 sps:$4 sm:$0xff]  }
  0x38   : > { %512 = vmatpush1.bf16.msra.mxu0 %v2869_v40  ;;  %v2922_v28 = vld [vmem:[%s4092_s1 + $0x290] ss:$8 sps:$4 sm:$0xff]   ;;  %v2927_v29 = vld [vmem:[%s4092_s1 + $0x1c4] ss:$8 sps:$4 sm:$0xff]   ;;  %v2925_v31 = vld [vmem:[%s4092_s1 + $0x1c0] ss:$8 sps:$4 sm:$0xff]  }
  0x39   : > { %687 = vmatpush1.bf16.msra.mxu1 %v2870_v41  ;;  %513 = vmatprep.subr.bf16.mxu0 %v2871_v42  ;;  %v2930_v30 = vld [vmem:[%s4092_s1 + $0x284] ss:$8 sps:$4 sm:$0xff]   ;;  %v2928_v32 = vld [vmem:[%s4092_s1 + $0x280] ss:$8 sps:$4 sm:$0xff]   ;;  %v2933_v33 = vld [vmem:[%s4092_s1 + $0x1b4] ss:$8 sps:$4 sm:$0xff]  }
  0x3a   : > { %688 = vmatprep.subr.bf16.mxu1 %v2873_v43  ;;  %v2936_v34 = vld [vmem:[%s4092_s1 + $0x274] ss:$8 sps:$4 sm:$0xff]   ;;  %v2931_v35 = vld [vmem:[%s4092_s1 + $0x1b0] ss:$8 sps:$4 sm:$0xff]   ;;  %v2939_v37 = vld [vmem:[%s4092_s1 + $0x1a4] ss:$8 sps:$4 sm:$0xff]  }
  0x3b   : > { %v2934_v36 = vld [vmem:[%s4092_s1 + $0x270] ss:$8 sps:$4 sm:$0xff]   ;;  %v2942_v38 = vld [vmem:[%s4092_s1 + $0x264] ss:$8 sps:$4 sm:$0xff]   ;;  %v2937_v41 = vld [vmem:[%s4092_s1 + $0x1a0] ss:$8 sps:$4 sm:$0xff]  }
  0x3c   : > { %514 = vmatpush1.bf16.msra.mxu0 %v2875_v44  ;;  %v2425_v39 = vld [vmem:[%s3381_s27 + $0x20] sm:$0xff]  ;;  %v2426_v40 = vld [vmem:[%s3381_s27 + $0x28] sm:$0xff] }
  0x3d   : > { %689 = vmatpush1.bf16.msra.mxu1 %v2876_v45  ;;  %515 = vmatprep.subr.bf16.mxu0 %v2877_v46  ;;  %v3515_v42 = vmax.bf16 %v3183_v59, %v2425_v39  ;;  %v3518_v43 = vmax.bf16 %v3183_v59, %v2426_v40  ;;  %v2940_v44 = vld [vmem:[%s4092_s1 + $0x260] ss:$8 sps:$4 sm:$0xff]   ;;  %v2954_v56 = vld [vmem:[%s4092_s1 + $0x244] ss:$8 sps:$4 sm:$0xff]   ;;  %v2957_v62 = vld [vmem:[%s4092_s1 + $0x234] ss:$8 sps:$4 sm:$0xff]  }
  0x3e   : > { %690 = vmatprep.subr.bf16.mxu1 %v2879_v47  ;;  %v2478_v45 = vld [vmem:[%s3381_s27 + $0x30] sm:$0xff]  ;;  %v2479_v46 = vld [vmem:[%s3381_s27 + $0x38] sm:$0xff] }
  0x3f   : > { %v2945_v47 = vld [vmem:[%s4092_s1 + $0x194] ss:$8 sps:$4 sm:$0xff]   ;;  %v2949_v57 = vld [vmem:[%s4092_s1 + $0x180] ss:$8 sps:$4 sm:$0xff]   ;;  %v2958_v3 = vld [vmem:[%s4092_s1 + $0x2f0] ss:$8 sps:$4 sm:$0xff]  }
  0x40   : > { %516 = vmatpush1.bf16.msra.mxu0 %v2881_v48  ;;  %v2452_v48 = vcombine.high %v3515_v42, %v3518_v43  ;;  %v2952_v58 = vld [vmem:[%s4092_s1 + $0x240] ss:$8 sps:$4 sm:$0xff]   ;;  %v2966_v7 = vld [vmem:[%s4092_s1 + $0x2e4] ss:$8 sps:$4 sm:$0xff]   ;;  %v2991_v39 = vld [vmem:[%s4092_s1 + $0x350] ss:$8 sps:$4 sm:$0xff]  }
  0x41   : > { %691 = vmatpush1.bf16.msra.mxu1 %v2882_v49  ;;  %525 = vmatprep.subr.bf16.mxu0 %v2883_v50  ;;  %v3531_v49 = vmax.bf16 %v3183_v59, %v2478_v45  ;;  %v2948_v50 = vld [vmem:[%s4092_s1 + $0x254] ss:$8 sps:$4 sm:$0xff]   ;;  %v2994_v40 = vld [vmem:[%s4092_s1 + $0x410] ss:$8 sps:$4 sm:$0xff]   ;;  %v3002_v45 = vld [vmem:[%s4092_s1 + $0x404] ss:$8 sps:$4 sm:$0xff]  }
  0x42   : > { %700 = vmatprep.subr.bf16.mxu1 %v2885_v51  ;;  %v3537_v51 = vmax.bf16 %v3183_v59, %v2479_v46  ;;  %v2997_v46 = vld [vmem:[%s4092_s1 + $0x340] ss:$8 sps:$4 sm:$0xff]   ;;  %v3099_v61 = vld [vmem:[%s4092_s1 + $0x530] ss:$8 sps:$4 sm:$0xff]  }
  0x43   : > { %v3102_v0 = vld [vmem:[%s4092_s1 + $0x5f0] ss:$8 sps:$4 sm:$0xff]  }
  0x44   : > { %526 = vmatpush2.bf16.msra.mxu0 %v2887_v52  ;;  %v2943_v52 = vld [vmem:[%s4092_s1 + $0x190] ss:$8 sps:$4 sm:$0xff]  }
  0x45   : > { %701 = vmatpush2.bf16.msra.mxu1 %v2888_v53  ;;  %527 = vmatprep.subr.bf16.mxu0 %v2889_v54  ;;  %v2946_v53 = vld [vmem:[%s4092_s1 + $0x250] ss:$8 sps:$4 sm:$0xff]   ;;  %v2505_v54 = vcombine.high %v3531_v49, %v3537_v51 }
  0x46   : > { %702 = vmatprep.subr.bf16.mxu1 %v2891_v55  ;;  %v2951_v55 = vld [vmem:[%s4092_s1 + $0x184] ss:$8 sps:$4 sm:$0xff]  }
  0x48   : > { %528 = vmatpush2.bf16.msra.mxu0 %v2893_v1  ;;  %v2960_v1 = vld [vmem:[%s4092_s1 + $0x2f4] ss:$8 sps:$4 sm:$0xff]  }
  0x49   : > { %703 = vmatpush2.bf16.msra.mxu1 %v2894_v2  ;;  %529 = vmatprep.subr.bf16.mxu0 %v2895_v5  ;;  %v2955_v2 = vld [vmem:[%s4092_s1 + $0x230] ss:$8 sps:$4 sm:$0xff]   ;;  %v2963_v5 = vld [vmem:[%s4092_s1 + $0x224] ss:$8 sps:$4 sm:$0xff]  }
  0x4a   : > { %704 = vmatprep.subr.bf16.mxu1 %v2897_v8  ;;  %v2961_v8 = vld [vmem:[%s4092_s1 + $0x220] ss:$8 sps:$4 sm:$0xff]  }
  0x4c   : > { %530 = vmatpush2.bf16.msra.mxu0 %v2899_v9  ;;  %v2964_v9 = vld [vmem:[%s4092_s1 + $0x2e0] ss:$8 sps:$4 sm:$0xff]  }
  0x4d   : > { %705 = vmatpush2.bf16.msra.mxu1 %v2900_v10  ;;  %531 = vmatprep.subr.bf16.mxu0 %v2901_v11  ;;  %v2969_v10 = vld [vmem:[%s4092_s1 + $0x214] ss:$8 sps:$4 sm:$0xff]  }
  0x4e   : > { %706 = vmatprep.subr.bf16.mxu1 %v2903_v12  ;;  %v2972_v11 = vld [vmem:[%s4092_s1 + $0x2d4] ss:$8 sps:$4 sm:$0xff]   ;;  %v2967_v12 = vld [vmem:[%s4092_s1 + $0x210] ss:$8 sps:$4 sm:$0xff]  }
  0x50   : > { %532 = vmatpush2.bf16.msra.mxu0 %v2905_v13  ;;  %v2970_v13 = vld [vmem:[%s4092_s1 + $0x2d0] ss:$8 sps:$4 sm:$0xff]  }
  0x51   : > { %707 = vmatpush2.bf16.msra.mxu1 %v2906_v14  ;;  %883 = vmatprep.subr.bf16.mxu0 %v2909_v15  ;;  %v2975_v14 = vld [vmem:[%s4092_s1 + $0x204] ss:$8 sps:$4 sm:$0xff]  }
  0x52   : > { %1094 = vmatprep.subr.bf16.mxu1 %v2912_v16  ;;  %v2978_v15 = vld [vmem:[%s4092_s1 + $0x2c4] ss:$8 sps:$4 sm:$0xff]   ;;  %v2973_v16 = vld [vmem:[%s4092_s1 + $0x200] ss:$8 sps:$4 sm:$0xff]  }
  0x53   : > { %534 = vmatmul.mubr.bf16.vlgmr.msra.gmra.mxu0 %v2371_v17  ;;  %v2976_v17 = vld [vmem:[%s4092_s1 + $0x2c0] ss:$8 sps:$4 sm:$0xff]  }
  0x54   : > { %709 = vmatmul.mubr.bf16.vlgmr.msra.gmra.mxu1 %v2398_v18  ;;  %884 = vmatpush1.bf16.msra.mxu0 %v2907_v19  ;;  %v2981_v18 = vld [vmem:[%s4092_s1 + $0x374] ss:$8 sps:$4 sm:$0xff]  }
  0x55   : > { %1095 = vmatpush1.bf16.msra.mxu1 %v2910_v20  ;;  %885 = vmatprep.subr.bf16.mxu0 %v2915_v21  ;;  %v2984_v19 = vld [vmem:[%s4092_s1 + $0x434] ss:$8 sps:$4 sm:$0xff]   ;;  %v2451_v20 = vcombine.low %v3515_v42, %v3518_v43  ;;  %v2979_v21 = vld [vmem:[%s4092_s1 + $0x370] ss:$8 sps:$4 sm:$0xff]  }
  0x56   : > { %1096 = vmatprep.subr.bf16.mxu1 %v2918_v22  ;;  %2477 = vmatprep.mubr.msk.bf16.mxu0 %vm497_vm0, %v2452_v48  ;;  %v2504_v22 = vcombine.low %v3531_v49, %v3537_v51  ;;  %v3005_v48 = vld [vmem:[%s4092_s1 + $0x334] ss:$8 sps:$4 sm:$0xff]  }
  0x57   : > { %2530 = vmatprep.mubr.msk.bf16.mxu1 %vm497_vm0, %v2505_v54  ;;  %v3011_v54 = vld [vmem:[%s4092_s1 + $0x324] ss:$8 sps:$4 sm:$0xff]  }
  0x58   : > { %886 = vmatpush1.bf16.msra.mxu0 %v2913_v23  ;;  %v2982_v23 = vld [vmem:[%s4092_s1 + $0x430] ss:$8 sps:$4 sm:$0xff]  }
  0x59   : > { %1097 = vmatpush1.bf16.msra.mxu1 %v2916_v24  ;;  %887 = vmatprep.subr.bf16.mxu0 %v2921_v25  ;;  %v2987_v24 = vld [vmem:[%s4092_s1 + $0x364] ss:$8 sps:$4 sm:$0xff]  }
  0x5a   : > { %1098 = vmatprep.subr.bf16.mxu1 %v2924_v26  ;;  %v2990_v25 = vld [vmem:[%s4092_s1 + $0x424] ss:$8 sps:$4 sm:$0xff]   ;;  %v2985_v26 = vld [vmem:[%s4092_s1 + $0x360] ss:$8 sps:$4 sm:$0xff]  }
  0x5c   : > { %888 = vmatpush1.bf16.msra.mxu0 %v2919_v27  ;;  %v2988_v27 = vld [vmem:[%s4092_s1 + $0x420] ss:$8 sps:$4 sm:$0xff]  }
  0x5d   : > { %1099 = vmatpush1.bf16.msra.mxu1 %v2922_v28  ;;  %889 = vmatprep.subr.bf16.mxu0 %v2927_v29  ;;  %v2531_v28 = vld [vmem:[%s3381_s27 + $0x40] sm:$0xff]  ;;  %v2532_v29 = vld [vmem:[%s3381_s27 + $0x48] sm:$0xff] }
  0x5e   : > { %1100 = vmatprep.subr.bf16.mxu1 %v2930_v30  ;;  %v3640_v30 = vmax.bf16 %v3183_v59, %v2531_v28  ;;  %v2691_v28 = vld [vmem:[%s3381_s27 + $0x78] sm:$0xff] }
  0x60   : > { %890 = vmatpush1.bf16.msra.mxu0 %v2925_v31  ;;  %v2993_v31 = vld [vmem:[%s4092_s1 + $0x354] ss:$8 sps:$4 sm:$0xff]  }
  0x61   : > { %1101 = vmatpush1.bf16.msra.mxu1 %v2928_v32  ;;  %891 = vmatprep.subr.bf16.mxu0 %v2933_v33  ;;  %v2996_v32 = vld [vmem:[%s4092_s1 + $0x414] ss:$8 sps:$4 sm:$0xff]   ;;  %v3649_v33 = vmax.bf16 %v3183_v59, %v2532_v29 }
  0x62   : > { %1102 = vmatprep.subr.bf16.mxu1 %v2936_v34  ;;  %v2584_v34 = vld [vmem:[%s3381_s27 + $0x50] sm:$0xff] }
  0x63   : > { %v3053_v29 = vld [vmem:[%s4092_s1 + $0x4f4] ss:$8 sps:$4 sm:$0xff]  }
  0x64   : > { %892 = vmatpush1.bf16.msra.mxu0 %v2931_v35  ;;  %v2585_v35 = vld [vmem:[%s3381_s27 + $0x58] sm:$0xff] }
  0x65   : > { %1103 = vmatpush1.bf16.msra.mxu1 %v2934_v36  ;;  %893 = vmatprep.subr.bf16.mxu0 %v2939_v37  ;;  %v3654_v36 = vmax.bf16 %v3183_v59, %v2584_v34  ;;  %v2558_v37 = vcombine.high %v3640_v30, %v3649_v33 }
  0x66   : > { %1104 = vmatprep.subr.bf16.mxu1 %v2942_v38  ;;  %v3659_v38 = vmax.bf16 %v3183_v59, %v2585_v35 }
  0x68   : > { %894 = vmatpush1.bf16.msra.mxu0 %v2937_v41  ;;  %v2999_v41 = vld [vmem:[%s4092_s1 + $0x344] ss:$8 sps:$4 sm:$0xff]  }
  0x69   : > { %1105 = vmatpush1.bf16.msra.mxu1 %v2940_v44  ;;  %895 = vmatprep.subr.bf16.mxu0 %v2945_v47  ;;  %v2611_v44 = vcombine.high %v3654_v36, %v3659_v38  ;;  %v3000_v47 = vld [vmem:[%s4092_s1 + $0x400] ss:$8 sps:$4 sm:$0xff]  }
  0x6a   : > { %1106 = vmatprep.subr.bf16.mxu1 %v2948_v50  ;;  %v3008_v50 = vld [vmem:[%s4092_s1 + $0x3f4] ss:$8 sps:$4 sm:$0xff]  }
  0x6c   : > { %896 = vmatpush1.bf16.msra.mxu0 %v2943_v52  ;;  %v3003_v52 = vld [vmem:[%s4092_s1 + $0x330] ss:$8 sps:$4 sm:$0xff]  }
  0x6d   : > { %1107 = vmatpush1.bf16.msra.mxu1 %v2946_v53  ;;  %897 = vmatprep.subr.bf16.mxu0 %v2951_v55  ;;  %v3006_v53 = vld [vmem:[%s4092_s1 + $0x3f0] ss:$8 sps:$4 sm:$0xff]   ;;  %v3014_v55 = vld [vmem:[%s4092_s1 + $0x3e4] ss:$8 sps:$4 sm:$0xff]  }
  0x6e   : > { %1108 = vmatprep.subr.bf16.mxu1 %v2954_v56  ;;  %v3009_v56 = vld [vmem:[%s4092_s1 + $0x320] ss:$8 sps:$4 sm:$0xff]  }
  0x70   : > { %898 = vmatpush1.bf16.msra.mxu0 %v2949_v57  ;;  %v3012_v57 = vld [vmem:[%s4092_s1 + $0x3e0] ss:$8 sps:$4 sm:$0xff]  }
  0x71   : > { %1109 = vmatpush1.bf16.msra.mxu1 %v2952_v58  ;;  %907 = vmatprep.subr.bf16.mxu0 %v2957_v62  ;;  %v3017_v58 = vld [vmem:[%s4092_s1 + $0x314] ss:$8 sps:$4 sm:$0xff]  }
  0x72   : > { %1118 = vmatprep.subr.bf16.mxu1 %v2960_v1  ;;  %v3020_v62 = vld [vmem:[%s4092_s1 + $0x3d4] ss:$8 sps:$4 sm:$0xff]   ;;  %v3015_v1 = vld [vmem:[%s4092_s1 + $0x310] ss:$8 sps:$4 sm:$0xff]  }
  0x74   : > { %908 = vmatpush2.bf16.msra.mxu0 %v2955_v2  ;;  %v3018_v2 = vld [vmem:[%s4092_s1 + $0x3d0] ss:$8 sps:$4 sm:$0xff]  }
  0x75   : > { %1119 = vmatpush2.bf16.msra.mxu1 %v2958_v3  ;;  %909 = vmatprep.subr.bf16.mxu0 %v2963_v5  ;;  %v3023_v3 = vld [vmem:[%s4092_s1 + $0x304] ss:$8 sps:$4 sm:$0xff]  }
  0x76   : > { %1120 = vmatprep.subr.bf16.mxu1 %v2966_v7  ;;  %v3026_v5 = vld [vmem:[%s4092_s1 + $0x3c4] ss:$8 sps:$4 sm:$0xff]   ;;  %v3021_v7 = vld [vmem:[%s4092_s1 + $0x300] ss:$8 sps:$4 sm:$0xff]  }
  0x78   : > { %910 = vmatpush2.bf16.msra.mxu0 %v2961_v8  ;;  %v3024_v8 = vld [vmem:[%s4092_s1 + $0x3c0] ss:$8 sps:$4 sm:$0xff]  }
  0x79   : > { %1121 = vmatpush2.bf16.msra.mxu1 %v2964_v9  ;;  %911 = vmatprep.subr.bf16.mxu0 %v2969_v10  ;;  %v3029_v9 = vld [vmem:[%s4092_s1 + $0x3b4] ss:$8 sps:$4 sm:$0xff]  }
  0x7a   : > { %1122 = vmatprep.subr.bf16.mxu1 %v2972_v11  ;;  %v3032_v10 = vld [vmem:[%s4092_s1 + $0x474] ss:$8 sps:$4 sm:$0xff]   ;;  %v3027_v11 = vld [vmem:[%s4092_s1 + $0x3b0] ss:$8 sps:$4 sm:$0xff]  }
  0x7c   : > { %912 = vmatpush2.bf16.msra.mxu0 %v2967_v12  ;;  %v3030_v12 = vld [vmem:[%s4092_s1 + $0x470] ss:$8 sps:$4 sm:$0xff]  }
  0x7d   : > { %1123 = vmatpush2.bf16.msra.mxu1 %v2970_v13  ;;  %913 = vmatprep.subr.bf16.mxu0 %v2975_v14  ;;  %v3035_v13 = vld [vmem:[%s4092_s1 + $0x3a4] ss:$8 sps:$4 sm:$0xff]  }
  0x7e   : > { %1124 = vmatprep.subr.bf16.mxu1 %v2978_v15  ;;  %v3038_v14 = vld [vmem:[%s4092_s1 + $0x464] ss:$8 sps:$4 sm:$0xff]   ;;  %v3033_v15 = vld [vmem:[%s4092_s1 + $0x3a0] ss:$8 sps:$4 sm:$0xff]  }
  0x80   : > { %914 = vmatpush2.bf16.msra.mxu0 %v2973_v16  ;;  %v3036_v16 = vld [vmem:[%s4092_s1 + $0x460] ss:$8 sps:$4 sm:$0xff]  }
  0x81   : > { %1125 = vmatpush2.bf16.msra.mxu1 %v2976_v17  ;;  %1305 = vmatprep.subr.bf16.mxu0 %v2981_v18  ;;  %v3041_v17 = vld [vmem:[%s4092_s1 + $0x394] ss:$8 sps:$4 sm:$0xff]  }
  0x82   : > { %1516 = vmatprep.subr.bf16.mxu1 %v2984_v19  ;;  %v3044_v18 = vld [vmem:[%s4092_s1 + $0x454] ss:$8 sps:$4 sm:$0xff]   ;;  %v3039_v19 = vld [vmem:[%s4092_s1 + $0x390] ss:$8 sps:$4 sm:$0xff]  }
  0x83   : > { %916 = vmatmul.mubr.bf16.vlgmr.msra.gmra.mxu0 %v2451_v20  ;;  %v3042_v20 = vld [vmem:[%s4092_s1 + $0x450] ss:$8 sps:$4 sm:$0xff]  }
  0x84   : > { %1127 = vmatmul.mubr.bf16.vlgmr.msra.gmra.mxu1 %v2504_v22  ;;  %1306 = vmatpush1.bf16.msra.mxu0 %v2979_v21  ;;  %v3047_v21 = vld [vmem:[%s4092_s1 + $0x384] ss:$8 sps:$4 sm:$0xff]  }
  0x85   : > { %1517 = vmatpush1.bf16.msra.mxu1 %v2982_v23  ;;  %1307 = vmatprep.subr.bf16.mxu0 %v2987_v24  ;;  %v3050_v22 = vld [vmem:[%s4092_s1 + $0x444] ss:$8 sps:$4 sm:$0xff]   ;;  %v3045_v23 = vld [vmem:[%s4092_s1 + $0x380] ss:$8 sps:$4 sm:$0xff]  }
  0x86   : > { %1518 = vmatprep.subr.bf16.mxu1 %v2990_v25  ;;  %2583 = vmatprep.mubr.msk.bf16.mxu0 %vm497_vm0, %v2558_v37  ;;  %v3048_v24 = vld [vmem:[%s4092_s1 + $0x440] ss:$8 sps:$4 sm:$0xff]   ;;  %v3799_v37 = vmax.bf16 %v3183_v59, %v2691_v28 }
  0x87   : > { %2636 = vmatprep.mubr.msk.bf16.mxu1 %vm497_vm0, %v2611_v44  ;;  %v2637_v25 = vld [vmem:[%s3381_s27 + $0x60] sm:$0xff] }
  0x88   : > { %1308 = vmatpush1.bf16.msra.mxu0 %v2985_v26  ;;  %v2638_v26 = vld [vmem:[%s3381_s27 + $0x68] sm:$0xff] }
  0x89   : > { %1519 = vmatpush1.bf16.msra.mxu1 %v2988_v27  ;;  %1309 = vmatprep.subr.bf16.mxu0 %v2993_v31  ;;  %v2690_v27 = vld [vmem:[%s3381_s27 + $0x70] sm:$0xff]  ;;  %v3793_v34 = vmax.bf16 %v3183_v59, %v2638_v26 }
  0x8a   : > { %1520 = vmatprep.subr.bf16.mxu1 %v2996_v32  ;;  %v3056_v31 = vld [vmem:[%s4092_s1 + $0x5b4] ss:$8 sps:$4 sm:$0xff]   ;;  %v3790_v32 = vmax.bf16 %v3183_v59, %v2637_v25  ;;  %v3796_v35 = vmax.bf16 %v3183_v59, %v2690_v27  ;;  %v3054_v44 = vld [vmem:[%s4092_s1 + $0x5b0] ss:$8 sps:$4 sm:$0xff]  }
  0x8b   : > { %v2744_v25 = vld [vmem:[%s3381_s27 + $0x88] sm:$0xff] }
  0x8c   : > { %1310 = vmatpush1.bf16.msra.mxu0 %v2991_v39  ;;  %v2557_v39 = vcombine.low %v3640_v30, %v3649_v33 }
  0x8d   : > { %1521 = vmatpush1.bf16.msra.mxu1 %v2994_v40  ;;  %1311 = vmatprep.subr.bf16.mxu0 %v2999_v41  ;;  %v3051_v40 = vld [vmem:[%s4092_s1 + $0x4f0] ss:$8 sps:$4 sm:$0xff]   ;;  %v2610_v41 = vcombine.low %v3654_v36, %v3659_v38 }
  0x8e   : > { %1522 = vmatprep.subr.bf16.mxu1 %v3002_v45  ;;  %v3059_v45 = vld [vmem:[%s4092_s1 + $0x4e4] ss:$8 sps:$4 sm:$0xff]  }
  0x90   : > { %1312 = vmatpush1.bf16.msra.mxu0 %v2997_v46  ;;  %v3062_v46 = vld [vmem:[%s4092_s1 + $0x5a4] ss:$8 sps:$4 sm:$0xff]  }
  0x91   : > { %1523 = vmatpush1.bf16.msra.mxu1 %v3000_v47  ;;  %1313 = vmatprep.subr.bf16.mxu0 %v3005_v48  ;;  %v2664_v47 = vcombine.high %v3790_v32, %v3793_v34  ;;  %v2717_v48 = vcombine.high %v3796_v35, %v3799_v37 }
  0x92   : > { %1524 = vmatprep.subr.bf16.mxu1 %v3008_v50  ;;  %v3057_v50 = vld [vmem:[%s4092_s1 + $0x4e0] ss:$8 sps:$4 sm:$0xff]  }
  0x94   : > { %1314 = vmatpush1.bf16.msra.mxu0 %v3003_v52  ;;  %v3060_v52 = vld [vmem:[%s4092_s1 + $0x5a0] ss:$8 sps:$4 sm:$0xff]  }
  0x95   : > { %1525 = vmatpush1.bf16.msra.mxu1 %v3006_v53  ;;  %1315 = vmatprep.subr.bf16.mxu0 %v3011_v54  ;;  %v3065_v53 = vld [vmem:[%s4092_s1 + $0x4d4] ss:$8 sps:$4 sm:$0xff]  }
  0x96   : > { %1526 = vmatprep.subr.bf16.mxu1 %v3014_v55  ;;  %v3068_v54 = vld [vmem:[%s4092_s1 + $0x594] ss:$8 sps:$4 sm:$0xff]   ;;  %v3063_v55 = vld [vmem:[%s4092_s1 + $0x4d0] ss:$8 sps:$4 sm:$0xff]  }
  0x98   : > { %1316 = vmatpush1.bf16.msra.mxu0 %v3009_v56  ;;  %v3066_v56 = vld [vmem:[%s4092_s1 + $0x590] ss:$8 sps:$4 sm:$0xff]  }
  0x99   : > { %1527 = vmatpush1.bf16.msra.mxu1 %v3012_v57  ;;  %1317 = vmatprep.subr.bf16.mxu0 %v3017_v58  ;;  %v3071_v57 = vld [vmem:[%s4092_s1 + $0x4c4] ss:$8 sps:$4 sm:$0xff]  }
  0x9a   : > { %1528 = vmatprep.subr.bf16.mxu1 %v3020_v62  ;;  %v3074_v58 = vld [vmem:[%s4092_s1 + $0x584] ss:$8 sps:$4 sm:$0xff]   ;;  %v3069_v62 = vld [vmem:[%s4092_s1 + $0x4c0] ss:$8 sps:$4 sm:$0xff]  }
  0x9c   : > { %1318 = vmatpush1.bf16.msra.mxu0 %v3015_v1  ;;  %v3072_v1 = vld [vmem:[%s4092_s1 + $0x580] ss:$8 sps:$4 sm:$0xff]  }
  0x9d   : > { %1529 = vmatpush1.bf16.msra.mxu1 %v3018_v2  ;;  %1319 = vmatprep.subr.bf16.mxu0 %v3023_v3  ;;  %v3077_v2 = vld [vmem:[%s4092_s1 + $0x4b4] ss:$8 sps:$4 sm:$0xff]  }
  0x9e   : > { %1530 = vmatprep.subr.bf16.mxu1 %v3026_v5  ;;  %v3080_v3 = vld [vmem:[%s4092_s1 + $0x574] ss:$8 sps:$4 sm:$0xff]   ;;  %v3075_v5 = vld [vmem:[%s4092_s1 + $0x4b0] ss:$8 sps:$4 sm:$0xff]  }
  0xa0   : > { %1320 = vmatpush1.bf16.msra.mxu0 %v3021_v7  ;;  %v3078_v7 = vld [vmem:[%s4092_s1 + $0x570] ss:$8 sps:$4 sm:$0xff]  }
  0xa1   : > { %1531 = vmatpush1.bf16.msra.mxu1 %v3024_v8  ;;  %1329 = vmatprep.subr.bf16.mxu0 %v3029_v9  ;;  %v3083_v8 = vld [vmem:[%s4092_s1 + $0x4a4] ss:$8 sps:$4 sm:$0xff]  }
  0xa2   : > { %1540 = vmatprep.subr.bf16.mxu1 %v3032_v10  ;;  %v3086_v9 = vld [vmem:[%s4092_s1 + $0x564] ss:$8 sps:$4 sm:$0xff]   ;;  %v3081_v10 = vld [vmem:[%s4092_s1 + $0x4a0] ss:$8 sps:$4 sm:$0xff]  }
  0xa4   : > { %1330 = vmatpush2.bf16.msra.mxu0 %v3027_v11  ;;  %v3084_v11 = vld [vmem:[%s4092_s1 + $0x560] ss:$8 sps:$4 sm:$0xff]  }
  0xa5   : > { %1541 = vmatpush2.bf16.msra.mxu1 %v3030_v12  ;;  %1331 = vmatprep.subr.bf16.mxu0 %v3035_v13  ;;  %v3089_v12 = vld [vmem:[%s4092_s1 + $0x494] ss:$8 sps:$4 sm:$0xff]  }
  0xa6   : > { %1542 = vmatprep.subr.bf16.mxu1 %v3038_v14  ;;  %v3092_v13 = vld [vmem:[%s4092_s1 + $0x554] ss:$8 sps:$4 sm:$0xff]   ;;  %v3087_v14 = vld [vmem:[%s4092_s1 + $0x490] ss:$8 sps:$4 sm:$0xff]  }
  0xa8   : > { %1332 = vmatpush2.bf16.msra.mxu0 %v3033_v15  ;;  %v3090_v15 = vld [vmem:[%s4092_s1 + $0x550] ss:$8 sps:$4 sm:$0xff]  }
  0xa9   : > { %1543 = vmatpush2.bf16.msra.mxu1 %v3036_v16  ;;  %1333 = vmatprep.subr.bf16.mxu0 %v3041_v17  ;;  %v3095_v16 = vld [vmem:[%s4092_s1 + $0x484] ss:$8 sps:$4 sm:$0xff]  }
  0xaa   : > { %1544 = vmatprep.subr.bf16.mxu1 %v3044_v18  ;;  %v3098_v17 = vld [vmem:[%s4092_s1 + $0x544] ss:$8 sps:$4 sm:$0xff]   ;;  %v3093_v18 = vld [vmem:[%s4092_s1 + $0x480] ss:$8 sps:$4 sm:$0xff]  }
  0xac   : > { %1334 = vmatpush2.bf16.msra.mxu0 %v3039_v19  ;;  %v3096_v19 = vld [vmem:[%s4092_s1 + $0x540] ss:$8 sps:$4 sm:$0xff]  }
  0xad   : > { %1545 = vmatpush2.bf16.msra.mxu1 %v3042_v20  ;;  %1335 = vmatprep.subr.bf16.mxu0 %v3047_v21  ;;  %v724_v20 = vmax.bf16 %v3515_v42, %v341_v4  ;;  %v725_v21 = vmax.bf16 %v3518_v43, %v342_v6  ;;  %v3107_v42 = vld [vmem:[%s4092_s1 + $0x524] ss:$8 sps:$4 sm:$0xff]  }
  0xae   : > { %1546 = vmatprep.subr.bf16.mxu1 %v3050_v22  ;;  %v3101_v22 = vld [vmem:[%s4092_s1 + $0x534] ss:$8 sps:$4 sm:$0xff]   ;;  %v3110_v43 = vld [vmem:[%s4092_s1 + $0x5e4] ss:$8 sps:$4 sm:$0xff]  }
  0xaf   : > { %v935_v60 = vmax.bf16 %v3531_v49, %v724_v20  ;;  %v936_v63 = vmax.bf16 %v3537_v51, %v725_v21 }
  0xb0   : > { %1336 = vmatpush2.bf16.msra.mxu0 %v3045_v23  ;;  %v3104_v23 = vld [vmem:[%s4092_s1 + $0x5f4] ss:$8 sps:$4 sm:$0xff]  }
  0xb1   : > { %1547 = vmatpush2.bf16.msra.mxu1 %v3048_v24  ;;  %1727 = vmatprep.subr.bf16.mxu0 %v3053_v29  ;;  %v1146_v4 = vmax.bf16 %v3640_v30, %v935_v60  ;;  %v1147_v6 = vmax.bf16 %v3649_v33, %v936_v63  ;;  %v2743_v24 = vld [vmem:[%s3381_s27 + $0x80] sm:$0xff]  ;;  %v3953_v29 = vmax.bf16 %v3183_v59, %v2744_v25  ;;  %s2343_s27 = sshll.u32 %s2335_s18, 1 }
  0xb2   : > { %1938 = vmatprep.subr.bf16.mxu1 %v3056_v31  ;;  %v3105_v30 = vld [vmem:[%s4092_s1 + $0x520] ss:$8 sps:$4 sm:$0xff]   ;;  %v3950_v28 = vmax.bf16 %v3183_v59, %v2743_v24  ;;  %v3119_v59 = vld [vmem:[%s4092_s1 + $0x504] ss:$8 sps:$4 sm:$0xff]   ;;  %p301_p8 = scmp.lt.s32.totalorder %s2343_s27, 3 }
  0xb3   : > { %1338 = vmatmul.mubr.bf16.vlgmr.msra.gmra.mxu0 %v2557_v39  ;;  %v1357_v49 = vmax.bf16 %v3654_v36, %v1146_v4  ;;  %v1358_v51 = vmax.bf16 %v3659_v38, %v1147_v6  ;;  %v3108_v33 = vld [vmem:[%s4092_s1 + $0x5e0] ss:$8 sps:$4 sm:$0xff]   ;;  %v3113_v36 = vld [vmem:[%s4092_s1 + $0x514] ss:$8 sps:$4 sm:$0xff]  }
  0xb4   : > { %1549 = vmatmul.mubr.bf16.vlgmr.msra.gmra.mxu1 %v2610_v41  ;;  %1728 = vmatpush1.bf16.msra.mxu0 %v3051_v40  ;;  %v3116_v38 = vld [vmem:[%s4092_s1 + $0x5d4] ss:$8 sps:$4 sm:$0xff]   ;;  %v3111_v40 = vld [vmem:[%s4092_s1 + $0x510] ss:$8 sps:$4 sm:$0xff]   ;;  %s4100_s27 = smov (!%p301_p8, %s2343_s27), 3 }
  0xb5   : > { %1939 = vmatpush1.bf16.msra.mxu1 %v3054_v44  ;;  %1729 = vmatprep.subr.bf16.mxu0 %v3059_v45  ;;  %v1568_v26 = vmax.bf16 %v3790_v32, %v1357_v49  ;;  %v1569_v27 = vmax.bf16 %v3793_v34, %v1358_v51  ;;  %v3114_v41 = vld [vmem:[%s4092_s1 + $0x5d0] ss:$8 sps:$4 sm:$0xff]   ;;  %s2808_s20 = smul.u32 12, %s4100_s27 }
  0xb6   : > { %1940 = vmatprep.subr.bf16.mxu1 %v3062_v46  ;;  %2689 = vmatprep.mubr.msk.bf16.mxu0 %vm497_vm0, %v2664_v47  ;;  %v3122_v46 = vld [vmem:[%s4092_s1 + $0x5c4] ss:$8 sps:$4 sm:$0xff]  }
  0xb7   : > { %2742 = vmatprep.mubr.msk.bf16.mxu1 %vm497_vm0, %v2717_v48  ;;  %v1779_v31 = vmax.bf16 %v3796_v35, %v1568_v26  ;;  %v1780_v39 = vmax.bf16 %v3799_v37, %v1569_v27  ;;  %s4067_s24 = scalar_lea.vmem %s4095_s4, %s2808_s20 }
  0xb8   : > { %1730 = vmatpush1.bf16.msra.mxu0 %v3057_v50  ;;  %v3117_v50 = vld [vmem:[%s4092_s1 + $0x500] ss:$8 sps:$4 sm:$0xff]  }
  0xb9   : > { %1941 = vmatpush1.bf16.msra.mxu1 %v3060_v52  ;;  %1731 = vmatprep.subr.bf16.mxu0 %v3065_v53  ;;  %v1990_v44 = vmax.bf16 %v3950_v28, %v1779_v31  ;;  %v1991_v45 = vmax.bf16 %v3953_v29, %v1780_v39  ;;  %v3120_v52 = vld [vmem:[%s4092_s1 + $0x5c0] ss:$8 sps:$4 sm:$0xff]   ;;  %v3125_v53 = vld [vmem:[%s4092_s1 + $0x674] ss:$8 sps:$4 sm:$0xff]  }
  0xba   : > { %1942 = vmatprep.subr.bf16.mxu1 %v3068_v54  ;;  %v2663_v54 = vcombine.low %v3790_v32, %v3793_v34  ;;  %v3126_v32 = vld [vmem:[%s4092_s1 + $0x660] ss:$8 sps:$4 sm:$0xff]   ;;  %v3131_v34 = vld [vmem:[%s4092_s1 + $0x654] ss:$8 sps:$4 sm:$0xff]  }
  0xbb   : > { %v2796_v47 = vcombine.low %v1990_v44, %v1991_v45  ;;  %v2797_v48 = vcombine.high %v1990_v44, %v1991_v45 }
  0xbc   : > { %1732 = vmatpush1.bf16.msra.mxu0 %v3063_v55  ;;  %v2716_v55 = vcombine.low %v3796_v35, %v3799_v37  ;;  %v3129_v35 = vld [vmem:[%s4092_s1 + $0x650] ss:$8 sps:$4 sm:$0xff]   ;;  %v3134_v37 = vld [vmem:[%s4092_s1 + $0x644] ss:$8 sps:$4 sm:$0xff]  }
  0xbd   : > { %1943 = vmatpush1.bf16.msra.mxu1 %v3066_v56  ;;  %1733 = vmatprep.subr.bf16.mxu0 %v3071_v57  ;;  %v3123_v56 = vld [vmem:[%s4092_s1 + $0x670] ss:$8 sps:$4 sm:$0xff]   ;;  %v2770_v57 = vcombine.high %v3950_v28, %v3953_v29 }
  0xbe   : > { %1944 = vmatprep.subr.bf16.mxu1 %v3074_v58  ;;  %2242 = vrot.lane.b32.xlu0 %v2796_v47, %s3184_s10  ;;  %v3128_v58 = vld [vmem:[%s4092_s1 + $0x664] ss:$8 sps:$4 sm:$0xff]  }
  0xc0   : > { %1734 = vmatpush1.bf16.msra.mxu0 %v3069_v62  ;;  %v3132_v62 = vld [vmem:[%s4092_s1 + $0x640] ss:$8 sps:$4 sm:$0xff]  }
  0xc1   : > { %1945 = vmatpush1.bf16.msra.mxu1 %v3072_v1  ;;  %1735 = vmatprep.subr.bf16.mxu0 %v3077_v2  ;;  %v3137_v1 = vld [vmem:[%s4092_s1 + $0x634] ss:$8 sps:$4 sm:$0xff]   ;;  %v3135_v2 = vld [vmem:[%s4092_s1 + $0x630] ss:$8 sps:$4 sm:$0xff]  }
  0xc2   : > { %1946 = vmatprep.subr.bf16.mxu1 %v3080_v3  ;;  %2244 = vrot.lane.b32.xlu0 %v2797_v48, %s3184_s10  ;;  %v3140_v3 = vld [vmem:[%s4092_s1 + $0x624] ss:$8 sps:$4 sm:$0xff]  }
  0xc4   : > { %1736 = vmatpush1.bf16.msra.mxu0 %v3075_v5  ;;  %v3138_v5 = vld [vmem:[%s4092_s1 + $0x620] ss:$8 sps:$4 sm:$0xff]  }
  0xc5   : > { %1947 = vmatpush1.bf16.msra.mxu1 %v3078_v7  ;;  %1737 = vmatprep.subr.bf16.mxu0 %v3083_v8  ;;  %v3143_v7 = vld [vmem:[%s4092_s1 + $0x614] ss:$8 sps:$4 sm:$0xff]   ;;  %v3141_v8 = vld [vmem:[%s4092_s1 + $0x610] ss:$8 sps:$4 sm:$0xff]  }
  0xc6   : > { %1948 = vmatprep.subr.bf16.mxu1 %v3086_v9  ;;  %v3146_v9 = vld [vmem:[%s4092_s1 + $0x604] ss:$8 sps:$4 sm:$0xff]  }
  0xc8   : > { %1738 = vmatpush1.bf16.msra.mxu0 %v3081_v10  ;;  %v3144_v10 = vld [vmem:[%s4092_s1 + $0x600] ss:$8 sps:$4 sm:$0xff]  }
  0xc9   : > { %1949 = vmatpush1.bf16.msra.mxu1 %v3084_v11  ;;  %1739 = vmatprep.subr.bf16.mxu0 %v3089_v12  ;;  %v3149_v11 = vld [vmem:[%s4092_s1 + $0x6b4] ss:$8 sps:$4 sm:$0xff]   ;;  %v3147_v12 = vld [vmem:[%s4092_s1 + $0x6b0] ss:$8 sps:$4 sm:$0xff]  }
  0xca   : > { %1950 = vmatprep.subr.bf16.mxu1 %v3092_v13  ;;  %v3152_v13 = vld [vmem:[%s4092_s1 + $0x6a4] ss:$8 sps:$4 sm:$0xff]  }
  0xcc   : > { %1740 = vmatpush1.bf16.msra.mxu0 %v3087_v14  ;;  %v3150_v14 = vld [vmem:[%s4092_s1 + $0x6a0] ss:$8 sps:$4 sm:$0xff]  }
  0xcd   : > { %1951 = vmatpush1.bf16.msra.mxu1 %v3090_v15  ;;  %1741 = vmatprep.subr.bf16.mxu0 %v3095_v16  ;;  %v3155_v15 = vld [vmem:[%s4092_s1 + $0x694] ss:$8 sps:$4 sm:$0xff]   ;;  %v3153_v16 = vld [vmem:[%s4092_s1 + $0x690] ss:$8 sps:$4 sm:$0xff]  }
  0xce   : > { %1952 = vmatprep.subr.bf16.mxu1 %v3098_v17  ;;  %v3158_v17 = vld [vmem:[%s4092_s1 + $0x684] ss:$8 sps:$4 sm:$0xff]  }
  0xd0   : > { %1742 = vmatpush1.bf16.msra.mxu0 %v3093_v18  ;;  %v3156_v18 = vld [vmem:[%s4092_s1 + $0x680] ss:$8 sps:$4 sm:$0xff]  }
  0xd1   : > { %1953 = vmatpush1.bf16.msra.mxu1 %v3096_v19  ;;  %1751 = vmatprep.subr.bf16.mxu0 %v3101_v22  ;;  %v2769_v19 = vcombine.low %v3950_v28, %v3953_v29 }
  0xd2   : > { %1962 = vmatprep.subr.bf16.mxu1 %v3104_v23 }
  0xd4   : > { %1752 = vmatpush2.bf16.msra.mxu0 %v3099_v61 }
  0xd5   : > { %1963 = vmatpush2.bf16.msra.mxu1 %v3102_v0  ;;  %1753 = vmatprep.subr.bf16.mxu0 %v3107_v42 }
  0xd6   : > { %1964 = vmatprep.subr.bf16.mxu1 %v3110_v43 }
  0xd8   : > { %1754 = vmatpush2.bf16.msra.mxu0 %v3105_v30 }
  0xd9   : > { %1965 = vmatpush2.bf16.msra.mxu1 %v3108_v33  ;;  %1755 = vmatprep.subr.bf16.mxu0 %v3113_v36 }
  0xda   : > { %1966 = vmatprep.subr.bf16.mxu1 %v3116_v38 }
  0xdc   : > { %1756 = vmatpush2.bf16.msra.mxu0 %v3111_v40 }
  0xdd   : > { %1967 = vmatpush2.bf16.msra.mxu1 %v3114_v41  ;;  %1757 = vmatprep.subr.bf16.mxu0 %v3119_v59 }
  0xde   : > { %1968 = vmatprep.subr.bf16.mxu1 %v3122_v46 }
  0xe0   : > { %1758 = vmatpush2.bf16.msra.mxu0 %v3117_v50 }
  0xe1   : > { %1969 = vmatpush2.bf16.msra.mxu1 %v3120_v52  ;;  %2149 = vmatprep.subr.bf16.mxu0 %v3125_v53 }
  0xe3   : > { %1760 = vmatmul.mubr.bf16.vlgmr.msra.gmra.mxu0 %v2663_v54 }
  0xe4   : > { %1971 = vmatmul.mubr.bf16.vlgmr.msra.gmra.mxu1 %v2716_v55  ;;  %2150 = vmatpush1.bf16.msra.mxu0 %v3123_v56 }
  0xe5   : > { %2795 = vmatprep.mubr.msk.bf16.mxu0 %vm497_vm0, %v2770_v57  ;;  %2151 = vmatprep.subr.bf16.mxu0 %v3128_v58 }
  0xe8   : > { %2152 = vmatpush1.bf16.msra.mxu0 %v3126_v32 }
  0xe9   : > { %2153 = vmatprep.subr.bf16.mxu0 %v3131_v34  ;;  %v2198_v34 = vlaneseq }
  0xec   : > { %2154 = vmatpush1.bf16.msra.mxu0 %v3129_v35 }
  0xed   : > { %2155 = vmatprep.subr.bf16.mxu0 %v3134_v37 }
  0xf0   : > { %2156 = vmatpush1.bf16.msra.mxu0 %v3132_v62 }
  0xf1   : > { %2157 = vmatprep.subr.bf16.mxu0 %v3137_v1 }
  0xf4   : > { %2158 = vmatpush1.bf16.msra.mxu0 %v3135_v2 }
  0xf5   : > { %2159 = vmatprep.subr.bf16.mxu0 %v3140_v3 }
  0xf8   : > { %2160 = vmatpush1.bf16.msra.mxu0 %v3138_v5 }
  0xf9   : > { %2161 = vmatprep.subr.bf16.mxu0 %v3143_v7  ;;  %v2199_v7 = vshrl.u32 %v2198_v34, 7 }
  0xfc   : > { %2162 = vmatpush1.bf16.msra.mxu0 %v3141_v8 }
  0xfd   : > { %2163 = vmatprep.subr.bf16.mxu0 %v3146_v9 }
 0x100   : > { %2164 = vmatpush1.bf16.msra.mxu0 %v3144_v10 }
 0x101   : > { %2173 = vmatprep.subr.bf16.mxu0 %v3149_v11 }
 0x104   : > { %2174 = vmatpush2.bf16.msra.mxu0 %v3147_v12 }
 0x105   : > { %2175 = vmatprep.subr.bf16.mxu0 %v3152_v13  ;;  %v2204_v13 = vsub.s32 1, %v2199_v7 }
 0x108   : > { %2176 = vmatpush2.bf16.msra.mxu0 %v3150_v14 }
 0x109   : > { %2177 = vmatprep.subr.bf16.mxu0 %v3155_v15 }
 0x10c   : > { %2178 = vmatpush2.bf16.msra.mxu0 %v3153_v16  ;;  %v2200_v16 = vsub.s32 0, %v2199_v7 }
 0x10d   : > { %2179 = vmatprep.subr.bf16.mxu0 %v3158_v17 }
 0x110   : > { %2180 = vmatpush2.bf16.msra.mxu0 %v3156_v18 }
 0x113   : > { %2182 = vmatmul.mubr.bf16.vlgmr.msra.gmra.mxu0 %v2769_v19  ;;  %v535_v63 = vpop.f32.mrf.mxu0  ;;  %v2196_v19 = vld [vmem:[%s4093_s2] sm:$0x3] }
 0x114   : > { %v710_v61 = vpop.f32.mrf.mxu1 }
 0x115   : > { %v537_v0 = vpop.f32.mrf.mxu0  ;;  %v711_v40 = vadd.f32 %v710_v61, %v535_v63  ;;  %v2205_v63 = vrot.slane %v2196_v19, %v2204_v13 }
 0x116   : > { %v712_v4 = vpop.f32.mrf.mxu1 }
 0x117   : > { %v539_v6 = vpop.f32.mrf.mxu0  ;;  %v713_v41 = vadd.f32 %v712_v4, %v537_v0  ;;  %v2201_v4 = vrot.slane %v2196_v19, %v2200_v16 }
 0x118   : > { %v714_v42 = vpop.f32.mrf.mxu1 }
 0x119   : > { %v541_v43 = vpop.f32.mrf.mxu0  ;;  %v715_v46 = vadd.f32 %v714_v42, %v539_v6 }
 0x11a   : > { %v716_v51 = vpop.f32.mrf.mxu1 }
 0x11b   : > { %v717_v50 = vadd.f32 %v716_v51, %v541_v43  ;;  %v2212_v43 = vld [vmem:[%s4094_s3] sm:$0x3] }
 0x130   : > { %v4060_v20 = vpop.permute.xlu0 %2242 }
 0x134   : > { %v2245_v21 = vpop.permute.xlu0 %2244 }
 0x135   : > { %v2247_v22 = vsel %vm497_vm0, %v4060_v20, %v2245_v21 }
 0x136   : > { %v2799_v23 = vcombine.low %v2247_v22, %v2247_v22  ;;  %v2801_v60 = vcombine.high %v2247_v22, %v2247_v22 }
 0x138   : > { %2268 = vst [vmem:[%s4067_s24 + $0x8] sm:$0xf] %v2799_v23  ;;  %2270 = vst [vmem:[%s4067_s24 + $0x14] sm:$0xf] %v2801_v60 }
 0x143   : > { %v917_v49 = vpop.f32.mrf.mxu0 }
 0x144   : > { %v1128_v25 = vpop.f32.mrf.mxu1  ;;  %v926_v44 = vadd.f32 %v917_v49, %v711_v40 }
 0x145   : > { %v919_v24 = vpop.f32.mrf.mxu0 }
 0x146   : > { %v1130_v33 = vpop.f32.mrf.mxu1  ;;  %v927_v47 = vadd.f32 %v919_v24, %v713_v41  ;;  %v1137_v53 = vadd.f32 %v1128_v25, %v926_v44 }
 0x147   : > { %v921_v30 = vpop.f32.mrf.mxu0 }
 0x148   : > { %v1132_v27 = vpop.f32.mrf.mxu1  ;;  %v928_v52 = vadd.f32 %v921_v30, %v715_v46  ;;  %v1138_v55 = vadd.f32 %v1130_v33, %v927_v47  ;;  %v2221_v30 = vrot.slane %v2212_v43, %v2204_v13 }
 0x149   : > { %v923_v26 = vpop.f32.mrf.mxu0 }
 0x14a   : > { %v1134_v38 = vpop.f32.mrf.mxu1  ;;  %v929_v56 = vadd.f32 %v923_v26, %v717_v50  ;;  %v1139_v35 = vadd.f32 %v1132_v27, %v928_v52  ;;  %v2217_v27 = vrot.slane %v2212_v43, %v2200_v16 }
 0x14c   : > { %v1140_v62 = vadd.f32 %v1134_v38, %v929_v56 }
 0x173   : > { %v1339_v36 = vpop.f32.mrf.mxu0 }
 0x174   : > { %v1550_v29 = vpop.f32.mrf.mxu1  ;;  %v1348_v57 = vadd.f32 %v1339_v36, %v1137_v53 }
 0x175   : > { %v1341_v28 = vpop.f32.mrf.mxu0 }
 0x176   : > { %v1552_v39 = vpop.f32.mrf.mxu1  ;;  %v1349_v37 = vadd.f32 %v1341_v28, %v1138_v55  ;;  %v1559_v2 = vadd.f32 %v1550_v29, %v1348_v57 }
 0x177   : > { %v1343_v31 = vpop.f32.mrf.mxu0 }
 0x178   : > { %v1554_v59 = vpop.f32.mrf.mxu1  ;;  %v1350_v1 = vadd.f32 %v1343_v31, %v1139_v35  ;;  %v1560_v8 = vadd.f32 %v1552_v39, %v1349_v37 }
 0x179   : > { %v1345_v45 = vpop.f32.mrf.mxu0 }
 0x17a   : > { %v1556_v54 = vpop.f32.mrf.mxu1  ;;  %v1351_v9 = vadd.f32 %v1345_v45, %v1140_v62  ;;  %v1561_v11 = vadd.f32 %v1554_v59, %v1350_v1 }
 0x17c   : > { %v1562_v17 = vadd.f32 %v1556_v54, %v1351_v9 }
 0x1a3   : > { %v1761_v48 = vpop.f32.mrf.mxu0 }
 0x1a4   : > { %v1972_v32 = vpop.f32.mrf.mxu1  ;;  %v1770_v10 = vadd.f32 %v1761_v48, %v1559_v2 }
 0x1a5   : > { %v1763_v58 = vpop.f32.mrf.mxu0 }
 0x1a6   : > { %v1974_v5 = vpop.f32.mrf.mxu1  ;;  %v1771_v12 = vadd.f32 %v1763_v58, %v1560_v8  ;;  %v1981_v21 = vadd.f32 %v1972_v32, %v1770_v10 }
 0x1a7   : > { %v1765_v3 = vpop.f32.mrf.mxu0 }
 0x1a8   : > { %v1976_v15 = vpop.f32.mrf.mxu1  ;;  %v1772_v18 = vadd.f32 %v1765_v3, %v1561_v11  ;;  %v1982_v23 = vadd.f32 %v1974_v5, %v1771_v12 }
 0x1a9   : > { %v1767_v14 = vpop.f32.mrf.mxu0 }
 0x1aa   : > { %v1773_v60 = vadd.f32 %v1767_v14, %v1562_v17  ;;  %v1978_v61 = vpop.f32.mrf.mxu1  ;;  %v1983_v42 = vadd.f32 %v1976_v15, %v1772_v18 }
 0x1ac   : > { %v1984_v24 = vadd.f32 %v1978_v61, %v1773_v60 }
 0x1d3   : > { %v2183_v22 = vpop.f32.mrf.mxu0 }
 0x1d4   : > { %v2192_v0 = vadd.f32 %v2183_v22, %v1981_v21 }
 0x1d5   : > { %v2185_v6 = vpop.f32.mrf.mxu0 }
 0x1d6   : > { %v2193_v49 = vadd.f32 %v2185_v6, %v1982_v23  ;;  %v2208_v26 = vmul.f32 %v2201_v4, %v2192_v0 }
 0x1d7   : > { %v2187_v51 = vpop.f32.mrf.mxu0 }
 0x1d8   : > { %v2209_v25 = vmul.f32 %v2205_v63, %v2193_v49  ;;  %v2194_v33 = vadd.f32 %v2187_v51, %v1983_v42  ;;  %v2224_v40 = vadd.f32 %v2217_v27, %v2208_v26 }
 0x1d9   : > { %v2189_v36 = vpop.f32.mrf.mxu0 }
 0x1da   : > { %v2210_v38 = vmul.f32 %v2201_v4, %v2194_v33  ;;  %v2195_v28 = vadd.f32 %v2189_v36, %v1984_v24  ;;  %v2225_v29 = vadd.f32 %v2221_v30, %v2209_v25  ;;  %v2228_v46 = vmax.f32 %v2224_v40, 0.0 }
 0x1dc   : > { %v2226_v31 = vadd.f32 %v2217_v27, %v2210_v38  ;;  %v2211_v39 = vmul.f32 %v2205_v63, %v2195_v28  ;;  %v2229_v45 = vmax.f32 %v2225_v29, 0.0 }
 0x1de   : > { %v2227_v41 = vadd.f32 %v2221_v30, %v2211_v39  ;;  %v2230_v44 = vmax.f32 %v2226_v31, 0.0 }
 0x1e0   : > { %v2231_v59 = vmax.f32 %v2227_v41, 0.0  ;;  %v2232_v48 = vpack.c.bf16 %v2230_v44, %v2228_v46 }
 0x1e2   : > { %v2233_v47 = vpack.c.bf16 %v2231_v59, %v2229_v45 }
 0x1e4   : > { %v2250_v50 = vsel %vm497_vm0, %v2233_v47, %v4060_v20 }
 0x1e5   : > { %v2798_v52 = vcombine.low %v2232_v48, %v2250_v50  ;;  %v2800_v53 = vcombine.high %v2232_v48, %v2250_v50 }
 0x1e7   : > { %2267 = vst [vmem:[%s4067_s24] sm:$0xff] %v2798_v52  ;;  %2269 = vst [vmem:[%s4067_s24 + $0xc] sm:$0xff] %v2800_v53 }
 0x1e8 PF: > { %p11_p9 = scmp.ge.s32.totalorder %s3227_s19, 4   ;;  %s4096_s15 = smov %s3177_s16 }
 0x1e9   : > { %s4097_s16 = smov %s3236_s22  ;;  %s4098_s17 = smov %s3227_s19 }
 0x1ea   :  { %13 = sbr.rel (!%p11_p9) target bundleno = 2 (0x2), region = 125 }

// kernel: inception_a.6
= control target key start
LH: loop header
LB: loop body
LE: loop exit
PB: predicated region body
PF: predicated region fallthrough
CT: control target
= control target key end

     0   :  { %s759_s15 = smov 0   ;;  %s858_s0 = inlined_call_operand.vmem [shape: bf16[32,384], index: 0, kind: input, shape index: {}]   ;;  %s859_s1 = inlined_call_operand.vmem [shape: bf16[384,128], index: 1, kind: input, shape index: {}]   ;;  %s860_s2 = inlined_call_operand.vmem [shape: f32[1,128], index: 2, kind: input, shape index: {}]   ;;  %s861_s3 = inlined_call_operand.vmem [shape: f32[1,128], index: 3, kind: input, shape index: {}]   ;;  %s862_s4 = inlined_call_operand.vmem [shape: bf16[32,128], index: 4, kind: output, shape index: {}]  }
   0x1 LB: > { %s585_s16 = sadd.s32 4294967295, %s730_s15   ;;  %p589_p0 = scmp.ge.s32.totalorder %s730_s15, 1  ;;  %s730_s15 = sphi %s759_s15, %s14_s15  }
   0x2   : > { %p164_p1 = scmp.lt.s32.totalorder %s730_s15, 3 }
   0x4   : > { %p165_p2 = pnand %p589_p0, %p164_p1 }
   0x5   : > { %s590_s7 = sshll.u32 (!%p165_p2), %s585_s16, 1 }
   0x6   : > { %168 = sbr.rel (%p165_p2) target bundleno = 257 (0x101), region = 36  ;;  %p192_p3 = scmp.lt.s32.totalorder (!%p165_p2), %s590_s7, 3 }
   0xb   : > { %v696_v0 = vld [vmem:[%s859_s1 + $0x78] sm:$0xff]   ;;  %v732_v1 = vmov 0.0   ;;  %vm733_vm0 = vmmov 0   ;;  %v699_v4 = vld [vmem:[%s859_s1 + $0x70] sm:$0xff]   ;;  %v702_v7 = vld [vmem:[%s859_s1 + $0x68] sm:$0xff]   ;;  %s864_s7 = smov (!%p192_p3, %s590_s7), 3 }
   0xc   : > { %665 = vmatprep.subr.bf16.mxu1 %v732_v1  ;;  %v697_v2 = vld [vmem:[%s859_s1 + $0xb8] sm:$0xff]   ;;  %634 = vmatprep.subr.bf16.mxu0 %v696_v0  ;;  %v700_v5 = vld [vmem:[%s859_s1 + $0xb0] sm:$0xff]   ;;  %v703_v8 = vld [vmem:[%s859_s1 + $0xa8] sm:$0xff]   ;;  %s685_s25 = smul.u32 12, %s864_s7 }
   0xd   : > { %v698_v3 = vld [vmem:[%s859_s1 + $0x38] sm:$0xff]   ;;  %681 = vmatprep.mubr.msk.bf16.mxu1 %vm733_vm0, %v732_v1  ;;  %666 = vmatpush3.bf16.msra.mxu1 %v697_v2  ;;  %v701_v6 = vld [vmem:[%s859_s1 + $0x30] sm:$0xff]   ;;  %v704_v9 = vld [vmem:[%s859_s1 + $0x28] sm:$0xff]  }
   0xe   : > { %635 = vmatpush3.bf16.msra.mxu0 %v698_v3  ;;  %667 = vmatprep.subr.bf16.mxu1 %v732_v1  ;;  %v705_v10 = vld [vmem:[%s859_s1 + $0x60] sm:$0xff]   ;;  %v708_v13 = vld [vmem:[%s859_s1 + $0x58] sm:$0xff]   ;;  %v711_v16 = vld [vmem:[%s859_s1 + $0x50] sm:$0xff]   ;;  %s196_s11 = scalar_lea.vmem %s858_s0, %s685_s25  ;;  %s593_s25 = sshll.u32 %s864_s7, 2 }
   0xf   : > { %636 = vmatprep.subr.bf16.mxu0 %v699_v4  ;;  %v706_v11 = vld [vmem:[%s859_s1 + $0xa0] sm:$0xff]   ;;  %v709_v14 = vld [vmem:[%s859_s1 + $0x98] sm:$0xff]   ;;  %v712_v17 = vld [vmem:[%s859_s1 + $0x90] sm:$0xff]   ;;  %s202_s28 = scalar_lea.vmem %s862_s4, %s593_s25 }
  0x10   : > { %v707_v12 = vld [vmem:[%s859_s1 + $0x20] sm:$0xff]   ;;  %v710_v15 = vld [vmem:[%s859_s1 + $0x18] sm:$0xff]   ;;  %v713_v18 = vld [vmem:[%s859_s1 + $0x10] sm:$0xff]  }
  0x11   : > { %668 = vmatpush3.bf16.msra.mxu1 %v700_v5  ;;  %v714_v19 = vld [vmem:[%s859_s1 + $0x48] sm:$0xff]   ;;  %v717_v22 = vld [vmem:[%s859_s1 + $0x40] sm:$0xff]  }
  0x12   : > { %637 = vmatpush3.bf16.msra.mxu0 %v701_v6  ;;  %669 = vmatprep.subr.bf16.mxu1 %v732_v1  ;;  %v715_v20 = vld [vmem:[%s859_s1 + $0x88] sm:$0xff]   ;;  %v722_v23 = vld [vmem:[%s196_s11 + $0x4] ss:$12 sps:$4 sm:$0xff]   ;;  %v621_v34 = vld [vmem:[%s860_s2] ss:$0 sm:$0xff] }
  0x13   : > { %638 = vmatprep.subr.bf16.mxu0 %v702_v7  ;;  %v716_v21 = vld [vmem:[%s859_s1 + $0x8] sm:$0xff]   ;;  %v718_v24 = vld [vmem:[%s859_s1 + $0x80] sm:$0xff]   ;;  %449 = vmatprep.mubr.bf16.mxu0 %v722_v23 }
  0x14   : > { %v719_v25 = vld [vmem:[%s859_s1] sm:$0xff]   ;;  %v723_v26 = vld [vmem:[%s196_s11 + $0x8] ss:$12 sps:$4 sm:$0xff]  }
  0x15   : > { %670 = vmatpush3.bf16.msra.mxu1 %v703_v8  ;;  %v720_v27 = vld [vmem:[%s196_s11] ss:$12 sps:$4 sm:$0xff]  }
  0x16   : > { %639 = vmatpush3.bf16.msra.mxu0 %v704_v9  ;;  %671 = vmatprep.subr.bf16.mxu1 %v732_v1  ;;  %v622_v41 = vld [vmem:[%s861_s3] ss:$0 sm:$0xff] }
  0x17   : > { %640 = vmatprep.subr.bf16.mxu0 %v705_v10 }
  0x19   : > { %672 = vmatpush3.bf16.msra.mxu1 %v706_v11 }
  0x1a   : > { %641 = vmatpush3.bf16.msra.mxu0 %v707_v12  ;;  %673 = vmatprep.subr.bf16.mxu1 %v732_v1 }
  0x1b   : > { %642 = vmatprep.subr.bf16.mxu0 %v708_v13 }
  0x1d   : > { %674 = vmatpush3.bf16.msra.mxu1 %v709_v14 }
  0x1e   : > { %643 = vmatpush3.bf16.msra.mxu0 %v710_v15  ;;  %675 = vmatprep.subr.bf16.mxu1 %v732_v1 }
  0x1f   : > { %644 = vmatprep.subr.bf16.mxu0 %v711_v16 }
  0x21   : > { %676 = vmatpush3.bf16.msra.mxu1 %v712_v17 }
  0x22   : > { %645 = vmatpush3.bf16.msra.mxu0 %v713_v18  ;;  %677 = vmatprep.subr.bf16.mxu1 %v732_v1 }
  0x23   : > { %646 = vmatprep.subr.bf16.mxu0 %v714_v19 }
  0x25   : > { %678 = vmatpush3.bf16.msra.mxu1 %v715_v20 }
  0x26   : > { %647 = vmatpush3.bf16.msra.mxu0 %v716_v21  ;;  %679 = vmatprep.subr.bf16.mxu1 %v732_v1 }
  0x27   : > { %648 = vmatprep.subr.bf16.mxu0 %v717_v22 }
  0x29   : > { %680 = vmatpush3.bf16.msra.mxu1 %v718_v24 }
  0x2a   : > { %649 = vmatpush3.bf16.msra.mxu0 %v719_v25 }
  0x2c   : > { %682 = vmatmul.mubr.bf16.vlgmr.msra.gmra.mxu1 %v723_v26 }
  0x2d   : > { %450 = vmatmul.mubr.bf16.vlgmr.msra.gmra.mxu0 %v720_v27 }
  0xec   : > { %v492_v28 = vpop.f32.mrf.mxu1 }
  0xed   : > { %v650_v29 = vpop.f32.mrf.mxu0 }
  0xee   : > { %v683_v30 = vpop.f32.mrf.mxu1 }
  0xef   : > { %v651_v31 = vpop.f32.mrf.mxu0 }
  0xf0   : > { %v652_v32 = vadd.f32 %v651_v31, %v650_v29  ;;  %v495_v33 = vpop.f32.mrf.mxu1 }
  0xf1   : > { %v653_v35 = vpop.f32.mrf.mxu0 }
  0xf2   : > { %v493_v36 = vadd.f32 %v652_v32, %v492_v28  ;;  %v684_v37 = vpop.f32.mrf.mxu1 }
  0xf3   : > { %v654_v38 = vpop.f32.mrf.mxu0 }
  0xf4   : > { %v506_v39 = vmul.f32 %v621_v34, %v493_v36  ;;  %v655_v40 = vadd.f32 %v654_v38, %v653_v35 }
  0xf6   : > { %v496_v42 = vadd.f32 %v655_v40, %v495_v33  ;;  %v515_v43 = vadd.f32 %v622_v41, %v506_v39 }
  0xf8   : > { %v507_v44 = vmul.f32 %v621_v34, %v496_v42  ;;  %v517_v46 = vmax.f32 %v515_v43, 0.0 }
  0xfa   : > { %v516_v45 = vadd.f32 %v622_v41, %v507_v44 }
  0xfc   : > { %v518_v47 = vmax.f32 %v516_v45, 0.0 }
  0xfe   : > { %v632_v48 = vpack.c.bf16 %v518_v47, %v517_v46 }
 0x100   : > { %633 = vst [vmem:[%s202_s28] sm:$0xff] %v632_v48  }
 0x101 PF: > { %s14_s15 = sadd.s32 1, %s730_s15  }
 0x102   : > { %p11_p4 = scmp.ge.s32.totalorder %s14_s15, 4  }
 0x104   :  { %13 = sbr.rel (!%p11_p4) target bundleno = 1 (0x1), region = 66 }

// kernel: inception_a.7
= control target key start
LH: loop header
LB: loop body
LE: loop exit
PB: predicated region body
PF: predicated region fallthrough
CT: control target
= control target key end

     0   :  { %s1617_s15 = smov 0   ;;  %s1619_s16 = smov 0   ;;  %s1857_s0 = inlined_call_operand.vmem [shape: bf16[9,32,64], index: 0, kind: input, shape index: {}]   ;;  %s1858_s1 = inlined_call_operand.vmem [shape: bf16[9,64,128], index: 1, kind: input, shape index: {}]   ;;  %s1859_s2 = inlined_call_operand.vmem [shape: f32[1,128], index: 2, kind: input, shape index: {}]   ;;  %s1860_s3 = inlined_call_operand.vmem [shape: f32[1,128], index: 3, kind: input, shape index: {}]   ;;  %s1861_s4 = inlined_call_operand.vmem [shape: bf16[32,128], index: 4, kind: output, shape index: {}]  }
   0x1   :  { %s1621_s17 = smov 0  }
   0x2 LB: > { %s1183_s18 = sadd.s32 4294967295, %s1588_s17   ;;  %s1634_s19 = sadd.s32 1, %s1588_s17   ;;  %s1588_s17 = sphi %s1621_s17, %s1864_s17   ;;  %s1584_s16 = sphi %s1619_s16, %s1863_s16   ;;  %s1580_s15 = sphi %s1617_s15, %s1862_s15  }
   0x3   : > { %s18_s20 = ssub.s32 %s1588_s17, %s1634_s19  ;;  %s21_s21 = sadd.s32 1, %s1584_s16 }
   0x4   : > { %p19_p0 = scmp.eq.s32.totalorder %s18_s20, 0  ;;  %p28_p1 = scmp.ne.s32.totalorder %s1584_s16, %s1580_s15 }
   0x5   : > { %p29_p2 = scmp.eq.s32.totalorder %s1588_s17, 0  ;;  %p1186_p4 = scmp.ge.s32.totalorder %s1588_s17, 2 }
   0x6   : > { %s1643_s22 = scalar_select %p19_p0, %s1584_s16, %s21_s21  }
   0x7   : > { %p30_p3 = por %p29_p2, %p28_p1  ;;  %152 = sbr.rel (%p1186_p4) target bundleno = 21 (0x15), region = 28 }
   0xc   : > { %155 = sbr.rel (!%p30_p3) target bundleno = 21 (0x15), region = 32  ;;  %s157_s23 = sand.u32 (%p30_p3), 1, %s1584_s16  }
   0xd   : > { %s1332_s24 = sshll.u32 (%p30_p3), %s1588_s17, 3  ;;  %s1493_s25 = smul.u32 (%p30_p3), 72, %s157_s23 }
   0xe   : > { %s162_s28 = scalar_lea.vmem (%p30_p3), %s1857_s0, %s1332_s24 }
   0xf   : > { %v179_v0 = vld [vmem:[%s162_s28] sm:$0xff] (%p30_p3)   ;;  %v183_v1 = vld [vmem:[%s162_s28 + $0x10] sm:$0xff] (%p30_p3)   ;;  %s159_s29 = scalar_lea.vmem (%p30_p3), [#allocation2], %s1493_s25 }
  0x10   : > { %v187_v2 = vld [vmem:[%s162_s28 + $0x20] sm:$0xff] (%p30_p3)   ;;  %v191_v3 = vld [vmem:[%s162_s28 + $0x30] sm:$0xff] (%p30_p3)   ;;  %180 = vst [vmem:[%s159_s29] sm:$0xff] (%p30_p3), %v179_v0   ;;  %184 = vst [vmem:[%s159_s29 + $0x8] sm:$0xff] (%p30_p3), %v183_v1  }
  0x11   : > { %v195_v4 = vld [vmem:[%s162_s28 + $0x40] sm:$0xff]   ;;  %v199_v5 = vld [vmem:[%s162_s28 + $0x50] sm:$0xff]   ;;  %188 = vst [vmem:[%s159_s29 + $0x10] sm:$0xff] %v187_v2   ;;  %192 = vst [vmem:[%s159_s29 + $0x18] sm:$0xff] %v191_v3  }
  0x12   : > { %196 = vst [vmem:[%s159_s29 + $0x20] sm:$0xff] %v195_v4   ;;  %200 = vst [vmem:[%s159_s29 + $0x28] sm:$0xff] %v199_v5   ;;  %v203_v6 = vld [vmem:[%s162_s28 + $0x60] sm:$0xff]   ;;  %v207_v7 = vld [vmem:[%s162_s28 + $0x70] sm:$0xff]  }
  0x13   : > { %v211_v8 = vld [vmem:[%s162_s28 + $0x80] sm:$0xff]   ;;  %204 = vst [vmem:[%s159_s29 + $0x30] sm:$0xff] %v203_v6   ;;  %208 = vst [vmem:[%s159_s29 + $0x38] sm:$0xff] %v207_v7  }
  0x14   : > { %212 = vst [vmem:[%s159_s29 + $0x40] sm:$0xff] %v211_v8  }
  0x15 PF: > { %p1189_p5 = scmp.ge.s32.totalorder %s1588_s17, 1  ;;  %p273_p6 = scmp.lt.s32.totalorder %s1588_s17, 3 }
  0x17   : > { %p274_p7 = pnand %p1189_p5, %p273_p6 }
  0x18   : > { %s280_s10 = sand.u32 (!%p274_p7), 1, %s1580_s15  }
  0x19   : > { %277 = sbr.rel (%p274_p7) target bundleno = 319 (0x13f), region = 73 }
  0x1a   : > { %s1494_s13 = smul.u32 (!%p274_p7), 72, %s280_s10 }
  0x1c   : > { %s1682_s23 = scalar_lea.vmem (!%p274_p7), [#allocation2], %s1494_s13 }
  0x1e   : > { %v1521_v9 = vld [vmem:[%s1858_s1 + $0x38] sm:$0xff]   ;;  %v1590_v10 = vmov 0.0   ;;  %v1523_v12 = vld [vmem:[%s1858_s1 + $0x30] sm:$0xff]   ;;  %vm1591_vm0 = vmmov 0   ;;  %v1525_v14 = vld [vmem:[%s1858_s1 + $0x28] sm:$0xff]   ;;  %vm364_vm1 = vcmask 523264  }
  0x1f   : > { %1385 = vmatprep.subr.bf16.mxu0 %v1590_v10  ;;  %1397 = vmatprep.subr.bf16.mxu1 %v1590_v10  ;;  %v1522_v11 = vld [vmem:[%s1858_s1 + $0x18] sm:$0xff]   ;;  %v1524_v13 = vld [vmem:[%s1858_s1 + $0x10] sm:$0xff]   ;;  %v1526_v15 = vld [vmem:[%s1858_s1 + $0x8] sm:$0xff]  }
  0x20   : > { %1386 = vmatpush3.bf16.msra.mxu0 %v1521_v9  ;;  %1393 = vmatprep.mubr.msk.bf16.mxu0 %vm1591_vm0, %v1590_v10  ;;  %v1527_v16 = vld [vmem:[%s1858_s1 + $0x20] sm:$0xff]   ;;  %v1529_v18 = vld [vmem:[%s1682_s23 + $0x8] sm:$0xff]   ;;  %v1531_v20 = vld [vmem:[%s1858_s1 + $0x58] sm:$0xff]  }
  0x21   : > { %1398 = vmatpush3.bf16.msra.mxu1 %v1522_v11  ;;  %1387 = vmatprep.subr.bf16.mxu0 %v1590_v10  ;;  %v1528_v17 = vld [vmem:[%s1858_s1] sm:$0xff]   ;;  %v1532_v21 = vld [vmem:[%s1858_s1 + $0x78] sm:$0xff]   ;;  %v1533_v22 = vld [vmem:[%s1858_s1 + $0x50] sm:$0xff]  }
  0x22   : > { %1399 = vmatprep.subr.bf16.mxu1 %v1590_v10  ;;  %1405 = vmatprep.mubr.msk.bf16.mxu1 %vm1591_vm0, %v1590_v10  ;;  %v1530_v19 = vld [vmem:[%s1682_s23] sm:$0xff]   ;;  %v1534_v23 = vld [vmem:[%s1858_s1 + $0x70] sm:$0xff]   ;;  %v1540_v29 = vld [vmem:[%s1858_s1 + $0x98] sm:$0xff]  }
  0x23   : > { %v1535_v24 = vld [vmem:[%s1858_s1 + $0x48] sm:$0xff]   ;;  %v1537_v26 = vld [vmem:[%s1858_s1 + $0x40] sm:$0xff]   ;;  %v1539_v28 = vld [vmem:[%s1682_s23 + $0x10] sm:$0xff]  }
  0x24   : > { %1388 = vmatpush3.bf16.msra.mxu0 %v1523_v12  ;;  %v1536_v25 = vld [vmem:[%s1858_s1 + $0x68] sm:$0xff]   ;;  %v1538_v27 = vld [vmem:[%s1858_s1 + $0x60] sm:$0xff]   ;;  %v1542_v31 = vld [vmem:[%s1858_s1 + $0xb8] sm:$0xff]  }
  0x25   : > { %1400 = vmatpush3.bf16.msra.mxu1 %v1524_v13  ;;  %1389 = vmatprep.subr.bf16.mxu0 %v1590_v10  ;;  %v1541_v30 = vld [vmem:[%s1682_s23 + $0x18] sm:$0xff]   ;;  %v1543_v32 = vld [vmem:[%s1858_s1 + $0x90] sm:$0xff]   ;;  %v1545_v34 = vld [vmem:[%s1858_s1 + $0x88] sm:$0xff]  }
  0x26   : > { %1401 = vmatprep.subr.bf16.mxu1 %v1590_v10  ;;  %v1544_v33 = vld [vmem:[%s1858_s1 + $0xb0] sm:$0xff]   ;;  %v1546_v35 = vld [vmem:[%s1858_s1 + $0xa8] sm:$0xff]   ;;  %v1547_v36 = vld [vmem:[%s1858_s1 + $0x80] sm:$0xff]  }
  0x27   : > { %v1548_v37 = vld [vmem:[%s1858_s1 + $0xa0] sm:$0xff]   ;;  %v1550_v39 = vld [vmem:[%s1858_s1 + $0xd8] sm:$0xff]   ;;  %v1551_v40 = vld [vmem:[%s1682_s23 + $0x28] sm:$0xff]  }
  0x28   : > { %1390 = vmatpush3.bf16.msra.mxu0 %v1525_v14  ;;  %v1549_v38 = vld [vmem:[%s1682_s23 + $0x20] sm:$0xff]   ;;  %v1552_v41 = vld [vmem:[%s1858_s1 + $0xf8] sm:$0xff]   ;;  %v1553_v42 = vld [vmem:[%s1858_s1 + $0xd0] sm:$0xff]  }
  0x29   : > { %1402 = vmatpush3.bf16.msra.mxu1 %v1526_v15  ;;  %1391 = vmatprep.subr.bf16.mxu0 %v1590_v10  ;;  %v1554_v43 = vld [vmem:[%s1858_s1 + $0xf0] sm:$0xff]   ;;  %v1555_v44 = vld [vmem:[%s1858_s1 + $0xc8] sm:$0xff]   ;;  %v1557_v46 = vld [vmem:[%s1858_s1 + $0xc0] sm:$0xff]  }
  0x2a   : > { %1403 = vmatprep.subr.bf16.mxu1 %v1590_v10  ;;  %v1556_v45 = vld [vmem:[%s1858_s1 + $0xe8] sm:$0xff]   ;;  %v1558_v47 = vld [vmem:[%s1858_s1 + $0xe0] sm:$0xff]   ;;  %v1559_v48 = vld [vmem:[%s1682_s23 + $0x30] sm:$0xff]  }
  0x2b   : > { %v1560_v49 = vld [vmem:[%s1858_s1 + $0x118] sm:$0xff]   ;;  %v1562_v51 = vld [vmem:[%s1858_s1 + $0x110] sm:$0xff]   ;;  %v1563_v52 = vld [vmem:[%s1858_s1 + $0x108] sm:$0xff]  }
  0x2c   : > { %1392 = vmatpush3.bf16.msra.mxu0 %v1527_v16  ;;  %v1561_v50 = vld [vmem:[%s1682_s23 + $0x38] sm:$0xff]   ;;  %v1565_v54 = vld [vmem:[%s1682_s23 + $0x40] sm:$0xff]   ;;  %s1190_s23 = sshll.u32 %s1183_s18, 1 }
  0x2d   : > { %1404 = vmatpush3.bf16.msra.mxu1 %v1528_v17  ;;  %1409 = vmatprep.subr.bf16.mxu0 %v1590_v10  ;;  %v1564_v53 = vld [vmem:[%s1858_s1 + $0x100] sm:$0xff]   ;;  %p307_p8 = scmp.lt.s32.totalorder %s1190_s23, 3 }
  0x2e   : > { %1421 = vmatprep.subr.bf16.mxu1 %v1590_v10 }
  0x2f   : > { %1394 = vmatmul.mubr.msk.bf16.vlgmr.msra.gmra.mxu0 %vm364_vm1, %v1529_v18  ;;  %s1866_s23 = smov (!%p307_p8, %s1190_s23), 3 }
  0x30   : > { %1406 = vmatmul.mubr.msk.bf16.vlgmr.msra.gmra.mxu1 %vm364_vm1, %v1530_v19  ;;  %1410 = vmatpush3.bf16.msra.mxu0 %v1531_v20  ;;  %s1191_s17 = sshll.u32 %s1866_s23, 2 }
  0x31   : > { %1422 = vmatpush3.bf16.msra.mxu1 %v1532_v21  ;;  %1411 = vmatprep.subr.bf16.mxu0 %v1590_v10  ;;  %s310_s29 = scalar_lea.vmem %s1861_s4, %s1191_s17 }
  0x32   : > { %1423 = vmatprep.subr.bf16.mxu1 %v1590_v10  ;;  %1417 = vmatprep.mubr.msk.bf16.mxu0 %vm1591_vm0, %v1590_v10 }
  0x33   : > { %1429 = vmatprep.mubr.msk.bf16.mxu1 %vm1591_vm0, %v1590_v10 }
  0x34   : > { %1412 = vmatpush3.bf16.msra.mxu0 %v1533_v22 }
  0x35   : > { %1424 = vmatpush3.bf16.msra.mxu1 %v1534_v23  ;;  %1413 = vmatprep.subr.bf16.mxu0 %v1590_v10 }
  0x36   : > { %1425 = vmatprep.subr.bf16.mxu1 %v1590_v10 }
  0x38   : > { %1414 = vmatpush3.bf16.msra.mxu0 %v1535_v24 }
  0x39   : > { %1426 = vmatpush3.bf16.msra.mxu1 %v1536_v25  ;;  %1415 = vmatprep.subr.bf16.mxu0 %v1590_v10 }
  0x3a   : > { %1427 = vmatprep.subr.bf16.mxu1 %v1590_v10 }
  0x3c   : > { %1416 = vmatpush3.bf16.msra.mxu0 %v1537_v26 }
  0x3d   : > { %1428 = vmatpush3.bf16.msra.mxu1 %v1538_v27  ;;  %1433 = vmatprep.subr.bf16.mxu0 %v1590_v10 }
  0x3e   : > { %1445 = vmatprep.subr.bf16.mxu1 %v1590_v10 }
  0x3f   : > { %1418 = vmatmul.mubr.msk.bf16.vlgmr.msra.gmra.mxu0 %vm364_vm1, %v1539_v28 }
  0x40   : > { %1434 = vmatpush3.bf16.msra.mxu0 %v1540_v29  ;;  %1430 = vmatmul.mubr.msk.bf16.vlgmr.msra.gmra.mxu1 %vm364_vm1, %v1541_v30 }
  0x41   : > { %1446 = vmatpush3.bf16.msra.mxu1 %v1542_v31  ;;  %1435 = vmatprep.subr.bf16.mxu0 %v1590_v10 }
  0x42   : > { %1447 = vmatprep.subr.bf16.mxu1 %v1590_v10  ;;  %1441 = vmatprep.mubr.msk.bf16.mxu0 %vm1591_vm0, %v1590_v10 }
  0x43   : > { %1453 = vmatprep.mubr.msk.bf16.mxu1 %vm1591_vm0, %v1590_v10 }
  0x44   : > { %1436 = vmatpush3.bf16.msra.mxu0 %v1543_v32 }
  0x45   : > { %1448 = vmatpush3.bf16.msra.mxu1 %v1544_v33  ;;  %1437 = vmatprep.subr.bf16.mxu0 %v1590_v10 }
  0x46   : > { %1449 = vmatprep.subr.bf16.mxu1 %v1590_v10 }
  0x48   : > { %1438 = vmatpush3.bf16.msra.mxu0 %v1545_v34 }
  0x49   : > { %1450 = vmatpush3.bf16.msra.mxu1 %v1546_v35  ;;  %1439 = vmatprep.subr.bf16.mxu0 %v1590_v10 }
  0x4a   : > { %1451 = vmatprep.subr.bf16.mxu1 %v1590_v10 }
  0x4c   : > { %1440 = vmatpush3.bf16.msra.mxu0 %v1547_v36 }
  0x4d   : > { %1452 = vmatpush3.bf16.msra.mxu1 %v1548_v37  ;;  %1457 = vmatprep.subr.bf16.mxu0 %v1590_v10  ;;  %v1326_v37 = vld [vmem:[%s1859_s2] ss:$0 sm:$0xff] }
  0x4e   : > { %1469 = vmatprep.subr.bf16.mxu1 %v1590_v10 }
  0x4f   : > { %1442 = vmatmul.mubr.msk.bf16.vlgmr.msra.gmra.mxu0 %vm364_vm1, %v1549_v38 }
  0x50   : > { %1458 = vmatpush3.bf16.msra.mxu0 %v1550_v39  ;;  %1454 = vmatmul.mubr.msk.bf16.vlgmr.msra.gmra.mxu1 %vm364_vm1, %v1551_v40 }
  0x51   : > { %1470 = vmatpush3.bf16.msra.mxu1 %v1552_v41  ;;  %1459 = vmatprep.subr.bf16.mxu0 %v1590_v10 }
  0x52   : > { %1471 = vmatprep.subr.bf16.mxu1 %v1590_v10  ;;  %1465 = vmatprep.mubr.msk.bf16.mxu0 %vm1591_vm0, %v1590_v10 }
  0x53   : > { %1477 = vmatprep.mubr.msk.bf16.mxu1 %vm1591_vm0, %v1590_v10 }
  0x54   : > { %1460 = vmatpush3.bf16.msra.mxu0 %v1553_v42  ;;  %v1327_v42 = vld [vmem:[%s1860_s3] ss:$0 sm:$0xff] }
  0x55   : > { %1472 = vmatpush3.bf16.msra.mxu1 %v1554_v43  ;;  %1461 = vmatprep.subr.bf16.mxu0 %v1590_v10 }
  0x56   : > { %1473 = vmatprep.subr.bf16.mxu1 %v1590_v10 }
  0x58   : > { %1462 = vmatpush3.bf16.msra.mxu0 %v1555_v44 }
  0x59   : > { %1474 = vmatpush3.bf16.msra.mxu1 %v1556_v45  ;;  %1463 = vmatprep.subr.bf16.mxu0 %v1590_v10 }
  0x5a   : > { %1475 = vmatprep.subr.bf16.mxu1 %v1590_v10 }
  0x5c   : > { %1464 = vmatpush3.bf16.msra.mxu0 %v1557_v46 }
  0x5d   : > { %1476 = vmatpush3.bf16.msra.mxu1 %v1558_v47  ;;  %1481 = vmatprep.subr.bf16.mxu0 %v1590_v10 }
  0x5f   : > { %1466 = vmatmul.mubr.msk.bf16.vlgmr.msra.gmra.mxu0 %vm364_vm1, %v1559_v48 }
  0x60   : > { %1482 = vmatpush3.bf16.msra.mxu0 %v1560_v49  ;;  %1478 = vmatmul.mubr.msk.bf16.vlgmr.msra.gmra.mxu1 %vm364_vm1, %v1561_v50 }
  0x61   : > { %1483 = vmatprep.subr.bf16.mxu0 %v1590_v10  ;;  %1489 = vmatprep.mubr.msk.bf16.mxu0 %vm1591_vm0, %v1590_v10 }
  0x64   : > { %1484 = vmatpush3.bf16.msra.mxu0 %v1562_v51 }
  0x65   : > { %1485 = vmatprep.subr.bf16.mxu0 %v1590_v10 }
  0x68   : > { %1486 = vmatpush3.bf16.msra.mxu0 %v1563_v52 }
  0x69   : > { %1487 = vmatprep.subr.bf16.mxu0 %v1590_v10 }
  0x6c   : > { %1488 = vmatpush3.bf16.msra.mxu0 %v1564_v53 }
  0x6f   : > { %1490 = vmatmul.mubr.msk.bf16.vlgmr.msra.gmra.mxu0 %vm364_vm1, %v1565_v54 }
  0xef   : > { %v402_v55 = vpop.f32.mrf.mxu0 }
  0xf0   : > { %v475_v56 = vpop.f32.mrf.mxu1 }
  0xf1   : > { %v1395_v57 = vpop.f32.mrf.mxu0  ;;  %v476_v15 = vadd.f32 %v475_v56, %v402_v55 }
  0xf2   : > { %v1407_v58 = vpop.f32.mrf.mxu1 }
  0xf3   : > { %v405_v59 = vpop.f32.mrf.mxu0 }
  0xf4   : > { %v478_v60 = vpop.f32.mrf.mxu1 }
  0xf5   : > { %v1396_v61 = vpop.f32.mrf.mxu0  ;;  %v479_v18 = vadd.f32 %v478_v60, %v405_v59 }
  0xf6   : > { %v1408_v62 = vpop.f32.mrf.mxu1 }
  0xff   : > { %v560_v63 = vpop.f32.mrf.mxu0 }
 0x100   : > { %v647_v0 = vpop.f32.mrf.mxu1  ;;  %v567_v16 = vadd.f32 %v560_v63, %v476_v15 }
 0x101   : > { %v1419_v1 = vpop.f32.mrf.mxu0 }
 0x102   : > { %v1431_v2 = vpop.f32.mrf.mxu1  ;;  %v654_v21 = vadd.f32 %v647_v0, %v567_v16 }
 0x103   : > { %v563_v3 = vpop.f32.mrf.mxu0 }
 0x104   : > { %v650_v4 = vpop.f32.mrf.mxu1  ;;  %v568_v22 = vadd.f32 %v563_v3, %v479_v18 }
 0x105   : > { %v1420_v5 = vpop.f32.mrf.mxu0 }
 0x106   : > { %v1432_v6 = vpop.f32.mrf.mxu1  ;;  %v655_v28 = vadd.f32 %v650_v4, %v568_v22 }
 0x10f   : > { %v734_v7 = vpop.f32.mrf.mxu0 }
 0x110   : > { %v821_v8 = vpop.f32.mrf.mxu1  ;;  %v741_v25 = vadd.f32 %v734_v7, %v654_v21 }
 0x111   : > { %v1443_v9 = vpop.f32.mrf.mxu0 }
 0x112   : > { %v1455_v10 = vpop.f32.mrf.mxu1  ;;  %v828_v30 = vadd.f32 %v821_v8, %v741_v25 }
 0x113   : > { %v737_v11 = vpop.f32.mrf.mxu0 }
 0x114   : > { %v824_v12 = vpop.f32.mrf.mxu1  ;;  %v742_v31 = vadd.f32 %v737_v11, %v655_v28 }
 0x115   : > { %v1444_v13 = vpop.f32.mrf.mxu0 }
 0x116   : > { %v1456_v14 = vpop.f32.mrf.mxu1  ;;  %v829_v33 = vadd.f32 %v824_v12, %v742_v31 }
 0x11f   : > { %v908_v17 = vpop.f32.mrf.mxu0 }
 0x120   : > { %v995_v19 = vpop.f32.mrf.mxu1  ;;  %v915_v32 = vadd.f32 %v908_v17, %v828_v30 }
 0x121   : > { %v1467_v20 = vpop.f32.mrf.mxu0 }
 0x122   : > { %v1479_v23 = vpop.f32.mrf.mxu1  ;;  %v1002_v34 = vadd.f32 %v995_v19, %v915_v32 }
 0x123   : > { %v911_v24 = vpop.f32.mrf.mxu0 }
 0x124   : > { %v998_v26 = vpop.f32.mrf.mxu1  ;;  %v916_v35 = vadd.f32 %v911_v24, %v829_v33 }
 0x125   : > { %v1468_v27 = vpop.f32.mrf.mxu0 }
 0x126   : > { %v1480_v29 = vpop.f32.mrf.mxu1  ;;  %v1003_v40 = vadd.f32 %v998_v26, %v916_v35 }
 0x12f   : > { %v1082_v36 = vpop.f32.mrf.mxu0 }
 0x130   : > { %v1089_v38 = vadd.f32 %v1082_v36, %v1002_v34 }
 0x131   : > { %v1491_v39 = vpop.f32.mrf.mxu0 }
 0x132   : > { %v1098_v41 = vmul.f32 %v1326_v37, %v1089_v38 }
 0x133   : > { %v1085_v43 = vpop.f32.mrf.mxu0 }
 0x134   : > { %v1090_v44 = vadd.f32 %v1085_v43, %v1003_v40  ;;  %v1107_v46 = vadd.f32 %v1327_v42, %v1098_v41 }
 0x135   : > { %v1492_v45 = vpop.f32.mrf.mxu0 }
 0x136   : > { %v1099_v47 = vmul.f32 %v1326_v37, %v1090_v44  ;;  %v1109_v49 = vmax.f32 %v1107_v46, 0.0 }
 0x138   : > { %v1108_v48 = vadd.f32 %v1327_v42, %v1099_v47 }
 0x13a   : > { %v1110_v50 = vmax.f32 %v1108_v48, 0.0 }
 0x13c   : > { %v1338_v51 = vpack.c.bf16 %v1110_v50, %v1109_v49 }
 0x13e   : > { %1339 = vst [vmem:[%s310_s29] sm:$0xff] %v1338_v51  }
 0x13f PF: > { %p11_p9 = scmp.ge.s32.totalorder %s1634_s19, 4   ;;  %s1862_s15 = smov %s1584_s16 }
 0x140   : > { %s1863_s16 = smov %s1643_s22  ;;  %s1864_s17 = smov %s1634_s19 }
 0x141   :  { %13 = sbr.rel (!%p11_p9) target bundleno = 2 (0x2), region = 128 }

// kernel: inception_a.9
= control target key start
LH: loop header
LB: loop body
LE: loop exit
PB: predicated region body
PF: predicated region fallthrough
CT: control target
= control target key end

     0   :  { %s1928_s25 = smov 0   ;;  %s2278_s0 = inlined_call_operand.vmem [shape: bf16[32,128], index: 0, kind: input, shape index: {}]   ;;  %s2279_s1 = inlined_call_operand.vmem [shape: bf16[128,384], index: 1, kind: input, shape index: {}]   ;;  %s2280_s2 = inlined_call_operand.vmem [shape: f32[1,384], index: 2, kind: input, shape index: {}]   ;;  %s2281_s3 = inlined_call_operand.vmem [shape: f32[1,384], index: 3, kind: input, shape index: {}]   ;;  %s2282_s4 = inlined_call_operand.vmem [shape: bf16[32,128], index: 4, kind: input, shape index: {}]   ;;  %s2283_s5 = inlined_call_operand.vmem [shape: bf16[128,384], index: 5, kind: input, shape index: {}]   ;;  %s2284_s6 = inlined_call_operand.vmem [shape: f32[1,384], index: 6, kind: input, shape index: {}]   ;;  %s2285_s7 = inlined_call_operand.vmem [shape: f32[1,384], index: 7, kind: input, shape index: {}]   ;;  %s2286_s8 = inlined_call_operand.vmem [shape: bf16[32,128], index: 8, kind: input, shape index: {}]   ;;  %s2287_s9 = inlined_call_operand.vmem [shape: bf16[128,384], index: 9, kind: input, shape index: {}]   ;;  %s2288_s10 = inlined_call_operand.vmem [shape: f32[1,384], index: 10, kind: input, shape index: {}]   ;;  %s2289_s11 = inlined_call_operand.vmem [shape: f32[1,384], index: 11, kind: input, shape index: {}]   ;;  %s2290_s12 = inlined_call_operand.vmem [shape: bf16[32,384], index: 12, kind: input, shape index: {}]   ;;  %s2291_s13 = inlined_call_operand.vmem [shape: f32[32,384], index: 13, kind: output, shape index: {}]  }
   0x1 LB: > { %s1556_s26 = sadd.s32 4294967295, %s1853_s25   ;;  %p1560_p0 = scmp.ge.s32.totalorder %s1853_s25, 1  ;;  %s1853_s25 = sphi %s1928_s25, %s23_s25  }
   0x2   : > { %p422_p1 = scmp.lt.s32.totalorder %s1853_s25, 3 }
   0x4   : > { %p423_p2 = pnand %p1560_p0, %p422_p1 }
   0x5   : > { %s1561_s16 = sshll.u32 (!%p423_p2), %s1556_s26, 1 }
   0x6   : > { %426 = sbr.rel (%p423_p2) target bundleno = 319 (0x13f), region = 72  ;;  %p484_p3 = scmp.lt.s32.totalorder (!%p423_p2), %s1561_s16, 3 }
   0xb   : > { %v1748_v0 = vld [vmem:[%s2279_s1 + $0xac] ss:$12 sps:$4 sm:$0xff]   ;;  %v1855_v1 = vmov 0.0   ;;  %v1750_v2 = vld [vmem:[%s2279_s1 + $0xb0] ss:$12 sps:$4 sm:$0xff]   ;;  %vm1856_vm0 = vmmov 0  }
   0xc   : > { %1675 = vmatprep.subr.bf16.mxu1 %v1855_v1  ;;  %1691 = vmatprep.mubr.msk.bf16.mxu1 %vm1856_vm0, %v1855_v1  ;;  %v1751_v3 = vld [vmem:[%s2279_s1 + $0xa8] ss:$12 sps:$4 sm:$0xff]   ;;  %v1857_v5 = vmov 0   ;;  %v1754_v6 = vld [vmem:[%s2279_s1 + $0x98] ss:$12 sps:$4 sm:$0xff]   ;;  %s2293_s16 = smov (!%p484_p3, %s1561_s16), 3 }
   0xd   : > { %684 = vmatprep.subr.bf16.mxu0 %v1748_v0  ;;  %1676 = vmatpush3.bf16.msra.mxu1 %v1750_v2  ;;  %v1752_v4 = vld [vmem:[%s2279_s1 + $0x94] ss:$12 sps:$4 sm:$0xff]   ;;  %v1755_v7 = vld [vmem:[%s2279_s1 + $0x90] ss:$12 sps:$4 sm:$0xff]   ;;  %v1759_v10 = vld [vmem:[%s2279_s1 + $0x78] ss:$12 sps:$4 sm:$0xff]  }
   0xe   : > { %716 = vmatprep.mubr.bf16.mxu0 %v1857_v5  ;;  %685 = vmatpush1.bf16.msra.mxu0 %v1751_v3  ;;  %v1756_v8 = vld [vmem:[%s2279_s1 + $0x7c] ss:$12 sps:$4 sm:$0xff]   ;;  %v1758_v9 = vld [vmem:[%s2279_s1 + $0x80] ss:$12 sps:$4 sm:$0xff]   ;;  %v1760_v11 = vld [vmem:[%s2279_s1 + $0x64] ss:$12 sps:$4 sm:$0xff]  }
   0xf   : > { %1677 = vmatprep.subr.bf16.mxu1 %v1855_v1  ;;  %686 = vmatprep.subr.bf16.mxu0 %v1752_v4  ;;  %v1762_v12 = vld [vmem:[%s2279_s1 + $0x68] ss:$12 sps:$4 sm:$0xff]   ;;  %v1763_v13 = vld [vmem:[%s2279_s1 + $0x60] ss:$12 sps:$4 sm:$0xff]   ;;  %s1985_s22 = sshll.u32 %s2293_s16, 2  ;;  %s1735_s24 = smul.u32 12, %s2293_s16 }
  0x10   : > { %v1764_v14 = vld [vmem:[%s2279_s1 + $0x4c] ss:$12 sps:$4 sm:$0xff]   ;;  %v1766_v15 = vld [vmem:[%s2279_s1 + $0x50] ss:$12 sps:$4 sm:$0xff]   ;;  %v1767_v16 = vld [vmem:[%s2279_s1 + $0x48] ss:$12 sps:$4 sm:$0xff]   ;;  %s487_s15 = scalar_lea.vmem %s2278_s0, %s1985_s22  ;;  %s493_s23 = scalar_lea.vmem %s2282_s4, %s1985_s22 }
  0x11   : > { %1678 = vmatpush3.bf16.msra.mxu1 %v1754_v6  ;;  %v1768_v17 = vld [vmem:[%s2279_s1 + $0x34] ss:$12 sps:$4 sm:$0xff]   ;;  %v1770_v18 = vld [vmem:[%s2279_s1 + $0x38] ss:$12 sps:$4 sm:$0xff]   ;;  %v1771_v19 = vld [vmem:[%s2279_s1 + $0x30] ss:$12 sps:$4 sm:$0xff]   ;;  %s499_s30 = scalar_lea.vmem %s2286_s8, %s1985_s22  ;;  %s2228_s17 = scalar_lea.vmem %s2290_s12, %s1735_s24 }
  0x12   : > { %687 = vmatpush1.bf16.msra.mxu0 %v1755_v7  ;;  %1679 = vmatprep.subr.bf16.mxu1 %v1855_v1  ;;  %v1772_v20 = vld [vmem:[%s2279_s1 + $0x1c] ss:$12 sps:$4 sm:$0xff]   ;;  %v1774_v21 = vld [vmem:[%s2279_s1 + $0x20] ss:$12 sps:$4 sm:$0xff]   ;;  %v1775_v22 = vld [vmem:[%s2279_s1 + $0x18] ss:$12 sps:$4 sm:$0xff]  }
  0x13   : > { %688 = vmatprep.subr.bf16.mxu0 %v1756_v8  ;;  %v1776_v23 = vld [vmem:[%s2279_s1 + $0x4] ss:$12 sps:$4 sm:$0xff]   ;;  %v1778_v24 = vld [vmem:[%s2279_s1 + $0x8] ss:$12 sps:$4 sm:$0xff]   ;;  %v1779_v25 = vld [vmem:[%s2279_s1] ss:$12 sps:$4 sm:$0xff]  }
  0x14   : > { %v1783_v26 = vld [vmem:[%s2283_s5 + $0xac] ss:$12 sps:$4 sm:$0xff]   ;;  %v1780_v27 = vld [vmem:[%s487_s15] sm:$0xff]   ;;  %v1784_v28 = vld [vmem:[%s2283_s5 + $0xb0] ss:$12 sps:$4 sm:$0xff]  }
  0x15   : > { %1680 = vmatpush3.bf16.msra.mxu1 %v1758_v9  ;;  %v1781_v29 = vld [vmem:[%s2283_s5 + $0xa8] ss:$12 sps:$4 sm:$0xff]   ;;  %v1788_v31 = vld [vmem:[%s2283_s5 + $0x98] ss:$12 sps:$4 sm:$0xff]   ;;  %v1785_v32 = vld [vmem:[%s2283_s5 + $0x90] ss:$12 sps:$4 sm:$0xff]  }
  0x16   : > { %689 = vmatpush1.bf16.msra.mxu0 %v1759_v10  ;;  %1681 = vmatprep.subr.bf16.mxu1 %v1855_v1  ;;  %v1787_v30 = vld [vmem:[%s2283_s5 + $0x94] ss:$12 sps:$4 sm:$0xff]   ;;  %v1791_v33 = vld [vmem:[%s2283_s5 + $0x7c] ss:$12 sps:$4 sm:$0xff]   ;;  %v1789_v35 = vld [vmem:[%s2283_s5 + $0x78] ss:$12 sps:$4 sm:$0xff]  }
  0x17   : > { %690 = vmatprep.subr.bf16.mxu0 %v1760_v11  ;;  %v1792_v34 = vld [vmem:[%s2283_s5 + $0x80] ss:$12 sps:$4 sm:$0xff]   ;;  %v1795_v36 = vld [vmem:[%s2283_s5 + $0x64] ss:$12 sps:$4 sm:$0xff]   ;;  %v1796_v37 = vld [vmem:[%s2283_s5 + $0x68] ss:$12 sps:$4 sm:$0xff]  }
  0x18   : > { %v1793_v38 = vld [vmem:[%s2283_s5 + $0x60] ss:$12 sps:$4 sm:$0xff]   ;;  %v1800_v40 = vld [vmem:[%s2283_s5 + $0x50] ss:$12 sps:$4 sm:$0xff]   ;;  %v1797_v41 = vld [vmem:[%s2283_s5 + $0x48] ss:$12 sps:$4 sm:$0xff]  }
  0x19   : > { %1682 = vmatpush3.bf16.msra.mxu1 %v1762_v12  ;;  %v1799_v39 = vld [vmem:[%s2283_s5 + $0x4c] ss:$12 sps:$4 sm:$0xff]   ;;  %v1803_v42 = vld [vmem:[%s2283_s5 + $0x34] ss:$12 sps:$4 sm:$0xff]   ;;  %v1801_v44 = vld [vmem:[%s2283_s5 + $0x30] ss:$12 sps:$4 sm:$0xff]  }
  0x1a   : > { %691 = vmatpush1.bf16.msra.mxu0 %v1763_v13  ;;  %1683 = vmatprep.subr.bf16.mxu1 %v1855_v1  ;;  %v1804_v43 = vld [vmem:[%s2283_s5 + $0x38] ss:$12 sps:$4 sm:$0xff]   ;;  %v1807_v45 = vld [vmem:[%s2283_s5 + $0x1c] ss:$12 sps:$4 sm:$0xff]   ;;  %v1808_v46 = vld [vmem:[%s2283_s5 + $0x20] ss:$12 sps:$4 sm:$0xff]  }
  0x1b   : > { %692 = vmatprep.subr.bf16.mxu0 %v1764_v14  ;;  %v1805_v47 = vld [vmem:[%s2283_s5 + $0x18] ss:$12 sps:$4 sm:$0xff]   ;;  %v1812_v49 = vld [vmem:[%s2283_s5 + $0x8] ss:$12 sps:$4 sm:$0xff]   ;;  %v1809_v50 = vld [vmem:[%s2283_s5] ss:$12 sps:$4 sm:$0xff]  }
  0x1c   : > { %v1811_v48 = vld [vmem:[%s2283_s5 + $0x4] ss:$12 sps:$4 sm:$0xff]   ;;  %v1816_v51 = vld [vmem:[%s2287_s9 + $0xac] ss:$12 sps:$4 sm:$0xff]   ;;  %v1814_v54 = vld [vmem:[%s2287_s9 + $0xa8] ss:$12 sps:$4 sm:$0xff]  }
  0x1d   : > { %1684 = vmatpush3.bf16.msra.mxu1 %v1766_v15  ;;  %v1813_v52 = vld [vmem:[%s493_s23] sm:$0xff]   ;;  %v1817_v53 = vld [vmem:[%s2287_s9 + $0xb0] ss:$12 sps:$4 sm:$0xff]   ;;  %v1829_v62 = vld [vmem:[%s2287_s9 + $0x68] ss:$12 sps:$4 sm:$0xff]  }
  0x1e   : > { %693 = vmatpush1.bf16.msra.mxu0 %v1767_v16  ;;  %1685 = vmatprep.subr.bf16.mxu1 %v1855_v1  ;;  %v1820_v55 = vld [vmem:[%s2287_s9 + $0x94] ss:$12 sps:$4 sm:$0xff]   ;;  %v1821_v56 = vld [vmem:[%s2287_s9 + $0x98] ss:$12 sps:$4 sm:$0xff]   ;;  %v1818_v57 = vld [vmem:[%s2287_s9 + $0x90] ss:$12 sps:$4 sm:$0xff]  }
  0x1f   : > { %694 = vmatprep.subr.bf16.mxu0 %v1768_v17  ;;  %v1824_v58 = vld [vmem:[%s2287_s9 + $0x7c] ss:$12 sps:$4 sm:$0xff]   ;;  %v1825_v59 = vld [vmem:[%s2287_s9 + $0x80] ss:$12 sps:$4 sm:$0xff]   ;;  %v1822_v60 = vld [vmem:[%s2287_s9 + $0x78] ss:$12 sps:$4 sm:$0xff]  }
  0x20   : > { %v1828_v61 = vld [vmem:[%s2287_s9 + $0x64] ss:$12 sps:$4 sm:$0xff]   ;;  %v1826_v63 = vld [vmem:[%s2287_s9 + $0x60] ss:$12 sps:$4 sm:$0xff]   ;;  %v1830_v3 = vld [vmem:[%s2287_s9 + $0x48] ss:$12 sps:$4 sm:$0xff]  }
  0x21   : > { %1686 = vmatpush3.bf16.msra.mxu1 %v1770_v18  ;;  %v1832_v0 = vld [vmem:[%s2287_s9 + $0x4c] ss:$12 sps:$4 sm:$0xff]   ;;  %v1833_v2 = vld [vmem:[%s2287_s9 + $0x50] ss:$12 sps:$4 sm:$0xff]   ;;  %v1836_v4 = vld [vmem:[%s2287_s9 + $0x34] ss:$12 sps:$4 sm:$0xff]  }
  0x22   : > { %695 = vmatpush1.bf16.msra.mxu0 %v1771_v19  ;;  %1687 = vmatprep.subr.bf16.mxu1 %v1855_v1  ;;  %v1834_v6 = vld [vmem:[%s2287_s9 + $0x30] ss:$12 sps:$4 sm:$0xff]   ;;  %v1841_v8 = vld [vmem:[%s2287_s9 + $0x20] ss:$12 sps:$4 sm:$0xff]   ;;  %v1838_v9 = vld [vmem:[%s2287_s9 + $0x18] ss:$12 sps:$4 sm:$0xff]  }
  0x23   : > { %696 = vmatprep.subr.bf16.mxu0 %v1772_v20  ;;  %v1840_v7 = vld [vmem:[%s2287_s9 + $0x1c] ss:$12 sps:$4 sm:$0xff]   ;;  %v1844_v10 = vld [vmem:[%s2287_s9 + $0x4] ss:$12 sps:$4 sm:$0xff]   ;;  %v1842_v12 = vld [vmem:[%s2287_s9] ss:$12 sps:$4 sm:$0xff]  }
  0x24   : > { %v1845_v11 = vld [vmem:[%s2287_s9 + $0x8] ss:$12 sps:$4 sm:$0xff]   ;;  %v1846_v13 = vld [vmem:[%s499_s30] sm:$0xff]   ;;  %s1736_s30 = smul.u32 24, %s2293_s16 }
  0x25   : > { %1688 = vmatpush3.bf16.msra.mxu1 %v1774_v21 }
  0x26   : > { %697 = vmatpush1.bf16.msra.mxu0 %v1775_v22  ;;  %1689 = vmatprep.subr.bf16.mxu1 %v1855_v1  ;;  %s513_s21 = scalar_lea.vmem %s2291_s13, %s1736_s30 }
  0x27   : > { %698 = vmatprep.subr.bf16.mxu0 %v1776_v23  ;;  %v770_v23 = vlaneseq }
  0x29   : > { %1690 = vmatpush3.bf16.msra.mxu1 %v1778_v24 }
  0x2a   : > { %699 = vmatpush1.bf16.msra.mxu0 %v1779_v25  ;;  %1695 = vmatprep.subr.bf16.mxu1 %v1855_v1  ;;  %v771_v25 = vshrl.u32 %v770_v23, 7 }
  0x2b   : > { %988 = vmatprep.subr.bf16.mxu0 %v1783_v26 }
  0x2c   : > { %1692 = vmatmul.mubr.bf16.vlgmr.msra.gmra.mxu1 %v1780_v27 }
  0x2d   : > { %717 = vmatmul.mubr.bf16.vlgmr.msra.gmra.mxu0 %v1780_v27  ;;  %1696 = vmatpush3.bf16.msra.mxu1 %v1784_v28  ;;  %v780_v27 = vsub.s32 2, %v771_v25 }
  0x2e   : > { %989 = vmatpush1.bf16.msra.mxu0 %v1781_v29  ;;  %1697 = vmatprep.subr.bf16.mxu1 %v1855_v1  ;;  %v772_v29 = vsub.s32 0, %v771_v25 }
  0x2f   : > { %990 = vmatprep.subr.bf16.mxu0 %v1787_v30  ;;  %1711 = vmatprep.mubr.msk.bf16.mxu1 %vm1856_vm0, %v1855_v1  ;;  %v1072_v30 = vld [vmem:[%s2284_s6] sm:$0x7] }
  0x30   : > { %1020 = vmatprep.mubr.bf16.mxu0 %v1857_v5 }
  0x31   : > { %1698 = vmatpush3.bf16.msra.mxu1 %v1788_v31  ;;  %v768_v31 = vld [vmem:[%s2280_s2] sm:$0x7] }
  0x32   : > { %991 = vmatpush1.bf16.msra.mxu0 %v1785_v32  ;;  %1699 = vmatprep.subr.bf16.mxu1 %v1855_v1  ;;  %v776_v32 = vsub.s32 1, %v771_v25 }
  0x33   : > { %992 = vmatprep.subr.bf16.mxu0 %v1791_v33  ;;  %v781_v33 = vrot.slane %v768_v31, %v780_v27 }
  0x35   : > { %1700 = vmatpush3.bf16.msra.mxu1 %v1792_v34  ;;  %v791_v34 = vld [vmem:[%s2281_s3] sm:$0x7] }
  0x36   : > { %993 = vmatpush1.bf16.msra.mxu0 %v1789_v35  ;;  %1701 = vmatprep.subr.bf16.mxu1 %v1855_v1  ;;  %v1085_v35 = vrot.slane %v1072_v30, %v780_v27 }
  0x37   : > { %994 = vmatprep.subr.bf16.mxu0 %v1795_v36  ;;  %v1095_v36 = vld [vmem:[%s2285_s7] sm:$0x7] }
  0x39   : > { %1702 = vmatpush3.bf16.msra.mxu1 %v1796_v37 }
  0x3a   : > { %995 = vmatpush1.bf16.msra.mxu0 %v1793_v38  ;;  %1703 = vmatprep.subr.bf16.mxu1 %v1855_v1  ;;  %v773_v38 = vrot.slane %v768_v31, %v772_v29 }
  0x3b   : > { %996 = vmatprep.subr.bf16.mxu0 %v1799_v39  ;;  %v804_v39 = vrot.slane %v791_v34, %v780_v27 }
  0x3d   : > { %1704 = vmatpush3.bf16.msra.mxu1 %v1800_v40  ;;  %v777_v40 = vrot.slane %v768_v31, %v776_v32 }
  0x3e   : > { %997 = vmatpush1.bf16.msra.mxu0 %v1797_v41  ;;  %1705 = vmatprep.subr.bf16.mxu1 %v1855_v1  ;;  %v1077_v41 = vrot.slane %v1072_v30, %v772_v29 }
  0x3f   : > { %998 = vmatprep.subr.bf16.mxu0 %v1803_v42  ;;  %v1382_v42 = vld [vmem:[%s2288_s10] sm:$0x7] }
  0x41   : > { %1706 = vmatpush3.bf16.msra.mxu1 %v1804_v43  ;;  %v1405_v43 = vld [vmem:[%s2289_s11] sm:$0x7] }
  0x42   : > { %999 = vmatpush1.bf16.msra.mxu0 %v1801_v44  ;;  %1707 = vmatprep.subr.bf16.mxu1 %v1855_v1  ;;  %v796_v44 = vrot.slane %v791_v34, %v772_v29 }
  0x43   : > { %1000 = vmatprep.subr.bf16.mxu0 %v1807_v45  ;;  %v800_v45 = vrot.slane %v791_v34, %v776_v32 }
  0x45   : > { %1708 = vmatpush3.bf16.msra.mxu1 %v1808_v46  ;;  %v1108_v46 = vrot.slane %v1095_v36, %v780_v27 }
  0x46   : > { %1001 = vmatpush1.bf16.msra.mxu0 %v1805_v47  ;;  %1709 = vmatprep.subr.bf16.mxu1 %v1855_v1  ;;  %v1081_v47 = vrot.slane %v1072_v30, %v776_v32 }
  0x47   : > { %1002 = vmatprep.subr.bf16.mxu0 %v1811_v48 }
  0x49   : > { %1710 = vmatpush3.bf16.msra.mxu1 %v1812_v49 }
  0x4a   : > { %1003 = vmatpush1.bf16.msra.mxu0 %v1809_v50  ;;  %1715 = vmatprep.subr.bf16.mxu1 %v1855_v1  ;;  %v1100_v50 = vrot.slane %v1095_v36, %v772_v29 }
  0x4b   : > { %1298 = vmatprep.subr.bf16.mxu0 %v1816_v51  ;;  %v1104_v51 = vrot.slane %v1095_v36, %v776_v32 }
  0x4c   : > { %1712 = vmatmul.mubr.bf16.vlgmr.msra.gmra.mxu1 %v1813_v52 }
  0x4d   : > { %1021 = vmatmul.mubr.bf16.vlgmr.msra.gmra.mxu0 %v1813_v52  ;;  %1716 = vmatpush3.bf16.msra.mxu1 %v1817_v53 }
  0x4e   : > { %1299 = vmatpush1.bf16.msra.mxu0 %v1814_v54  ;;  %1717 = vmatprep.subr.bf16.mxu1 %v1855_v1  ;;  %v1395_v54 = vrot.slane %v1382_v42, %v780_v27 }
  0x4f   : > { %1300 = vmatprep.subr.bf16.mxu0 %v1820_v55  ;;  %1731 = vmatprep.mubr.msk.bf16.mxu1 %vm1856_vm0, %v1855_v1  ;;  %v2236_v55 = vrot.slane %v1405_v43, %v780_v27 }
  0x50   : > { %1330 = vmatprep.mubr.bf16.mxu0 %v1857_v5  ;;  %v1837_v5 = vld [vmem:[%s2287_s9 + $0x38] ss:$12 sps:$4 sm:$0xff]  }
  0x51   : > { %1718 = vmatpush3.bf16.msra.mxu1 %v1821_v56  ;;  %v2239_v56 = vld [vmem:[%s2228_s17 + $0x8] ss:$12 sps:$4 sm:$0xff]  }
  0x52   : > { %1301 = vmatpush1.bf16.msra.mxu0 %v1818_v57  ;;  %1719 = vmatprep.subr.bf16.mxu1 %v1855_v1  ;;  %v1387_v57 = vrot.slane %v1382_v42, %v772_v29 }
  0x53   : > { %1302 = vmatprep.subr.bf16.mxu0 %v1824_v58 }
  0x55   : > { %1720 = vmatpush3.bf16.msra.mxu1 %v1825_v59 }
  0x56   : > { %1303 = vmatpush1.bf16.msra.mxu0 %v1822_v60  ;;  %1721 = vmatprep.subr.bf16.mxu1 %v1855_v1 }
  0x57   : > { %1304 = vmatprep.subr.bf16.mxu0 %v1828_v61  ;;  %v2241_v61 = vrot.slane %v1405_v43, %v772_v29 }
  0x59   : > { %1722 = vmatpush3.bf16.msra.mxu1 %v1829_v62  ;;  %v2244_v62 = vld [vmem:[%s2228_s17] sm:$0xff] }
  0x5a   : > { %1305 = vmatpush1.bf16.msra.mxu0 %v1826_v63  ;;  %1723 = vmatprep.subr.bf16.mxu1 %v1855_v1 }
  0x5b   : > { %1306 = vmatprep.subr.bf16.mxu0 %v1832_v0 }
  0x5d   : > { %1724 = vmatpush3.bf16.msra.mxu1 %v1833_v2  ;;  %v2246_v2 = vrot.slane %v1382_v42, %v776_v32 }
  0x5e   : > { %1307 = vmatpush1.bf16.msra.mxu0 %v1830_v3  ;;  %1725 = vmatprep.subr.bf16.mxu1 %v1855_v1  ;;  %v2248_v3 = vrot.slane %v1405_v43, %v776_v32 }
  0x5f   : > { %1308 = vmatprep.subr.bf16.mxu0 %v1836_v4 }
  0x61   : > { %1726 = vmatpush3.bf16.msra.mxu1 %v1837_v5 }
  0x62   : > { %1309 = vmatpush1.bf16.msra.mxu0 %v1834_v6  ;;  %1727 = vmatprep.subr.bf16.mxu1 %v1855_v1 }
  0x63   : > { %1310 = vmatprep.subr.bf16.mxu0 %v1840_v7 }
  0x65   : > { %1728 = vmatpush3.bf16.msra.mxu1 %v1841_v8  ;;  %v1446_v8 = vunpack.c.l.bf16 %v2239_v56 }
  0x66   : > { %1311 = vmatpush1.bf16.msra.mxu0 %v1838_v9  ;;  %1729 = vmatprep.subr.bf16.mxu1 %v1855_v1 }
  0x67   : > { %1312 = vmatprep.subr.bf16.mxu0 %v1844_v10 }
  0x69   : > { %1730 = vmatpush3.bf16.msra.mxu1 %v1845_v11 }
  0x6a   : > { %1313 = vmatpush1.bf16.msra.mxu0 %v1842_v12  ;;  %v1444_v12 = vunpack.c.l.bf16 %v2244_v62 }
  0x6c   : > { %1732 = vmatmul.mubr.bf16.vlgmr.msra.gmra.mxu1 %v1846_v13 }
  0x6d   : > { %1331 = vmatmul.mubr.bf16.vlgmr.msra.gmra.mxu0 %v1846_v13  ;;  %v2253_v13 = vld [vmem:[%s2228_s17 + $0xc] sm:$0xff] }
  0xec   : > { %v761_v14 = vpop.f32.mrf.mxu1 }
  0xed   : > { %v718_v1 = vpop.f32.mrf.mxu0  ;;  %v787_v48 = vmul.f32 %v781_v33, %v761_v14 }
  0xee   : > { %v1693_v15 = vpop.f32.mrf.mxu1  ;;  %v785_v53 = vmul.f32 %v773_v38, %v718_v1 }
  0xef   : > { %v720_v21 = vpop.f32.mrf.mxu0  ;;  %v810_v4 = vadd.f32 %v804_v39, %v787_v48 }
  0xf0   : > { %v764_v16 = vpop.f32.mrf.mxu1  ;;  %v786_v58 = vmul.f32 %v777_v40, %v720_v21  ;;  %v808_v9 = vadd.f32 %v796_v44, %v785_v53  ;;  %v1449_v21 = vunpack.c.h.bf16 %v2239_v56 }
  0xf1   : > { %v722_v24 = vpop.f32.mrf.mxu0  ;;  %v790_v59 = vmul.f32 %v781_v33, %v764_v16 }
  0xf2   : > { %v1694_v17 = vpop.f32.mrf.mxu1  ;;  %v788_v63 = vmul.f32 %v773_v38, %v722_v24  ;;  %v809_v14 = vadd.f32 %v800_v45, %v786_v58 }
  0xf3   : > { %v724_v26 = vpop.f32.mrf.mxu0  ;;  %v813_v15 = vadd.f32 %v804_v39, %v790_v59  ;;  %v1445_v17 = vunpack.c.h.bf16 %v2244_v62 }
  0xf4   : > { %v789_v5 = vmul.f32 %v777_v40, %v724_v26  ;;  %v814_v26 = vmax.f32 %v808_v9, 0.0  ;;  %v815_v31 = vmax.f32 %v809_v14, 0.0 }
  0xf5   : > { %v819_v32 = vmax.f32 %v813_v15, 0.0 }
  0xf6   : > { %v812_v23 = vadd.f32 %v800_v45, %v789_v5 }
 0x10c   : > { %v1065_v18 = vpop.f32.mrf.mxu1 }
 0x10d   : > { %v1022_v28 = vpop.f32.mrf.mxu0  ;;  %v1091_v49 = vmul.f32 %v1085_v35, %v1065_v18  ;;  %v811_v18 = vadd.f32 %v796_v44, %v788_v63 }
 0x10e   : > { %v1713_v19 = vpop.f32.mrf.mxu1  ;;  %v1089_v60 = vmul.f32 %v1077_v41, %v1022_v28 }
 0x10f   : > { %v1024_v37 = vpop.f32.mrf.mxu0  ;;  %v1114_v6 = vadd.f32 %v1108_v46, %v1091_v49  ;;  %v817_v36 = vmax.f32 %v811_v18, 0.0 }
 0x110   : > { %v1068_v20 = vpop.f32.mrf.mxu1  ;;  %v1090_v0 = vmul.f32 %v1081_v47, %v1024_v37  ;;  %v1112_v16 = vadd.f32 %v1100_v50, %v1089_v60 }
 0x111   : > { %v1026_v52 = vpop.f32.mrf.mxu0  ;;  %v1094_v10 = vmul.f32 %v1085_v35, %v1068_v20  ;;  %v1120_v24 = vmax.f32 %v1114_v6, 0.0  ;;  %v1447_v20 = vunpack.c.l.bf16 %v2253_v13 }
 0x112   : > { %v1714_v22 = vpop.f32.mrf.mxu1  ;;  %v1092_v11 = vmul.f32 %v1077_v41, %v1026_v52  ;;  %v1113_v1 = vadd.f32 %v1104_v51, %v1090_v0  ;;  %v1118_v33 = vmax.f32 %v1112_v16, 0.0  ;;  %v818_v41 = vmax.f32 %v812_v23, 0.0 }
 0x113   : > { %v1028_v7 = vpop.f32.mrf.mxu0  ;;  %v816_v22 = vmax.f32 %v810_v4, 0.0  ;;  %v1117_v27 = vadd.f32 %v1108_v46, %v1094_v10 }
 0x114   : > { %v1093_v19 = vmul.f32 %v1081_v47, %v1028_v7  ;;  %v1115_v28 = vadd.f32 %v1100_v50, %v1092_v11  ;;  %v1119_v37 = vmax.f32 %v1113_v1, 0.0  ;;  %v1124_v52 = vadd.f32 %v1118_v33, %v814_v26 }
 0x115   : > { %v1126_v42 = vadd.f32 %v1120_v24, %v816_v22  ;;  %v1123_v46 = vmax.f32 %v1117_v27, 0.0 }
 0x116   : > { %v1116_v38 = vadd.f32 %v1104_v51, %v1093_v19  ;;  %v1121_v47 = vmax.f32 %v1115_v28, 0.0  ;;  %v1125_v60 = vadd.f32 %v1119_v37, %v815_v31  ;;  %v1448_v19 = vunpack.c.h.bf16 %v2253_v13 }
 0x117   : > { %v1129_v10 = vadd.f32 %v1123_v46, %v819_v32 }
 0x118   : > { %v1122_v63 = vmax.f32 %v1116_v38, 0.0  ;;  %v1127_v11 = vadd.f32 %v1121_v47, %v817_v36 }
 0x11a   : > { %v1128_v22 = vadd.f32 %v1122_v63, %v818_v41 }
 0x12c   : > { %v1375_v25 = vpop.f32.mrf.mxu1 }
 0x12d   : > { %v1401_v29 = vmul.f32 %v1395_v54, %v1375_v25  ;;  %v1332_v30 = vpop.f32.mrf.mxu0 }
 0x12e   : > { %v1399_v34 = vmul.f32 %v1387_v57, %v1332_v30  ;;  %v1733_v35 = vpop.f32.mrf.mxu1 }
 0x12f   : > { %v1424_v39 = vadd.f32 %v2236_v55, %v1401_v29  ;;  %v1334_v40 = vpop.f32.mrf.mxu0 }
 0x130   : > { %v1422_v43 = vadd.f32 %v2241_v61, %v1399_v34  ;;  %v1400_v44 = vmul.f32 %v2246_v2, %v1334_v40  ;;  %v1378_v45 = vpop.f32.mrf.mxu1 }
 0x131   : > { %v1430_v48 = vmax.f32 %v1424_v39, 0.0  ;;  %v1404_v49 = vmul.f32 %v1395_v54, %v1378_v45  ;;  %v1336_v50 = vpop.f32.mrf.mxu0 }
 0x132   : > { %v1428_v53 = vmax.f32 %v1422_v43, 0.0  ;;  %v1423_v51 = vadd.f32 %v2248_v3, %v1400_v44  ;;  %v1402_v58 = vmul.f32 %v1387_v57, %v1336_v50  ;;  %v1734_v59 = vpop.f32.mrf.mxu1 }
 0x133   : > { %v1436_v0 = vadd.f32 %v1430_v48, %v1126_v42  ;;  %v1427_v4 = vadd.f32 %v2236_v55, %v1404_v49  ;;  %v1338_v5 = vpop.f32.mrf.mxu0 }
 0x134   : > { %v1434_v6 = vadd.f32 %v1428_v53, %v1124_v52  ;;  %v1429_v7 = vmax.f32 %v1423_v51, 0.0  ;;  %v1425_v54 = vadd.f32 %v2241_v61, %v1402_v58  ;;  %v1403_v9 = vmul.f32 %v2246_v2, %v1338_v5 }
 0x135   : > { %v1452_v57 = vadd.f32 %v1446_v8, %v1436_v0  ;;  %v1433_v14 = vmax.f32 %v1427_v4, 0.0 }
 0x136   : > { %v1450_v15 = vadd.f32 %v1444_v12, %v1434_v6  ;;  %v1435_v16 = vadd.f32 %v1429_v7, %v1125_v60  ;;  %v1431_v18 = vmax.f32 %v1425_v54, 0.0  ;;  %v1426_v55 = vadd.f32 %v2248_v3, %v1403_v9 }
 0x137   : > { %1458 = vst [vmem:[%s513_s21 + $0x10] sm:$0xff] %v1452_v57  ;;  %v1439_v1 = vadd.f32 %v1433_v14, %v1129_v10 }
 0x138   : > { %1456 = vst [vmem:[%s513_s21] sm:$0xff] %v1450_v15  ;;  %v1451_v61 = vadd.f32 %v1445_v17, %v1435_v16  ;;  %v1437_v23 = vadd.f32 %v1431_v18, %v1127_v11  ;;  %v1432_v2 = vmax.f32 %v1426_v55, 0.0 }
 0x139   : > { %v1455_v8 = vadd.f32 %v1449_v21, %v1439_v1 }
 0x13a   : > { %1457 = vst [vmem:[%s513_s21 + $0x8] sm:$0xff] %v1451_v61  ;;  %v1453_v12 = vadd.f32 %v1447_v20, %v1437_v23  ;;  %v1438_v24 = vadd.f32 %v1432_v2, %v1128_v22 }
 0x13b   : > { %1461 = vst [vmem:[%s513_s21 + $0x28] sm:$0xff] %v1455_v8 }
 0x13c   : > { %1459 = vst [vmem:[%s513_s21 + $0x18] sm:$0xff] %v1453_v12  ;;  %v1454_v3 = vadd.f32 %v1448_v19, %v1438_v24 }
 0x13e   : > { %1460 = vst [vmem:[%s513_s21 + $0x20] sm:$0xff] %v1454_v3 }
 0x13f PF: > { %s23_s25 = sadd.s32 1, %s1853_s25  }
 0x140   : > { %p20_p4 = scmp.ge.s32.totalorder %s23_s25, 4  }
 0x142   :  { %22 = sbr.rel (!%p20_p4) target bundleno = 1 (0x1), region = 111 }

// kernel: inception_a.8
= control target key start
LH: loop header
LB: loop body
LE: loop exit
PB: predicated region body
PF: predicated region fallthrough
CT: control target
= control target key end

     0   :  { %s1484_s15 = smov 0   ;;  %s1486_s16 = smov 0   ;;  %s1688_s0 = inlined_call_operand.vmem [shape: bf16[9,32,48], index: 0, kind: input, shape index: {}]   ;;  %s1689_s1 = inlined_call_operand.vmem [shape: bf16[9,48,128], index: 1, kind: input, shape index: {}]   ;;  %s1690_s2 = inlined_call_operand.vmem [shape: f32[1,128], index: 2, kind: input, shape index: {}]   ;;  %s1691_s3 = inlined_call_operand.vmem [shape: f32[1,128], index: 3, kind: input, shape index: {}]   ;;  %s1692_s4 = inlined_call_operand.vmem [shape: bf16[32,128], index: 4, kind: output, shape index: {}]  }
   0x1   :  { %s1488_s17 = smov 0  }
   0x2 LB: > { %s1111_s18 = sadd.s32 4294967295, %s1455_s17   ;;  %s1501_s19 = sadd.s32 1, %s1455_s17   ;;  %s1455_s17 = sphi %s1488_s17, %s1695_s17   ;;  %s1451_s16 = sphi %s1486_s16, %s1694_s16   ;;  %s1447_s15 = sphi %s1484_s15, %s1693_s15  }
   0x3   : > { %s18_s20 = ssub.s32 %s1455_s17, %s1501_s19  ;;  %s21_s21 = sadd.s32 1, %s1451_s16 }
   0x4   : > { %p19_p0 = scmp.eq.s32.totalorder %s18_s20, 0  ;;  %p28_p1 = scmp.ne.s32.totalorder %s1451_s16, %s1447_s15 }
   0x5   : > { %p29_p2 = scmp.eq.s32.totalorder %s1455_s17, 0  ;;  %p1114_p4 = scmp.ge.s32.totalorder %s1455_s17, 2 }
   0x6   : > { %s1510_s22 = scalar_select %p19_p0, %s1451_s16, %s21_s21  }
   0x7   : > { %p30_p3 = por %p29_p2, %p28_p1  ;;  %152 = sbr.rel (%p1114_p4) target bundleno = 21 (0x15), region = 28 }
   0xc   : > { %155 = sbr.rel (!%p30_p3) target bundleno = 21 (0x15), region = 32  ;;  %s157_s23 = sand.u32 (%p30_p3), 1, %s1451_s16  }
   0xd   : > { %s1235_s24 = sshll.u32 (%p30_p3), %s1455_s17, 3  ;;  %s1369_s25 = smul.u32 (%p30_p3), 72, %s157_s23 }
   0xe   : > { %s162_s28 = scalar_lea.vmem (%p30_p3), %s1688_s0, %s1235_s24 }
   0xf   : > { %v179_v0 = vld [vmem:[%s162_s28] sm:$0xff] (%p30_p3)   ;;  %v183_v1 = vld [vmem:[%s162_s28 + $0x10] sm:$0xff] (%p30_p3)   ;;  %s159_s29 = scalar_lea.vmem (%p30_p3), [#allocation2], %s1369_s25 }
  0x10   : > { %v187_v2 = vld [vmem:[%s162_s28 + $0x20] sm:$0xff] (%p30_p3)   ;;  %v191_v3 = vld [vmem:[%s162_s28 + $0x30] sm:$0xff] (%p30_p3)   ;;  %180 = vst [vmem:[%s159_s29] sm:$0xff] (%p30_p3), %v179_v0   ;;  %184 = vst [vmem:[%s159_s29 + $0x8] sm:$0xff] (%p30_p3), %v183_v1  }
  0x11   : > { %v195_v4 = vld [vmem:[%s162_s28 + $0x40] sm:$0xff]   ;;  %v199_v5 = vld [vmem:[%s162_s28 + $0x50] sm:$0xff]   ;;  %188 = vst [vmem:[%s159_s29 + $0x10] sm:$0xff] %v187_v2   ;;  %192 = vst [vmem:[%s159_s29 + $0x18] sm:$0xff] %v191_v3  }
  0x12   : > { %196 = vst [vmem:[%s159_s29 + $0x20] sm:$0xff] %v195_v4   ;;  %200 = vst [vmem:[%s159_s29 + $0x28] sm:$0xff] %v199_v5   ;;  %v203_v6 = vld [vmem:[%s162_s28 + $0x60] sm:$0xff]   ;;  %v207_v7 = vld [vmem:[%s162_s28 + $0x70] sm:$0xff]  }
  0x13   : > { %v211_v8 = vld [vmem:[%s162_s28 + $0x80] sm:$0xff]   ;;  %204 = vst [vmem:[%s159_s29 + $0x30] sm:$0xff] %v203_v6   ;;  %208 = vst [vmem:[%s159_s29 + $0x38] sm:$0xff] %v207_v7  }
  0x14   : > { %212 = vst [vmem:[%s159_s29 + $0x40] sm:$0xff] %v211_v8  }
  0x15 PF: > { %p1117_p5 = scmp.ge.s32.totalorder %s1455_s17, 1  ;;  %p273_p6 = scmp.lt.s32.totalorder %s1455_s17, 3 }
  0x17   : > { %p274_p7 = pnand %p1117_p5, %p273_p6 }
  0x18   : > { %s280_s10 = sand.u32 (!%p274_p7), 1, %s1447_s15  }
  0x19   : > { %277 = sbr.rel (%p274_p7) target bundleno = 299 (0x12b), region = 73 }
  0x1a   : > { %s1370_s13 = smul.u32 (!%p274_p7), 72, %s280_s10 }
  0x1c   : > { %s1544_s21 = scalar_lea.vmem (!%p274_p7), [#allocation2], %s1370_s13 }
  0x1e   : > { %v1397_v9 = vld [vmem:[%s1689_s1 + $0x28] sm:$0xff]   ;;  %v1457_v10 = vmov 0.0   ;;  %v1398_v11 = vld [vmem:[%s1689_s1 + $0x10] sm:$0xff]   ;;  %v1399_v12 = vld [vmem:[%s1689_s1 + $0x20] sm:$0xff]   ;;  %vm1458_vm0 = vmmov 0   ;;  %vm354_vm1 = vcmask 392192  }
  0x1f   : > { %1279 = vmatprep.subr.bf16.mxu0 %v1457_v10  ;;  %1289 = vmatprep.subr.bf16.mxu1 %v1457_v10  ;;  %v1400_v13 = vld [vmem:[%s1689_s1 + $0x8] sm:$0xff]   ;;  %v1401_v14 = vld [vmem:[%s1689_s1 + $0x18] sm:$0xff]   ;;  %v1402_v15 = vld [vmem:[%s1689_s1] sm:$0xff]  }
  0x20   : > { %1280 = vmatpush3.bf16.msra.mxu0 %v1397_v9  ;;  %1285 = vmatprep.mubr.msk.bf16.mxu0 %vm1458_vm0, %v1457_v10  ;;  %v1403_v16 = vld [vmem:[%s1544_s21 + $0x8] sm:$0xff]   ;;  %v1404_v17 = vld [vmem:[%s1544_s21] sm:$0xff]   ;;  %v1406_v19 = vld [vmem:[%s1689_s1 + $0x58] sm:$0xff]  }
  0x21   : > { %1290 = vmatpush3.bf16.msra.mxu1 %v1398_v11  ;;  %1281 = vmatprep.subr.bf16.mxu0 %v1457_v10  ;;  %v1405_v18 = vld [vmem:[%s1689_s1 + $0x40] sm:$0xff]   ;;  %v1407_v20 = vld [vmem:[%s1689_s1 + $0x38] sm:$0xff]   ;;  %v1408_v21 = vld [vmem:[%s1689_s1 + $0x50] sm:$0xff]  }
  0x22   : > { %1291 = vmatprep.subr.bf16.mxu1 %v1457_v10  ;;  %1295 = vmatprep.mubr.msk.bf16.mxu1 %vm1458_vm0, %v1457_v10  ;;  %v1409_v22 = vld [vmem:[%s1689_s1 + $0x30] sm:$0xff]   ;;  %v1410_v23 = vld [vmem:[%s1689_s1 + $0x48] sm:$0xff]   ;;  %v1413_v26 = vld [vmem:[%s1544_s21 + $0x18] sm:$0xff]  }
  0x23   : > { %v1411_v24 = vld [vmem:[%s1544_s21 + $0x10] sm:$0xff]   ;;  %v1414_v27 = vld [vmem:[%s1689_s1 + $0x88] sm:$0xff]   ;;  %v1416_v29 = vld [vmem:[%s1689_s1 + $0x80] sm:$0xff]  }
  0x24   : > { %1282 = vmatpush3.bf16.msra.mxu0 %v1399_v12  ;;  %v1412_v25 = vld [vmem:[%s1689_s1 + $0x70] sm:$0xff]   ;;  %v1415_v28 = vld [vmem:[%s1689_s1 + $0x68] sm:$0xff]   ;;  %v1417_v30 = vld [vmem:[%s1689_s1 + $0x60] sm:$0xff]  }
  0x25   : > { %1292 = vmatpush3.bf16.msra.mxu1 %v1400_v13  ;;  %1283 = vmatprep.subr.bf16.mxu0 %v1457_v10  ;;  %v1418_v31 = vld [vmem:[%s1689_s1 + $0x78] sm:$0xff]   ;;  %v1419_v32 = vld [vmem:[%s1544_s21 + $0x20] sm:$0xff]   ;;  %v1421_v34 = vld [vmem:[%s1544_s21 + $0x28] sm:$0xff]  }
  0x26   : > { %1293 = vmatprep.subr.bf16.mxu1 %v1457_v10  ;;  %v1420_v33 = vld [vmem:[%s1689_s1 + $0xa0] sm:$0xff]   ;;  %v1422_v35 = vld [vmem:[%s1689_s1 + $0xb8] sm:$0xff]   ;;  %v1424_v37 = vld [vmem:[%s1689_s1 + $0xb0] sm:$0xff]  }
  0x27   : > { %v1423_v36 = vld [vmem:[%s1689_s1 + $0x98] sm:$0xff]   ;;  %v1425_v38 = vld [vmem:[%s1689_s1 + $0x90] sm:$0xff]   ;;  %v1426_v39 = vld [vmem:[%s1689_s1 + $0xa8] sm:$0xff]  }
  0x28   : > { %1284 = vmatpush3.bf16.msra.mxu0 %v1401_v14  ;;  %v1427_v40 = vld [vmem:[%s1544_s21 + $0x30] sm:$0xff]   ;;  %v1429_v42 = vld [vmem:[%s1544_s21 + $0x38] sm:$0xff]   ;;  %v1430_v43 = vld [vmem:[%s1689_s1 + $0xc8] sm:$0xff]  }
  0x29   : > { %1294 = vmatpush3.bf16.msra.mxu1 %v1402_v15  ;;  %1299 = vmatprep.subr.bf16.mxu0 %v1457_v10  ;;  %v1428_v41 = vld [vmem:[%s1689_s1 + $0xd0] sm:$0xff]   ;;  %v1431_v44 = vld [vmem:[%s1689_s1 + $0xc0] sm:$0xff]  }
  0x2a   : > { %1309 = vmatprep.subr.bf16.mxu1 %v1457_v10  ;;  %v1432_v45 = vld [vmem:[%s1544_s21 + $0x40] sm:$0xff]   ;;  %s1118_s21 = sshll.u32 %s1111_s18, 1 }
  0x2b   : > { %1286 = vmatmul.mubr.msk.bf16.vlgmr.msra.gmra.mxu0 %vm354_vm1, %v1403_v16  ;;  %p307_p8 = scmp.lt.s32.totalorder %s1118_s21, 3 }
  0x2c   : > { %1296 = vmatmul.mubr.msk.bf16.vlgmr.msra.gmra.mxu1 %vm354_vm1, %v1404_v17  ;;  %1300 = vmatpush3.bf16.msra.mxu0 %v1405_v18 }
  0x2d   : > { %1310 = vmatpush3.bf16.msra.mxu1 %v1406_v19  ;;  %1301 = vmatprep.subr.bf16.mxu0 %v1457_v10  ;;  %s1697_s21 = smov (!%p307_p8, %s1118_s21), 3 }
  0x2e   : > { %1311 = vmatprep.subr.bf16.mxu1 %v1457_v10  ;;  %1305 = vmatprep.mubr.msk.bf16.mxu0 %vm1458_vm0, %v1457_v10  ;;  %s1119_s17 = sshll.u32 %s1697_s21, 2 }
  0x2f   : > { %1315 = vmatprep.mubr.msk.bf16.mxu1 %vm1458_vm0, %v1457_v10  ;;  %s310_s5 = scalar_lea.vmem %s1692_s4, %s1119_s17 }
  0x30   : > { %1302 = vmatpush3.bf16.msra.mxu0 %v1407_v20 }
  0x31   : > { %1312 = vmatpush3.bf16.msra.mxu1 %v1408_v21  ;;  %1303 = vmatprep.subr.bf16.mxu0 %v1457_v10 }
  0x32   : > { %1313 = vmatprep.subr.bf16.mxu1 %v1457_v10 }
  0x34   : > { %1304 = vmatpush3.bf16.msra.mxu0 %v1409_v22 }
  0x35   : > { %1314 = vmatpush3.bf16.msra.mxu1 %v1410_v23  ;;  %1319 = vmatprep.subr.bf16.mxu0 %v1457_v10 }
  0x36   : > { %1329 = vmatprep.subr.bf16.mxu1 %v1457_v10 }
  0x37   : > { %1306 = vmatmul.mubr.msk.bf16.vlgmr.msra.gmra.mxu0 %vm354_vm1, %v1411_v24 }
  0x38   : > { %1320 = vmatpush3.bf16.msra.mxu0 %v1412_v25  ;;  %1316 = vmatmul.mubr.msk.bf16.vlgmr.msra.gmra.mxu1 %vm354_vm1, %v1413_v26 }
  0x39   : > { %1330 = vmatpush3.bf16.msra.mxu1 %v1414_v27  ;;  %1321 = vmatprep.subr.bf16.mxu0 %v1457_v10 }
  0x3a   : > { %1331 = vmatprep.subr.bf16.mxu1 %v1457_v10  ;;  %1325 = vmatprep.mubr.msk.bf16.mxu0 %vm1458_vm0, %v1457_v10 }
  0x3b   : > { %1335 = vmatprep.mubr.msk.bf16.mxu1 %vm1458_vm0, %v1457_v10 }
  0x3c   : > { %1322 = vmatpush3.bf16.msra.mxu0 %v1415_v28  ;;  %v1229_v28 = vld [vmem:[%s1690_s2] ss:$0 sm:$0xff] }
  0x3d   : > { %1332 = vmatpush3.bf16.msra.mxu1 %v1416_v29  ;;  %1323 = vmatprep.subr.bf16.mxu0 %v1457_v10 }
  0x3e   : > { %1333 = vmatprep.subr.bf16.mxu1 %v1457_v10 }
  0x40   : > { %1324 = vmatpush3.bf16.msra.mxu0 %v1417_v30 }
  0x41   : > { %1334 = vmatpush3.bf16.msra.mxu1 %v1418_v31  ;;  %1339 = vmatprep.subr.bf16.mxu0 %v1457_v10 }
  0x42   : > { %1349 = vmatprep.subr.bf16.mxu1 %v1457_v10 }
  0x43   : > { %1326 = vmatmul.mubr.msk.bf16.vlgmr.msra.gmra.mxu0 %vm354_vm1, %v1419_v32 }
  0x44   : > { %1340 = vmatpush3.bf16.msra.mxu0 %v1420_v33  ;;  %1336 = vmatmul.mubr.msk.bf16.vlgmr.msra.gmra.mxu1 %vm354_vm1, %v1421_v34  ;;  %v1230_v33 = vld [vmem:[%s1691_s3] ss:$0 sm:$0xff] }
  0x45   : > { %1350 = vmatpush3.bf16.msra.mxu1 %v1422_v35  ;;  %1341 = vmatprep.subr.bf16.mxu0 %v1457_v10 }
  0x46   : > { %1351 = vmatprep.subr.bf16.mxu1 %v1457_v10  ;;  %1345 = vmatprep.mubr.msk.bf16.mxu0 %vm1458_vm0, %v1457_v10 }
  0x47   : > { %1355 = vmatprep.mubr.msk.bf16.mxu1 %vm1458_vm0, %v1457_v10 }
  0x48   : > { %1342 = vmatpush3.bf16.msra.mxu0 %v1423_v36 }
  0x49   : > { %1352 = vmatpush3.bf16.msra.mxu1 %v1424_v37  ;;  %1343 = vmatprep.subr.bf16.mxu0 %v1457_v10 }
  0x4a   : > { %1353 = vmatprep.subr.bf16.mxu1 %v1457_v10 }
  0x4c   : > { %1344 = vmatpush3.bf16.msra.mxu0 %v1425_v38 }
  0x4d   : > { %1354 = vmatpush3.bf16.msra.mxu1 %v1426_v39  ;;  %1359 = vmatprep.subr.bf16.mxu0 %v1457_v10 }
  0x4f   : > { %1346 = vmatmul.mubr.msk.bf16.vlgmr.msra.gmra.mxu0 %vm354_vm1, %v1427_v40 }
  0x50   : > { %1360 = vmatpush3.bf16.msra.mxu0 %v1428_v41  ;;  %1356 = vmatmul.mubr.msk.bf16.vlgmr.msra.gmra.mxu1 %vm354_vm1, %v1429_v42 }
  0x51   : > { %1361 = vmatprep.subr.bf16.mxu0 %v1457_v10  ;;  %1365 = vmatprep.mubr.msk.bf16.mxu0 %vm1458_vm0, %v1457_v10 }
  0x54   : > { %1362 = vmatpush3.bf16.msra.mxu0 %v1430_v43 }
  0x55   : > { %1363 = vmatprep.subr.bf16.mxu0 %v1457_v10 }
  0x58   : > { %1364 = vmatpush3.bf16.msra.mxu0 %v1431_v44 }
  0x5b   : > { %1366 = vmatmul.mubr.msk.bf16.vlgmr.msra.gmra.mxu0 %vm354_vm1, %v1432_v45 }
  0xeb   : > { %v392_v46 = vpop.f32.mrf.mxu0 }
  0xec   : > { %v459_v47 = vpop.f32.mrf.mxu1 }
  0xed   : > { %v1287_v48 = vpop.f32.mrf.mxu0  ;;  %v460_v3 = vadd.f32 %v459_v47, %v392_v46 }
  0xee   : > { %v1297_v49 = vpop.f32.mrf.mxu1 }
  0xef   : > { %v395_v50 = vpop.f32.mrf.mxu0 }
  0xf0   : > { %v462_v51 = vpop.f32.mrf.mxu1 }
  0xf1   : > { %v1288_v52 = vpop.f32.mrf.mxu0  ;;  %v463_v8 = vadd.f32 %v462_v51, %v395_v50 }
  0xf2   : > { %v1298_v53 = vpop.f32.mrf.mxu1 }
  0xf7   : > { %v536_v54 = vpop.f32.mrf.mxu0 }
  0xf8   : > { %v615_v55 = vpop.f32.mrf.mxu1  ;;  %v543_v6 = vadd.f32 %v536_v54, %v460_v3 }
  0xf9   : > { %v1307_v56 = vpop.f32.mrf.mxu0 }
  0xfa   : > { %v1317_v57 = vpop.f32.mrf.mxu1  ;;  %v622_v9 = vadd.f32 %v615_v55, %v543_v6 }
  0xfb   : > { %v539_v58 = vpop.f32.mrf.mxu0 }
  0xfc   : > { %v618_v59 = vpop.f32.mrf.mxu1  ;;  %v544_v10 = vadd.f32 %v539_v58, %v463_v8 }
  0xfd   : > { %v1308_v60 = vpop.f32.mrf.mxu0 }
  0xfe   : > { %v1318_v61 = vpop.f32.mrf.mxu1  ;;  %v623_v15 = vadd.f32 %v618_v59, %v544_v10 }
 0x103   : > { %v694_v62 = vpop.f32.mrf.mxu0 }
 0x104   : > { %v773_v63 = vpop.f32.mrf.mxu1  ;;  %v701_v12 = vadd.f32 %v694_v62, %v622_v9 }
 0x105   : > { %v1327_v0 = vpop.f32.mrf.mxu0 }
 0x106   : > { %v1337_v1 = vpop.f32.mrf.mxu1  ;;  %v780_v18 = vadd.f32 %v773_v63, %v701_v12 }
 0x107   : > { %v697_v2 = vpop.f32.mrf.mxu0 }
 0x108   : > { %v776_v4 = vpop.f32.mrf.mxu1  ;;  %v702_v19 = vadd.f32 %v697_v2, %v623_v15 }
 0x109   : > { %v1328_v5 = vpop.f32.mrf.mxu0 }
 0x10a   : > { %v1338_v7 = vpop.f32.mrf.mxu1  ;;  %v781_v24 = vadd.f32 %v776_v4, %v702_v19 }
 0x10f   : > { %v852_v11 = vpop.f32.mrf.mxu0 }
 0x110   : > { %v931_v13 = vpop.f32.mrf.mxu1  ;;  %v859_v22 = vadd.f32 %v852_v11, %v780_v18 }
 0x111   : > { %v1347_v14 = vpop.f32.mrf.mxu0 }
 0x112   : > { %v1357_v16 = vpop.f32.mrf.mxu1  ;;  %v938_v25 = vadd.f32 %v931_v13, %v859_v22 }
 0x113   : > { %v855_v17 = vpop.f32.mrf.mxu0 }
 0x114   : > { %v934_v20 = vpop.f32.mrf.mxu1  ;;  %v860_v26 = vadd.f32 %v855_v17, %v781_v24 }
 0x115   : > { %v1348_v21 = vpop.f32.mrf.mxu0 }
 0x116   : > { %v1358_v23 = vpop.f32.mrf.mxu1  ;;  %v939_v31 = vadd.f32 %v934_v20, %v860_v26 }
 0x11b   : > { %v1010_v27 = vpop.f32.mrf.mxu0 }
 0x11c   : > { %v1017_v29 = vadd.f32 %v1010_v27, %v938_v25 }
 0x11d   : > { %v1367_v30 = vpop.f32.mrf.mxu0 }
 0x11e   : > { %v1026_v32 = vmul.f32 %v1229_v28, %v1017_v29 }
 0x11f   : > { %v1013_v34 = vpop.f32.mrf.mxu0 }
 0x120   : > { %v1018_v35 = vadd.f32 %v1013_v34, %v939_v31  ;;  %v1035_v37 = vadd.f32 %v1230_v33, %v1026_v32 }
 0x121   : > { %v1368_v36 = vpop.f32.mrf.mxu0 }
 0x122   : > { %v1027_v38 = vmul.f32 %v1229_v28, %v1018_v35  ;;  %v1037_v40 = vmax.f32 %v1035_v37, 0.0 }
 0x124   : > { %v1036_v39 = vadd.f32 %v1230_v33, %v1027_v38 }
 0x126   : > { %v1038_v41 = vmax.f32 %v1036_v39, 0.0 }
 0x128   : > { %v1241_v42 = vpack.c.bf16 %v1038_v41, %v1037_v40 }
 0x12a   : > { %1242 = vst [vmem:[%s310_s5] sm:$0xff] %v1241_v42  }
 0x12b PF: > { %p11_p9 = scmp.ge.s32.totalorder %s1501_s19, 4   ;;  %s1693_s15 = smov %s1451_s16 }
 0x12c   : > { %s1694_s16 = smov %s1510_s22  ;;  %s1695_s17 = smov %s1501_s19 }
 0x12d   :  { %13 = sbr.rel (!%p11_p9) target bundleno = 2 (0x2), region = 128 }

</bundles_post_ra>
